<compile_context>
chip_gen: v6e
topology: v6e:2x2x1
jax: 0.10.0
libtpu: 0.0.40
codegen_flags: <defaults>
</compile_context>

<pallas_src>
import math
import functools

import jax
import jax.numpy as jnp
from jax.experimental import pallas as pl
from jax.experimental.pallas import tpu as pltpu

LANES = 128
# Large finite negative instead of -inf: keeps the online-softmax update
# NaN-free even for rows whose current (later-in-run) block is fully masked.
DEFAULT_MASK_VALUE = -0.7 * float(jnp.finfo(jnp.float32).max)


def _rep_lanes(x, n):
    """x: (rows, LANES) lane-replicated (all lanes equal per row) -> (rows, n)."""
    if n == LANES:
        return x
    if n < LANES:
        return x[:, :n]
    if n % LANES == 0:
        return jnp.tile(x, (1, n // LANES))
    return jnp.broadcast_to(x[:, :1], (x.shape[0], n))


def _to_rep(x1):
    """x1: (rows, 1) -> lane-replicated (rows, LANES)."""
    return jnp.broadcast_to(x1, (x1.shape[0], LANES))


def _has_bf16_eup():
    """bf16 transcendentals exist on v6e / v7x; fall back to f32 elsewhere."""
    try:
        kind = jax.devices()[0].device_kind.lower()
    except Exception:
        return False
    return any(tag in kind for tag in ("v6", "v7", "7x"))


def _flash_attn_kernel(qi_tab, ki_tab, last_tab, mask_tab,
                       q_ref, k_ref, v_ref, o_ref,
                       m_sc, l_sc, acc_sc,
                       *, scale, fold_scale, causal, use_bf16_exp,
                       tq, tk, group, head_dim):
    t = pl.program_id(2)
    qi = qi_tab[t]
    ki = ki_tab[t]

    # First kv step of this query block's run (the schedule always starts a
    # run at ki == 0, which contains unmasked columns for every query row, so
    # m/l are always initialized from real data -- keep this invariant if the
    # schedule generation changes).
    @pl.when(ki == 0)
    def _():
        m_sc[...] = jnp.full(m_sc.shape, DEFAULT_MASK_VALUE, m_sc.dtype)
        l_sc[...] = jnp.zeros(l_sc.shape, l_sc.dtype)
        acc_sc[...] = jnp.zeros(acc_sc.shape, acc_sc.dtype)

    def body(apply_mask):
        q_all = q_ref[0]                       # (tq, group*head_dim)
        if fold_scale:
            q_all = q_all * scale              # exact: scale is a power of two
        k_all = k_ref[0]                       # (tk, group*head_dim)
        v_all = v_ref[0]

        if apply_mask:
            # (tq,1) vs (1,tk) iotas; broadcast happens in the compare, so no
            # full (tq,tk) int32 tiles are materialized.
            row = qi * tq + jax.lax.broadcasted_iota(jnp.int32, (tq, 1), 0)
            col = ki * tk + jax.lax.broadcasted_iota(jnp.int32, (1, tk), 1)
            keep = col <= row                  # (tq, tk) bool

        for h in range(group):                 # static unroll over the group
            lo = h * head_dim
            qh = q_all[:, lo:lo + head_dim]
            kh = k_all[:, lo:lo + head_dim]
            vh = v_all[:, lo:lo + head_dim]

            # scores: (tq, tk) accumulated in f32 on the MXU
            s = jax.lax.dot_general(qh, kh, (((1,), (1,)), ((), ())),
                                    preferred_element_type=jnp.float32)
            if not fold_scale:
                s = s * scale                  # f32 scale: no bf16 rounding
            if apply_mask:
                s = jnp.where(keep, s, DEFAULT_MASK_VALUE)

            # online softmax update, lane-replicated m/l scratch
            m_prev = m_sc[h]                                   # (tq, LANES)
            l_prev = l_sc[h]
            m_curr = jnp.max(s, axis=-1, keepdims=True)        # (tq, 1)
            m_next = jnp.maximum(m_prev, m_curr)               # (tq, LANES)
            alpha = jnp.exp(m_prev - m_next)                   # (tq, LANES)
            s_shift = s - _rep_lanes(m_next, tk)               # (tq, tk) f32
            if use_bf16_exp:
                p = jnp.exp(s_shift.astype(jnp.bfloat16))      # EUP bf16
                l_curr = jnp.sum(p, axis=-1, keepdims=True, dtype=jnp.float32)
                p_mm = p
            else:
                p = jnp.exp(s_shift)                           # EUP f32
                l_curr = jnp.sum(p, axis=-1, keepdims=True)
                p_mm = p.astype(vh.dtype)
            l_sc[h] = alpha * l_prev + _to_rep(l_curr)
            acc_sc[h] = (_rep_lanes(alpha, head_dim) * acc_sc[h]
                         + jnp.dot(p_mm, vh,
                                   preferred_element_type=jnp.float32))
            m_sc[h] = m_next

    if causal:
        needs_mask = mask_tab[t] == 1
        pl.when(needs_mask)(lambda: body(True))                 # diagonal blocks
        pl.when(jnp.logical_not(needs_mask))(lambda: body(False))  # fast path
        # Fully-masked blocks never appear in the schedule at all.
    else:
        body(False)

    @pl.when(last_tab[t] == 1)
    def _():
        outs = []
        for h in range(group):
            inv_l = pl.reciprocal(l_sc[h], approx=True)         # EUP slot
            outs.append((acc_sc[h] * _rep_lanes(inv_l, head_dim))
                        .astype(o_ref.dtype))
        # Lane-dense (tq, group*head_dim) slab -> unmasked 128-wide stores.
        o_ref[0] = outs[0] if group == 1 else jnp.concatenate(outs, axis=-1)


def _make_schedule(nq, nk, tq, tk, causal):
    """Flattened (qi, ki) schedule; causal blocks past the diagonal omitted."""
    qi_l, ki_l, last_l, mask_l = [], [], [], []
    for qi in range(nq):
        last_ki = min(nk - 1, (qi * tq + tq - 1) // tk) if causal else nk - 1
        for ki in range(last_ki + 1):
            qi_l.append(qi)
            ki_l.append(ki)
            last_l.append(1 if ki == last_ki else 0)
            needs = causal and (ki * tk + tk - 1 > qi * tq)
            mask_l.append(1 if needs else 0)
    mk = lambda xs: jnp.asarray(xs, dtype=jnp.int32)
    return mk(qi_l), mk(ki_l), mk(last_l), mk(mask_l)


def flash_self_attention(q, k, v, causal=None, softmax_scale=None,
                         block_q=512, block_k=256, use_bf16_exp=None):
    """q, k, v: (B, S, H, D) bf16/fp16. Returns (B, Sq, H, D)."""
    B, Sq, H, D = q.shape
    Bk, Sk, Hk, Dk = k.shape
    assert (B, H, D) == (Bk, Hk, Dk) and v.shape == k.shape

    if causal is None:
        causal = (Sq == Sk)                  # module's eval-mode behavior
    # NOTE: the module only ever uses causal with Sq == Sk.  If causal is
    # forced with Sq != Sk this kernel masks with top-left (col <= row)
    # alignment, whereas flash-attn uses bottom-right alignment.
    if softmax_scale is None:
        softmax_scale = 1.0 / math.sqrt(D)   # flash-attn default
    ss = float(softmax_scale)
    fold_scale = ss > 0 and (ss == 2.0 ** round(math.log2(ss)))

    if use_bf16_exp is None:
        use_bf16_exp = (q.dtype == jnp.bfloat16) and _has_bf16_eup()

    # Head grouping: pack G heads per grid step so blocks are 128-lane dense.
    if D % LANES == 0:
        G = 1
    elif LANES % D == 0 and H % (LANES // D) == 0:
        G = LANES // D
    else:
        G = H        # layout-legal fallback (block spans the full folded dim)
    gw = G * D

    tq = min(block_q, Sq)
    tk = min(block_k, Sk)
    assert Sq % tq == 0 and Sk % tk == 0, \
        "sequence lengths must be divisible by the block sizes"

    nq, nk = Sq // tq, Sk // tk
    qi_tab, ki_tab, last_tab, mask_tab = _make_schedule(nq, nk, tq, tk, causal)
    T = int(qi_tab.shape[0])

    # Free reshapes only -- heads stay where they live in HBM (no transposes).
    qf = q.reshape(B, Sq, H * D)
    kf = k.reshape(B, Sk, H * D)
    vf = v.reshape(B, Sk, H * D)

    kernel = functools.partial(
        _flash_attn_kernel, scale=ss, fold_scale=fold_scale, causal=causal,
        use_bf16_exp=use_bf16_exp, tq=tq, tk=tk, group=G, head_dim=D)

    q_spec = pl.BlockSpec((1, tq, gw),
                          lambda b, g, t, qi_t, ki_t, la_t, mk_t: (b, qi_t[t], g))
    kv_spec = pl.BlockSpec((1, tk, gw),
                           lambda b, g, t, qi_t, ki_t, la_t, mk_t: (b, ki_t[t], g))
    o_spec = pl.BlockSpec((1, tq, gw),
                          lambda b, g, t, qi_t, ki_t, la_t, mk_t: (b, qi_t[t], g))

    out = pl.pallas_call(
        kernel,
        out_shape=jax.ShapeDtypeStruct((B, Sq, H * D), q.dtype),
        grid_spec=pltpu.PrefetchScalarGridSpec(
            num_scalar_prefetch=4,
            grid=(B, H // G, T),
            in_specs=[q_spec, kv_spec, kv_spec],
            out_specs=o_spec,
            scratch_shapes=[
                pltpu.VMEM((G, tq, LANES), jnp.float32),  # running max (lane-rep)
                pltpu.VMEM((G, tq, LANES), jnp.float32),  # running denom (lane-rep)
                pltpu.VMEM((G, tq, D), jnp.float32),      # output accumulator
            ]),
        compiler_params=pltpu.CompilerParams(
            dimension_semantics=("parallel", "parallel", "arbitrary")),
    )(qi_tab, ki_tab, last_tab, mask_tab, qf, kf, vf)

    return out.reshape(B, Sq, H, D)


def _reference_attention(q, k, v, causal, scale):
    qf, kf, vf = (x.astype(jnp.float32) for x in (q, k, v))
    s = jnp.einsum('bqhd,bkhd->bhqk', qf, kf) * scale
    if causal:
        Sq, Sk = q.shape[1], k.shape[1]
        mask = jnp.tril(jnp.ones((Sq, Sk), dtype=bool))
        s = jnp.where(mask[None, None], s, -jnp.inf)
    p = jax.nn.softmax(s, axis=-1)
    return jnp.einsum('bhqk,bkhd->bqhd', p, vf)


if __name__ == "__main__":
    B, S, H, D = 2, 256, 2, 64
    key = jax.random.PRNGKey(0)
    kq, kk, kv_ = jax.random.split(key, 3)
    q = jax.random.normal(kq, (B, S, H, D), dtype=jnp.bfloat16)
    k = jax.random.normal(kk, (B, S, H, D), dtype=jnp.bfloat16)
    v = jax.random.normal(kv_, (B, S, H, D), dtype=jnp.bfloat16)

    # Eval path, Sq == Sk -> causal.  Small blocks so the triangular schedule
    # actually runs several kv steps per query block.
    out = flash_self_attention(q, k, v, block_q=128, block_k=128)
    jax.block_until_ready(out)
    ref = _reference_attention(q, k, v, causal=True, scale=1.0 / math.sqrt(D))
    err = float(jnp.max(jnp.abs(out.astype(jnp.float32) - ref)))
    assert out.shape == (B, S, H, D) and out.dtype == jnp.bfloat16
    assert err < 5e-2, f"causal max abs error {err}"

    # Eval path, Sq != Sk -> non-causal (cross-attention style).
    Sq2 = 128
    q2 = jax.random.normal(jax.random.PRNGKey(1), (B, Sq2, H, D),
                           dtype=jnp.bfloat16)
    out2 = flash_self_attention(q2, k, v, block_q=128, block_k=128)
    jax.block_until_ready(out2)
    ref2 = _reference_attention(q2, k, v, causal=False,
                                scale=1.0 / math.sqrt(D))
    err2 = float(jnp.max(jnp.abs(out2.astype(jnp.float32) - ref2)))
    assert out2.shape == (B, Sq2, H, D) and out2.dtype == jnp.bfloat16
    assert err2 < 5e-2, f"non-causal max abs error {err2}"

    print("KERNEL_OK")
</pallas_src>

<mosaic_0001>
module attributes {stable_mosaic.version = 11 : i64} {
  func.func @_flash_attn_kernel(%arg0: i32, %arg1: i32, %arg2: i32, %arg3: memref<3xi32, #tpu.memory_space<smem>>, %arg4: memref<3xi32, #tpu.memory_space<smem>>, %arg5: memref<3xi32, #tpu.memory_space<smem>>, %arg6: memref<3xi32, #tpu.memory_space<smem>>, %arg7: memref<1x128x128xbf16, #tpu.memory_space<vmem>>, %arg8: memref<1x128x128xbf16, #tpu.memory_space<vmem>>, %arg9: memref<1x128x128xbf16, #tpu.memory_space<vmem>>, %arg10: memref<1x128x128xbf16, #tpu.memory_space<vmem>>, %arg11: memref<2x128x128xf32, #tpu.memory_space<vmem>>, %arg12: memref<2x128x128xf32, #tpu.memory_space<vmem>>, %arg13: memref<2x128x64xf32, #tpu.memory_space<vmem>>) attributes {dimension_semantics = [#tpu.dimension_semantics<parallel>, #tpu.dimension_semantics<parallel>, #tpu.dimension_semantics<arbitrary>], iteration_bounds = array<i64: 2, 1, 3>, scalar_prefetch = 4 : i64, scratch_operands = 3 : i64, tpu.core_type = #tpu.core_type<tc>, window_params = [{transform_indices = @transform_0, window_bounds = array<i64: 1, 128, 128>}, {transform_indices = @transform_1, window_bounds = array<i64: 1, 128, 128>}, {transform_indices = @transform_2, window_bounds = array<i64: 1, 128, 128>}, {transform_indices = @transform_3, window_bounds = array<i64: 1, 128, 128>}]} {
    %0 = arith.index_cast %arg2 : i32 to index
    %1 = memref.load %arg3[%0] : memref<3xi32, #tpu.memory_space<smem>>
    %2 = arith.index_cast %arg2 : i32 to index
    %3 = memref.load %arg4[%2] : memref<3xi32, #tpu.memory_space<smem>>
    %c0_i32 = arith.constant 0 : i32
    %4 = arith.cmpi eq, %3, %c0_i32 : i32
    %5 = arith.extui %4 : i1 to i32
    %c0_i32_0 = arith.constant 0 : i32
    %6 = arith.cmpi ne, %5, %c0_i32_0 : i32
    scf.if %6 {
      %cst = arith.constant -2.38197633E+38 : f32
      %20 = vector.broadcast %cst : f32 to vector<2x128x128xf32>
      %c0 = arith.constant 0 : index
      %c0_5 = arith.constant 0 : index
      %c0_6 = arith.constant 0 : index
      %21 = vector.load %arg11[%c0, %c0_5, %c0_6] : memref<2x128x128xf32, #tpu.memory_space<vmem>>, vector<2x128x128xf32>
      tpu.vector_store %arg11[%c0, %c0_5, %c0_6], %20 {strides = array<i32>} : memref<2x128x128xf32, #tpu.memory_space<vmem>>, vector<2x128x128xf32>,
      %cst_7 = arith.constant 0.000000e+00 : f32
      %22 = vector.broadcast %cst_7 : f32 to vector<2x128x128xf32>
      %c0_8 = arith.constant 0 : index
      %c0_9 = arith.constant 0 : index
      %c0_10 = arith.constant 0 : index
      %23 = vector.load %arg12[%c0_8, %c0_9, %c0_10] : memref<2x128x128xf32, #tpu.memory_space<vmem>>, vector<2x128x128xf32>
      tpu.vector_store %arg12[%c0_8, %c0_9, %c0_10], %22 {strides = array<i32>} : memref<2x128x128xf32, #tpu.memory_space<vmem>>, vector<2x128x128xf32>,
      %cst_11 = arith.constant 0.000000e+00 : f32
      %24 = vector.broadcast %cst_11 : f32 to vector<2x128x64xf32>
      %c0_12 = arith.constant 0 : index
      %c0_13 = arith.constant 0 : index
      %c0_14 = arith.constant 0 : index
      %25 = vector.load %arg13[%c0_12, %c0_13, %c0_14] : memref<2x128x64xf32, #tpu.memory_space<vmem>>, vector<2x128x64xf32>
      tpu.vector_store %arg13[%c0_12, %c0_13, %c0_14], %24 {strides = array<i32>} : memref<2x128x64xf32, #tpu.memory_space<vmem>>, vector<2x128x64xf32>,
    } else {
    }
    %7 = arith.index_cast %arg2 : i32 to index
    %8 = memref.load %arg6[%7] : memref<3xi32, #tpu.memory_space<smem>>
    %c1_i32 = arith.constant 1 : i32
    %9 = arith.cmpi eq, %8, %c1_i32 : i32
    %10 = arith.extui %9 : i1 to i32
    %c0_i32_1 = arith.constant 0 : i32
    %11 = arith.cmpi ne, %10, %c0_i32_1 : i32
    scf.if %11 {
      %c0 = arith.constant 0 : index
      %c0_5 = arith.constant 0 : index
      %c0_6 = arith.constant 0 : index
      %20 = vector.load %arg7[%c0, %c0_5, %c0_6] : memref<1x128x128xbf16, #tpu.memory_space<vmem>>, vector<1x128x128xbf16>
      %21 = vector.shape_cast %20 : vector<1x128x128xbf16> to vector<128x128xbf16>
      %cst = arith.constant 1.250000e-01 : bf16
      %22 = vector.broadcast %cst : bf16 to vector<128x128xbf16>
      %23 = arith.mulf %21, %22 : vector<128x128xbf16>
      %c0_7 = arith.constant 0 : index
      %c0_8 = arith.constant 0 : index
      %c0_9 = arith.constant 0 : index
      %24 = vector.load %arg8[%c0_7, %c0_8, %c0_9] : memref<1x128x128xbf16, #tpu.memory_space<vmem>>, vector<1x128x128xbf16>
      %25 = vector.shape_cast %24 : vector<1x128x128xbf16> to vector<128x128xbf16>
      %c0_10 = arith.constant 0 : index
      %c0_11 = arith.constant 0 : index
      %c0_12 = arith.constant 0 : index
      %26 = vector.load %arg9[%c0_10, %c0_11, %c0_12] : memref<1x128x128xbf16, #tpu.memory_space<vmem>>, vector<1x128x128xbf16>
      %27 = vector.shape_cast %26 : vector<1x128x128xbf16> to vector<128x128xbf16>
      %c128_i32 = arith.constant 128 : i32
      %28 = arith.muli %1, %c128_i32 : i32
      %29 = tpu.iota {dimensions = array<i32: 0>} : vector<128x1xi32>
      %30 = vector.broadcast %28 : i32 to vector<128x1xi32>
      %31 = arith.addi %30, %29 : vector<128x1xi32>
      %c128_i32_13 = arith.constant 128 : i32
      %32 = arith.muli %3, %c128_i32_13 : i32
      %33 = tpu.iota {dimensions = array<i32: 1>} : vector<1x128xi32>
      %34 = vector.broadcast %32 : i32 to vector<1x128xi32>
      %35 = arith.addi %34, %33 : vector<1x128xi32>
      %36 = vector.broadcast %35 : vector<1x128xi32> to vector<128x128xi32>
      %37 = vector.broadcast %31 : vector<128x1xi32> to vector<128x128xi32>
      %38 = arith.cmpi sle, %36, %37 : vector<128x128xi32>
      %39 = vector.extract_strided_slice %23 {offsets = [0, 0], sizes = [128, 64], strides = [1, 1]} : vector<128x128xbf16> to vector<128x64xbf16>
      %40 = vector.extract_strided_slice %25 {offsets = [0, 0], sizes = [128, 64], strides = [1, 1]} : vector<128x128xbf16> to vector<128x64xbf16>
      %41 = vector.extract_strided_slice %27 {offsets = [0, 0], sizes = [128, 64], strides = [1, 1]} : vector<128x128xbf16> to vector<128x64xbf16>
      %cst_14 = arith.constant dense<0.000000e+00> : vector<128x128xf32>
      %42 = tpu.matmul %39, %40, %cst_14 {dimension_numbers = #tpu.dot_dimension_numbers<[1], [1], [0], [0], [0, 0, 1, 0], [], []>} : vector<128x64xbf16>, vector<128x64xbf16>, vector<128x128xf32> -> vector<128x128xf32>
      %cst_15 = arith.constant -2.38197633E+38 : f32
      %43 = vector.broadcast %cst_15 : f32 to vector<128x128xf32>
      %44 = arith.select %38, %42, %43 : vector<128x128xi1>, vector<128x128xf32>
      %c0_16 = arith.constant 0 : index
      %c0_17 = arith.constant 0 : index
      %c0_18 = arith.constant 0 : index
      %45 = vector.load %arg11[%c0_16, %c0_17, %c0_18] : memref<2x128x128xf32, #tpu.memory_space<vmem>>, vector<1x128x128xf32>
      %46 = vector.shape_cast %45 : vector<1x128x128xf32> to vector<128x128xf32>
      %c0_19 = arith.constant 0 : index
      %c0_20 = arith.constant 0 : index
      %c0_21 = arith.constant 0 : index
      %47 = vector.load %arg12[%c0_19, %c0_20, %c0_21] : memref<2x128x128xf32, #tpu.memory_space<vmem>>, vector<1x128x128xf32>
      %48 = vector.shape_cast %47 : vector<1x128x128xf32> to vector<128x128xf32>
      %cst_22 = arith.constant dense<0xFF800000> : vector<128xf32>
      %49 = vector.multi_reduction <maximumf>, %44, %cst_22 [1] : vector<128x128xf32> to vector<128xf32>
      %50 = vector.shape_cast %49 : vector<128xf32> to vector<128x1xf32>
      %51 = vector.broadcast %50 : vector<128x1xf32> to vector<128x128xf32>
      %52 = arith.maximumf %46, %51 : vector<128x128xf32>
      %53 = arith.subf %46, %52 : vector<128x128xf32>
      %54 = math.exp %53 : vector<128x128xf32>
      %55 = arith.subf %44, %52 : vector<128x128xf32>
      %56 = math.exp %55 : vector<128x128xf32>
      %cst_23 = arith.constant dense<0.000000e+00> : vector<128xf32>
      %57 = vector.multi_reduction <add>, %56, %cst_23 [1] : vector<128x128xf32> to vector<128xf32>
      %58 = vector.shape_cast %57 : vector<128xf32> to vector<128x1xf32>
      %59 = arith.truncf %56 : vector<128x128xf32> to vector<128x128xbf16>
      %60 = arith.mulf %54, %48 : vector<128x128xf32>
      %61 = vector.shape_cast %58 : vector<128x1xf32> to vector<128x1xf32>
      %62 = vector.broadcast %61 : vector<128x1xf32> to vector<128x128xf32>
      %63 = arith.addf %60, %62 : vector<128x128xf32>
      %c0_24 = arith.constant 0 : index
      %c0_25 = arith.constant 0 : index
      %c0_26 = arith.constant 0 : index
      %64 = vector.load %arg12[%c0_24, %c0_25, %c0_26] : memref<2x128x128xf32, #tpu.memory_space<vmem>>, vector<1x128x128xf32>
      %65 = vector.shape_cast %64 : vector<1x128x128xf32> to vector<128x128xf32>
      %66 = vector.shape_cast %63 : vector<128x128xf32> to vector<1x128x128xf32>
      tpu.vector_store %arg12[%c0_24, %c0_25, %c0_26], %66 {strides = array<i32>} : memref<2x128x128xf32, #tpu.memory_space<vmem>>, vector<1x128x128xf32>,
      %67 = vector.extract_strided_slice %54 {offsets = [0, 0], sizes = [128, 64], strides = [1, 1]} : vector<128x128xf32> to vector<128x64xf32>
      %c0_27 = arith.constant 0 : index
      %c0_28 = arith.constant 0 : index
      %c0_29 = arith.constant 0 : index
      %68 = vector.load %arg13[%c0_27, %c0_28, %c0_29] : memref<2x128x64xf32, #tpu.memory_space<vmem>>, vector<1x128x64xf32>
      %69 = vector.shape_cast %68 : vector<1x128x64xf32> to vector<128x64xf32>
      %70 = arith.mulf %67, %69 : vector<128x64xf32>
      %cst_30 = arith.constant dense<0.000000e+00> : vector<128x64xf32>
      %71 = tpu.matmul %59, %41, %cst_30 {dimension_numbers = #tpu.dot_dimension_numbers<[1], [0], [0], [1], [0, 0, 1, 1], [], []>} : vector<128x128xbf16>, vector<128x64xbf16>, vector<128x64xf32> -> vector<128x64xf32>
      %72 = arith.addf %70, %71 : vector<128x64xf32>
      %c0_31 = arith.constant 0 : index
      %c0_32 = arith.constant 0 : index
      %c0_33 = arith.constant 0 : index
      %73 = vector.load %arg13[%c0_31, %c0_32, %c0_33] : memref<2x128x64xf32, #tpu.memory_space<vmem>>, vector<1x128x64xf32>
      %74 = vector.shape_cast %73 : vector<1x128x64xf32> to vector<128x64xf32>
      %75 = vector.shape_cast %72 : vector<128x64xf32> to vector<1x128x64xf32>
      tpu.vector_store %arg13[%c0_31, %c0_32, %c0_33], %75 {strides = array<i32>} : memref<2x128x64xf32, #tpu.memory_space<vmem>>, vector<1x128x64xf32>,
      %c0_34 = arith.constant 0 : index
      %c0_35 = arith.constant 0 : index
      %c0_36 = arith.constant 0 : index
      %76 = vector.load %arg11[%c0_34, %c0_35, %c0_36] : memref<2x128x128xf32, #tpu.memory_space<vmem>>, vector<1x128x128xf32>
      %77 = vector.shape_cast %76 : vector<1x128x128xf32> to vector<128x128xf32>
      %78 = vector.shape_cast %52 : vector<128x128xf32> to vector<1x128x128xf32>
      tpu.vector_store %arg11[%c0_34, %c0_35, %c0_36], %78 {strides = array<i32>} : memref<2x128x128xf32, #tpu.memory_space<vmem>>, vector<1x128x128xf32>,
      %79 = vector.extract_strided_slice %23 {offsets = [0, 64], sizes = [128, 64], strides = [1, 1]} : vector<128x128xbf16> to vector<128x64xbf16>
      %80 = vector.extract_strided_slice %25 {offsets = [0, 64], sizes = [128, 64], strides = [1, 1]} : vector<128x128xbf16> to vector<128x64xbf16>
      %81 = vector.extract_strided_slice %27 {offsets = [0, 64], sizes = [128, 64], strides = [1, 1]} : vector<128x128xbf16> to vector<128x64xbf16>
      %cst_37 = arith.constant dense<0.000000e+00> : vector<128x128xf32>
      %82 = tpu.matmul %79, %80, %cst_37 {dimension_numbers = #tpu.dot_dimension_numbers<[1], [1], [0], [0], [0, 0, 1, 0], [], []>} : vector<128x64xbf16>, vector<128x64xbf16>, vector<128x128xf32> -> vector<128x128xf32>
      %cst_38 = arith.constant -2.38197633E+38 : f32
      %83 = vector.broadcast %cst_38 : f32 to vector<128x128xf32>
      %84 = arith.select %38, %82, %83 : vector<128x128xi1>, vector<128x128xf32>
      %c1 = arith.constant 1 : index
      %c0_39 = arith.constant 0 : index
      %c0_40 = arith.constant 0 : index
      %85 = vector.load %arg11[%c1, %c0_39, %c0_40] : memref<2x128x128xf32, #tpu.memory_space<vmem>>, vector<1x128x128xf32>
      %86 = vector.shape_cast %85 : vector<1x128x128xf32> to vector<128x128xf32>
      %c1_41 = arith.constant 1 : index
      %c0_42 = arith.constant 0 : index
      %c0_43 = arith.constant 0 : index
      %87 = vector.load %arg12[%c1_41, %c0_42, %c0_43] : memref<2x128x128xf32, #tpu.memory_space<vmem>>, vector<1x128x128xf32>
      %88 = vector.shape_cast %87 : vector<1x128x128xf32> to vector<128x128xf32>
      %cst_44 = arith.constant dense<0xFF800000> : vector<128xf32>
      %89 = vector.multi_reduction <maximumf>, %84, %cst_44 [1] : vector<128x128xf32> to vector<128xf32>
      %90 = vector.shape_cast %89 : vector<128xf32> to vector<128x1xf32>
      %91 = vector.broadcast %90 : vector<128x1xf32> to vector<128x128xf32>
      %92 = arith.maximumf %86, %91 : vector<128x128xf32>
      %93 = arith.subf %86, %92 : vector<128x128xf32>
      %94 = math.exp %93 : vector<128x128xf32>
      %95 = arith.subf %84, %92 : vector<128x128xf32>
      %96 = math.exp %95 : vector<128x128xf32>
      %cst_45 = arith.constant dense<0.000000e+00> : vector<128xf32>
      %97 = vector.multi_reduction <add>, %96, %cst_45 [1] : vector<128x128xf32> to vector<128xf32>
      %98 = vector.shape_cast %97 : vector<128xf32> to vector<128x1xf32>
      %99 = arith.truncf %96 : vector<128x128xf32> to vector<128x128xbf16>
      %100 = arith.mulf %94, %88 : vector<128x128xf32>
      %101 = vector.shape_cast %98 : vector<128x1xf32> to vector<128x1xf32>
      %102 = vector.broadcast %101 : vector<128x1xf32> to vector<128x128xf32>
      %103 = arith.addf %100, %102 : vector<128x128xf32>
      %c1_46 = arith.constant 1 : index
      %c0_47 = arith.constant 0 : index
      %c0_48 = arith.constant 0 : index
      %104 = vector.load %arg12[%c1_46, %c0_47, %c0_48] : memref<2x128x128xf32, #tpu.memory_space<vmem>>, vector<1x128x128xf32>
      %105 = vector.shape_cast %104 : vector<1x128x128xf32> to vector<128x128xf32>
      %106 = vector.shape_cast %103 : vector<128x128xf32> to vector<1x128x128xf32>
      tpu.vector_store %arg12[%c1_46, %c0_47, %c0_48], %106 {strides = array<i32>} : memref<2x128x128xf32, #tpu.memory_space<vmem>>, vector<1x128x128xf32>,
      %107 = vector.extract_strided_slice %94 {offsets = [0, 0], sizes = [128, 64], strides = [1, 1]} : vector<128x128xf32> to vector<128x64xf32>
      %c1_49 = arith.constant 1 : index
      %c0_50 = arith.constant 0 : index
      %c0_51 = arith.constant 0 : index
      %108 = vector.load %arg13[%c1_49, %c0_50, %c0_51] : memref<2x128x64xf32, #tpu.memory_space<vmem>>, vector<1x128x64xf32>
      %109 = vector.shape_cast %108 : vector<1x128x64xf32> to vector<128x64xf32>
      %110 = arith.mulf %107, %109 : vector<128x64xf32>
      %cst_52 = arith.constant dense<0.000000e+00> : vector<128x64xf32>
      %111 = tpu.matmul %99, %81, %cst_52 {dimension_numbers = #tpu.dot_dimension_numbers<[1], [0], [0], [1], [0, 0, 1, 1], [], []>} : vector<128x128xbf16>, vector<128x64xbf16>, vector<128x64xf32> -> vector<128x64xf32>
      %112 = arith.addf %110, %111 : vector<128x64xf32>
      %c1_53 = arith.constant 1 : index
      %c0_54 = arith.constant 0 : index
      %c0_55 = arith.constant 0 : index
      %113 = vector.load %arg13[%c1_53, %c0_54, %c0_55] : memref<2x128x64xf32, #tpu.memory_space<vmem>>, vector<1x128x64xf32>
      %114 = vector.shape_cast %113 : vector<1x128x64xf32> to vector<128x64xf32>
      %115 = vector.shape_cast %112 : vector<128x64xf32> to vector<1x128x64xf32>
      tpu.vector_store %arg13[%c1_53, %c0_54, %c0_55], %115 {strides = array<i32>} : memref<2x128x64xf32, #tpu.memory_space<vmem>>, vector<1x128x64xf32>,
      %c1_56 = arith.constant 1 : index
      %c0_57 = arith.constant 0 : index
      %c0_58 = arith.constant 0 : index
      %116 = vector.load %arg11[%c1_56, %c0_57, %c0_58] : memref<2x128x128xf32, #tpu.memory_space<vmem>>, vector<1x128x128xf32>
      %117 = vector.shape_cast %116 : vector<1x128x128xf32> to vector<128x128xf32>
      %118 = vector.shape_cast %92 : vector<128x128xf32> to vector<1x128x128xf32>
      tpu.vector_store %arg11[%c1_56, %c0_57, %c0_58], %118 {strides = array<i32>} : memref<2x128x128xf32, #tpu.memory_space<vmem>>, vector<1x128x128xf32>,
    } else {
    }
    %true = arith.constant true
    %12 = arith.xori %9, %true : i1
    %13 = arith.extui %12 : i1 to i32
    %c0_i32_2 = arith.constant 0 : i32
    %14 = arith.cmpi ne, %13, %c0_i32_2 : i32
    scf.if %14 {
      %c0 = arith.constant 0 : index
      %c0_5 = arith.constant 0 : index
      %c0_6 = arith.constant 0 : index
      %20 = vector.load %arg7[%c0, %c0_5, %c0_6] : memref<1x128x128xbf16, #tpu.memory_space<vmem>>, vector<1x128x128xbf16>
      %21 = vector.shape_cast %20 : vector<1x128x128xbf16> to vector<128x128xbf16>
      %cst = arith.constant 1.250000e-01 : bf16
      %22 = vector.broadcast %cst : bf16 to vector<128x128xbf16>
      %23 = arith.mulf %21, %22 : vector<128x128xbf16>
      %c0_7 = arith.constant 0 : index
      %c0_8 = arith.constant 0 : index
      %c0_9 = arith.constant 0 : index
      %24 = vector.load %arg8[%c0_7, %c0_8, %c0_9] : memref<1x128x128xbf16, #tpu.memory_space<vmem>>, vector<1x128x128xbf16>
      %25 = vector.shape_cast %24 : vector<1x128x128xbf16> to vector<128x128xbf16>
      %c0_10 = arith.constant 0 : index
      %c0_11 = arith.constant 0 : index
      %c0_12 = arith.constant 0 : index
      %26 = vector.load %arg9[%c0_10, %c0_11, %c0_12] : memref<1x128x128xbf16, #tpu.memory_space<vmem>>, vector<1x128x128xbf16>
      %27 = vector.shape_cast %26 : vector<1x128x128xbf16> to vector<128x128xbf16>
      %28 = vector.extract_strided_slice %23 {offsets = [0, 0], sizes = [128, 64], strides = [1, 1]} : vector<128x128xbf16> to vector<128x64xbf16>
      %29 = vector.extract_strided_slice %25 {offsets = [0, 0], sizes = [128, 64], strides = [1, 1]} : vector<128x128xbf16> to vector<128x64xbf16>
      %30 = vector.extract_strided_slice %27 {offsets = [0, 0], sizes = [128, 64], strides = [1, 1]} : vector<128x128xbf16> to vector<128x64xbf16>
      %cst_13 = arith.constant dense<0.000000e+00> : vector<128x128xf32>
      %31 = tpu.matmul %28, %29, %cst_13 {dimension_numbers = #tpu.dot_dimension_numbers<[1], [1], [0], [0], [0, 0, 1, 0], [], []>} : vector<128x64xbf16>, vector<128x64xbf16>, vector<128x128xf32> -> vector<128x128xf32>
      %c0_14 = arith.constant 0 : index
      %c0_15 = arith.constant 0 : index
      %c0_16 = arith.constant 0 : index
      %32 = vector.load %arg11[%c0_14, %c0_15, %c0_16] : memref<2x128x128xf32, #tpu.memory_space<vmem>>, vector<1x128x128xf32>
      %33 = vector.shape_cast %32 : vector<1x128x128xf32> to vector<128x128xf32>
      %c0_17 = arith.constant 0 : index
      %c0_18 = arith.constant 0 : index
      %c0_19 = arith.constant 0 : index
      %34 = vector.load %arg12[%c0_17, %c0_18, %c0_19] : memref<2x128x128xf32, #tpu.memory_space<vmem>>, vector<1x128x128xf32>
      %35 = vector.shape_cast %34 : vector<1x128x128xf32> to vector<128x128xf32>
      %cst_20 = arith.constant dense<0xFF800000> : vector<128xf32>
      %36 = vector.multi_reduction <maximumf>, %31, %cst_20 [1] : vector<128x128xf32> to vector<128xf32>
      %37 = vector.shape_cast %36 : vector<128xf32> to vector<128x1xf32>
      %38 = vector.broadcast %37 : vector<128x1xf32> to vector<128x128xf32>
      %39 = arith.maximumf %33, %38 : vector<128x128xf32>
      %40 = arith.subf %33, %39 : vector<128x128xf32>
      %41 = math.exp %40 : vector<128x128xf32>
      %42 = arith.subf %31, %39 : vector<128x128xf32>
      %43 = math.exp %42 : vector<128x128xf32>
      %cst_21 = arith.constant dense<0.000000e+00> : vector<128xf32>
      %44 = vector.multi_reduction <add>, %43, %cst_21 [1] : vector<128x128xf32> to vector<128xf32>
      %45 = vector.shape_cast %44 : vector<128xf32> to vector<128x1xf32>
      %46 = arith.truncf %43 : vector<128x128xf32> to vector<128x128xbf16>
      %47 = arith.mulf %41, %35 : vector<128x128xf32>
      %48 = vector.shape_cast %45 : vector<128x1xf32> to vector<128x1xf32>
      %49 = vector.broadcast %48 : vector<128x1xf32> to vector<128x128xf32>
      %50 = arith.addf %47, %49 : vector<128x128xf32>
      %c0_22 = arith.constant 0 : index
      %c0_23 = arith.constant 0 : index
      %c0_24 = arith.constant 0 : index
      %51 = vector.load %arg12[%c0_22, %c0_23, %c0_24] : memref<2x128x128xf32, #tpu.memory_space<vmem>>, vector<1x128x128xf32>
      %52 = vector.shape_cast %51 : vector<1x128x128xf32> to vector<128x128xf32>
      %53 = vector.shape_cast %50 : vector<128x128xf32> to vector<1x128x128xf32>
      tpu.vector_store %arg12[%c0_22, %c0_23, %c0_24], %53 {strides = array<i32>} : memref<2x128x128xf32, #tpu.memory_space<vmem>>, vector<1x128x128xf32>,
      %54 = vector.extract_strided_slice %41 {offsets = [0, 0], sizes = [128, 64], strides = [1, 1]} : vector<128x128xf32> to vector<128x64xf32>
      %c0_25 = arith.constant 0 : index
      %c0_26 = arith.constant 0 : index
      %c0_27 = arith.constant 0 : index
      %55 = vector.load %arg13[%c0_25, %c0_26, %c0_27] : memref<2x128x64xf32, #tpu.memory_space<vmem>>, vector<1x128x64xf32>
      %56 = vector.shape_cast %55 : vector<1x128x64xf32> to vector<128x64xf32>
      %57 = arith.mulf %54, %56 : vector<128x64xf32>
      %cst_28 = arith.constant dense<0.000000e+00> : vector<128x64xf32>
      %58 = tpu.matmul %46, %30, %cst_28 {dimension_numbers = #tpu.dot_dimension_numbers<[1], [0], [0], [1], [0, 0, 1, 1], [], []>} : vector<128x128xbf16>, vector<128x64xbf16>, vector<128x64xf32> -> vector<128x64xf32>
      %59 = arith.addf %57, %58 : vector<128x64xf32>
      %c0_29 = arith.constant 0 : index
      %c0_30 = arith.constant 0 : index
      %c0_31 = arith.constant 0 : index
      %60 = vector.load %arg13[%c0_29, %c0_30, %c0_31] : memref<2x128x64xf32, #tpu.memory_space<vmem>>, vector<1x128x64xf32>
      %61 = vector.shape_cast %60 : vector<1x128x64xf32> to vector<128x64xf32>
      %62 = vector.shape_cast %59 : vector<128x64xf32> to vector<1x128x64xf32>
      tpu.vector_store %arg13[%c0_29, %c0_30, %c0_31], %62 {strides = array<i32>} : memref<2x128x64xf32, #tpu.memory_space<vmem>>, vector<1x128x64xf32>,
      %c0_32 = arith.constant 0 : index
      %c0_33 = arith.constant 0 : index
      %c0_34 = arith.constant 0 : index
      %63 = vector.load %arg11[%c0_32, %c0_33, %c0_34] : memref<2x128x128xf32, #tpu.memory_space<vmem>>, vector<1x128x128xf32>
      %64 = vector.shape_cast %63 : vector<1x128x128xf32> to vector<128x128xf32>
      %65 = vector.shape_cast %39 : vector<128x128xf32> to vector<1x128x128xf32>
      tpu.vector_store %arg11[%c0_32, %c0_33, %c0_34], %65 {strides = array<i32>} : memref<2x128x128xf32, #tpu.memory_space<vmem>>, vector<1x128x128xf32>,
      %66 = vector.extract_strided_slice %23 {offsets = [0, 64], sizes = [128, 64], strides = [1, 1]} : vector<128x128xbf16> to vector<128x64xbf16>
      %67 = vector.extract_strided_slice %25 {offsets = [0, 64], sizes = [128, 64], strides = [1, 1]} : vector<128x128xbf16> to vector<128x64xbf16>
      %68 = vector.extract_strided_slice %27 {offsets = [0, 64], sizes = [128, 64], strides = [1, 1]} : vector<128x128xbf16> to vector<128x64xbf16>
      %cst_35 = arith.constant dense<0.000000e+00> : vector<128x128xf32>
      %69 = tpu.matmul %66, %67, %cst_35 {dimension_numbers = #tpu.dot_dimension_numbers<[1], [1], [0], [0], [0, 0, 1, 0], [], []>} : vector<128x64xbf16>, vector<128x64xbf16>, vector<128x128xf32> -> vector<128x128xf32>
      %c1 = arith.constant 1 : index
      %c0_36 = arith.constant 0 : index
      %c0_37 = arith.constant 0 : index
      %70 = vector.load %arg11[%c1, %c0_36, %c0_37] : memref<2x128x128xf32, #tpu.memory_space<vmem>>, vector<1x128x128xf32>
      %71 = vector.shape_cast %70 : vector<1x128x128xf32> to vector<128x128xf32>
      %c1_38 = arith.constant 1 : index
      %c0_39 = arith.constant 0 : index
      %c0_40 = arith.constant 0 : index
      %72 = vector.load %arg12[%c1_38, %c0_39, %c0_40] : memref<2x128x128xf32, #tpu.memory_space<vmem>>, vector<1x128x128xf32>
      %73 = vector.shape_cast %72 : vector<1x128x128xf32> to vector<128x128xf32>
      %cst_41 = arith.constant dense<0xFF800000> : vector<128xf32>
      %74 = vector.multi_reduction <maximumf>, %69, %cst_41 [1] : vector<128x128xf32> to vector<128xf32>
      %75 = vector.shape_cast %74 : vector<128xf32> to vector<128x1xf32>
      %76 = vector.broadcast %75 : vector<128x1xf32> to vector<128x128xf32>
      %77 = arith.maximumf %71, %76 : vector<128x128xf32>
      %78 = arith.subf %71, %77 : vector<128x128xf32>
      %79 = math.exp %78 : vector<128x128xf32>
      %80 = arith.subf %69, %77 : vector<128x128xf32>
      %81 = math.exp %80 : vector<128x128xf32>
      %cst_42 = arith.constant dense<0.000000e+00> : vector<128xf32>
      %82 = vector.multi_reduction <add>, %81, %cst_42 [1] : vector<128x128xf32> to vector<128xf32>
      %83 = vector.shape_cast %82 : vector<128xf32> to vector<128x1xf32>
      %84 = arith.truncf %81 : vector<128x128xf32> to vector<128x128xbf16>
      %85 = arith.mulf %79, %73 : vector<128x128xf32>
      %86 = vector.shape_cast %83 : vector<128x1xf32> to vector<128x1xf32>
      %87 = vector.broadcast %86 : vector<128x1xf32> to vector<128x128xf32>
      %88 = arith.addf %85, %87 : vector<128x128xf32>
      %c1_43 = arith.constant 1 : index
      %c0_44 = arith.constant 0 : index
      %c0_45 = arith.constant 0 : index
      %89 = vector.load %arg12[%c1_43, %c0_44, %c0_45] : memref<2x128x128xf32, #tpu.memory_space<vmem>>, vector<1x128x128xf32>
      %90 = vector.shape_cast %89 : vector<1x128x128xf32> to vector<128x128xf32>
      %91 = vector.shape_cast %88 : vector<128x128xf32> to vector<1x128x128xf32>
      tpu.vector_store %arg12[%c1_43, %c0_44, %c0_45], %91 {strides = array<i32>} : memref<2x128x128xf32, #tpu.memory_space<vmem>>, vector<1x128x128xf32>,
      %92 = vector.extract_strided_slice %79 {offsets = [0, 0], sizes = [128, 64], strides = [1, 1]} : vector<128x128xf32> to vector<128x64xf32>
      %c1_46 = arith.constant 1 : index
      %c0_47 = arith.constant 0 : index
      %c0_48 = arith.constant 0 : index
      %93 = vector.load %arg13[%c1_46, %c0_47, %c0_48] : memref<2x128x64xf32, #tpu.memory_space<vmem>>, vector<1x128x64xf32>
      %94 = vector.shape_cast %93 : vector<1x128x64xf32> to vector<128x64xf32>
      %95 = arith.mulf %92, %94 : vector<128x64xf32>
      %cst_49 = arith.constant dense<0.000000e+00> : vector<128x64xf32>
      %96 = tpu.matmul %84, %68, %cst_49 {dimension_numbers = #tpu.dot_dimension_numbers<[1], [0], [0], [1], [0, 0, 1, 1], [], []>} : vector<128x128xbf16>, vector<128x64xbf16>, vector<128x64xf32> -> vector<128x64xf32>
      %97 = arith.addf %95, %96 : vector<128x64xf32>
      %c1_50 = arith.constant 1 : index
      %c0_51 = arith.constant 0 : index
      %c0_52 = arith.constant 0 : index
      %98 = vector.load %arg13[%c1_50, %c0_51, %c0_52] : memref<2x128x64xf32, #tpu.memory_space<vmem>>, vector<1x128x64xf32>
      %99 = vector.shape_cast %98 : vector<1x128x64xf32> to vector<128x64xf32>
      %100 = vector.shape_cast %97 : vector<128x64xf32> to vector<1x128x64xf32>
      tpu.vector_store %arg13[%c1_50, %c0_51, %c0_52], %100 {strides = array<i32>} : memref<2x128x64xf32, #tpu.memory_space<vmem>>, vector<1x128x64xf32>,
      %c1_53 = arith.constant 1 : index
      %c0_54 = arith.constant 0 : index
      %c0_55 = arith.constant 0 : index
      %101 = vector.load %arg11[%c1_53, %c0_54, %c0_55] : memref<2x128x128xf32, #tpu.memory_space<vmem>>, vector<1x128x128xf32>
      %102 = vector.shape_cast %101 : vector<1x128x128xf32> to vector<128x128xf32>
      %103 = vector.shape_cast %77 : vector<128x128xf32> to vector<1x128x128xf32>
      tpu.vector_store %arg11[%c1_53, %c0_54, %c0_55], %103 {strides = array<i32>} : memref<2x128x128xf32, #tpu.memory_space<vmem>>, vector<1x128x128xf32>,
    } else {
    }
    %15 = arith.index_cast %arg2 : i32 to index
    %16 = memref.load %arg5[%15] : memref<3xi32, #tpu.memory_space<smem>>
    %c1_i32_3 = arith.constant 1 : i32
    %17 = arith.cmpi eq, %16, %c1_i32_3 : i32
    %18 = arith.extui %17 : i1 to i32
    %c0_i32_4 = arith.constant 0 : i32
    %19 = arith.cmpi ne, %18, %c0_i32_4 : i32
    scf.if %19 {
      %c0 = arith.constant 0 : index
      %c0_5 = arith.constant 0 : index
      %c0_6 = arith.constant 0 : index
      %20 = vector.load %arg12[%c0, %c0_5, %c0_6] : memref<2x128x128xf32, #tpu.memory_space<vmem>>, vector<1x128x128xf32>
      %21 = vector.shape_cast %20 : vector<1x128x128xf32> to vector<128x128xf32>
      %22 = tpu.reciprocal %21 {approx = true} : vector<128x128xf32> -> vector<128x128xf32>
      %c0_7 = arith.constant 0 : index
      %c0_8 = arith.constant 0 : index
      %c0_9 = arith.constant 0 : index
      %23 = vector.load %arg13[%c0_7, %c0_8, %c0_9] : memref<2x128x64xf32, #tpu.memory_space<vmem>>, vector<1x128x64xf32>
      %24 = vector.shape_cast %23 : vector<1x128x64xf32> to vector<128x64xf32>
      %25 = vector.extract_strided_slice %22 {offsets = [0, 0], sizes = [128, 64], strides = [1, 1]} : vector<128x128xf32> to vector<128x64xf32>
      %26 = arith.mulf %24, %25 : vector<128x64xf32>
      %27 = arith.truncf %26 : vector<128x64xf32> to vector<128x64xbf16>
      %c1 = arith.constant 1 : index
      %c0_10 = arith.constant 0 : index
      %c0_11 = arith.constant 0 : index
      %28 = vector.load %arg12[%c1, %c0_10, %c0_11] : memref<2x128x128xf32, #tpu.memory_space<vmem>>, vector<1x128x128xf32>
      %29 = vector.shape_cast %28 : vector<1x128x128xf32> to vector<128x128xf32>
      %30 = tpu.reciprocal %29 {approx = true} : vector<128x128xf32> -> vector<128x128xf32>
      %c1_12 = arith.constant 1 : index
      %c0_13 = arith.constant 0 : index
      %c0_14 = arith.constant 0 : index
      %31 = vector.load %arg13[%c1_12, %c0_13, %c0_14] : memref<2x128x64xf32, #tpu.memory_space<vmem>>, vector<1x128x64xf32>
      %32 = vector.shape_cast %31 : vector<1x128x64xf32> to vector<128x64xf32>
      %33 = vector.extract_strided_slice %30 {offsets = [0, 0], sizes = [128, 64], strides = [1, 1]} : vector<128x128xf32> to vector<128x64xf32>
      %34 = arith.mulf %32, %33 : vector<128x64xf32>
      %35 = arith.truncf %34 : vector<128x64xf32> to vector<128x64xbf16>
      %36 = tpu.concatenate %27, %35 in 1 : vector<128x64xbf16>, vector<128x64xbf16> -> vector<128x128xbf16>
      %c0_15 = arith.constant 0 : index
      %c0_16 = arith.constant 0 : index
      %c0_17 = arith.constant 0 : index
      %37 = vector.load %arg10[%c0_15, %c0_16, %c0_17] : memref<1x128x128xbf16, #tpu.memory_space<vmem>>, vector<1x128x128xbf16>
      %38 = vector.shape_cast %37 : vector<1x128x128xbf16> to vector<128x128xbf16>
      %39 = vector.shape_cast %36 : vector<128x128xbf16> to vector<1x128x128xbf16>
      tpu.vector_store %arg10[%c0_15, %c0_16, %c0_17], %39 {strides = array<i32>} : memref<1x128x128xbf16, #tpu.memory_space<vmem>>, vector<1x128x128xbf16>,
    } else {
    }
    return
  }
  func.func @transform_0(%arg0: i32, %arg1: i32, %arg2: i32, %arg3: memref<3xi32, #tpu.memory_space<smem>>, %arg4: memref<3xi32, #tpu.memory_space<smem>>, %arg5: memref<3xi32, #tpu.memory_space<smem>>, %arg6: memref<3xi32, #tpu.memory_space<smem>>) -> (i32, i32, i32) {
    %0 = arith.index_cast %arg2 : i32 to index
    %1 = memref.load %arg3[%0] : memref<3xi32, #tpu.memory_space<smem>>
    %c0_i32 = arith.constant 0 : i32
    return %arg0, %1, %arg1 : i32, i32, i32
  }
  func.func @transform_1(%arg0: i32, %arg1: i32, %arg2: i32, %arg3: memref<3xi32, #tpu.memory_space<smem>>, %arg4: memref<3xi32, #tpu.memory_space<smem>>, %arg5: memref<3xi32, #tpu.memory_space<smem>>, %arg6: memref<3xi32, #tpu.memory_space<smem>>) -> (i32, i32, i32) {
    %0 = arith.index_cast %arg2 : i32 to index
    %1 = memref.load %arg4[%0] : memref<3xi32, #tpu.memory_space<smem>>
    %c0_i32 = arith.constant 0 : i32
    return %arg0, %1, %arg1 : i32, i32, i32
  }
  func.func @transform_2(%arg0: i32, %arg1: i32, %arg2: i32, %arg3: memref<3xi32, #tpu.memory_space<smem>>, %arg4: memref<3xi32, #tpu.memory_space<smem>>, %arg5: memref<3xi32, #tpu.memory_space<smem>>, %arg6: memref<3xi32, #tpu.memory_space<smem>>) -> (i32, i32, i32) {
    %0 = arith.index_cast %arg2 : i32 to index
    %1 = memref.load %arg4[%0] : memref<3xi32, #tpu.memory_space<smem>>
    %c0_i32 = arith.constant 0 : i32
    return %arg0, %1, %arg1 : i32, i32, i32
  }
  func.func @transform_3(%arg0: i32, %arg1: i32, %arg2: i32, %arg3: memref<3xi32, #tpu.memory_space<smem>>, %arg4: memref<3xi32, #tpu.memory_space<smem>>, %arg5: memref<3xi32, #tpu.memory_space<smem>>, %arg6: memref<3xi32, #tpu.memory_space<smem>>) -> (i32, i32, i32) {
    %0 = arith.index_cast %arg2 : i32 to index
    %1 = memref.load %arg3[%0] : memref<3xi32, #tpu.memory_space<smem>>
    %c0_i32 = arith.constant 0 : i32
    return %arg0, %1, %arg1 : i32, i32, i32
  }
}

</mosaic_0001>

<bundles_post_ra>
// kernel: tpu_custom_call.1
= control target key start
LH: loop header
LB: loop body
LE: loop exit
PB: predicated region body
PF: predicated region fallthrough
CT: control target
= control target key end

     0   :  { %s5229_s24 = smov [#allocation6]   ;;  %s8009_s0 = inlined_call_operand.hbm [shape: s32[3], index: 0, kind: input, shape index: {}]   ;;  %s8010_s4 = inlined_call_operand.hbm [shape: bf16[2,256,128], index: 4, kind: input, shape index: {}]   ;;  %s8011_s5 = inlined_call_operand.hbm [shape: bf16[2,256,128], index: 5, kind: input, shape index: {}]   ;;  %s8012_s6 = inlined_call_operand.hbm [shape: bf16[2,256,128], index: 6, kind: input, shape index: {}]   ;;  %s8013_s7 = inlined_call_operand.hbm [shape: bf16[2,256,128], index: 7, kind: output, shape index: {}]   ;;  %s8014_s1 = inlined_call_operand.vmem [shape: s32[3], index: 1, kind: input, shape index: {}]   ;;  %s8015_s2 = inlined_call_operand.vmem [shape: s32[3], index: 2, kind: input, shape index: {}]   ;;  %s8016_s3 = inlined_call_operand.vmem [shape: s32[3], index: 3, kind: input, shape index: {}]  }
   0x1   :  { %8064 = sst [smem:[#allocation58_spill]] %s8010_s4  ;;  %s14_s29 = sshll.u32 %s8014_s1, 4  ;;  %s15_s29 = int_to_ptr.vmem [resolvable:$true] %s14_s29 }
   0x2   :  { %8065 = sst [smem:[#allocation59_spill]] %s8011_s5  ;;  %s18_s9 = sshll.u32 %s8015_s2, 4  ;;  %s19_s9 = int_to_ptr.vmem [resolvable:$true] %s18_s9 }
   0x3   :  { %8066 = sst [smem:[#allocation60_spill]] %s8012_s6  ;;  %s4929_s10 = scalar_lea.vmem %s15_s29, 16 }
   0x4   :  { %8067 = sst [smem:[#allocation61_spill]] %s8013_s7  ;;  %p4930_p0 = scmp.ne.s32.totalorder %s15_s29, %s4929_s10 }
   0x5   :  { %13 = dma.hbm_to_smem %s8009_s0, 16, %s5229_s24, [#allocation5] }
   0x6   :  { %p4934_p1 = scmp.lt.s32.totalorder %s15_s29, %s15_s29  ;;  %p4935_p2 = scmp.lt.s32.totalorder %s4929_s10, %s4929_s10 }
   0x8   :  { %p4936_p3 = por %p4935_p2, %p4934_p1 }
   0xa   :  { %p4937_p4 = pnand %p4936_p3, %p4930_p0 }
   0xc   :  { %4940 = shalt.err (!%p4937_p4)  }
   0xd   :  { %s5230_s11 = smov [#allocation7]   ;;  %s22_s13 = sshll.u32 %s8016_s3, 4  ;;  %s23_s13 = int_to_ptr.vmem [resolvable:$true] %s22_s13 }
   0xe   :  { %17 = dma.vmem_to_smem %s15_s29, 16, %s5230_s11, [#allocation5] }
   0xf   :  { %s4941_s1 = scalar_lea.vmem %s19_s9, 16  ;;  %p4946_p6 = scmp.lt.s32.totalorder %s19_s9, %s19_s9 }
  0x10   :  { %p4942_p5 = scmp.ne.s32.totalorder %s19_s9, %s4941_s1  ;;  %p4947_p7 = scmp.lt.s32.totalorder %s4941_s1, %s4941_s1 }
  0x12   :  { %p4948_p8 = por %p4947_p7, %p4946_p6 }
  0x14   :  { %p4949_p9 = pnand %p4948_p8, %p4942_p5 }
  0x16   :  { %4952 = shalt.err (!%p4949_p9)  }
  0x17   :  { %s5231_s2 = smov [#allocation8]   ;;  %s4953_s14 = scalar_lea.vmem %s23_s13, 16 }
  0x18   :  { %21 = dma.vmem_to_smem %s19_s9, 16, %s5231_s2, [#allocation5] }
  0x19   :  { %p4954_p10 = scmp.ne.s32.totalorder %s23_s13, %s4953_s14  ;;  %p4958_p11 = scmp.lt.s32.totalorder %s23_s13, %s23_s13 }
  0x1a   :  { %p4959_p12 = scmp.lt.s32.totalorder %s4953_s14, %s4953_s14 }
  0x1c   :  { %p4960_p13 = por %p4959_p12, %p4958_p11 }
  0x1e   :  { %p4961_p0 = pnand %p4960_p13, %p4954_p10 }
  0x20   :  { %4964 = shalt.err (!%p4961_p0)  }
  0x21   :  { %s5232_s15 = smov [#allocation9]  }
  0x22   :  { %25 = dma.vmem_to_smem %s23_s13, 16, %s5232_s15, [#allocation5] }
  0x23   :  { %5143 = dma.done.wait [#allocation5], 64 }
  0x24   :  { %5144 = vsyncadd [#allocation5], 4294967232 }
  0x25   :  { %27 = sfence }
  0x26   :  { %28 = vsyncpa [#allocation11], 0 }
  0x27   :  { %30 = vsyncpa [#allocation11 + $0x1], 0 }
  0x28   :  { %31 = vsyncpa [#allocation14], 0 }
  0x29   :  { %33 = vsyncpa [#allocation14 + $0x1], 0 }
  0x2a   :  { %34 = vsyncpa [#allocation12], 0 }
  0x2b   :  { %36 = vsyncpa [#allocation12 + $0x1], 0  ;;  %s5298_s3 = smov 0   ;;  %s5300_s16 = smov 0  }
  0x2c   :  { %s5302_s17 = smov 0   ;;  %s5304_s18 = smov 0  }
  0x2d   :  { %s5306_s19 = smov 0   ;;  %s5308_s20 = smov 0  }
  0x2e   :  { %s5310_s21 = smov 0   ;;  %s5312_s22 = smov 0  }
  0x2f   :  { %s5314_s23 = smov 0   ;;  %s5316_s24 = smov 0  }
  0x30   :  { %s5318_s25 = smov 0   ;;  %s5320_s26 = smov 0  }
  0x31   :  { %s5322_s27 = smov 0   ;;  %s5324_s28 = smov 0  }
  0x32   :  { %s5326_s29 = smov 0   ;;  %s5328_s30 = smov 0  }
  0x33   :  { %s5330_s8 = smov 0  }
  0x34 LB: > { %8068 = sst [smem:[#allocation29_spill]] %s5163_s3  ;;  %s5382_s9 = sadd.s32 4294967295, %s5227_s8   ;;  %s5227_s8 = sphi %s5330_s8, %s42_s8   ;;  %s5223_s30 = sphi %s5328_s30, %s8236_s30   ;;  %s5219_s29 = sphi %s5326_s29, %s8247_s29   ;;  %s5215_s28 = sphi %s5324_s28, %s8246_s28   ;;  %s5211_s27 = sphi %s5322_s27, %s8245_s27   ;;  %s5207_s26 = sphi %s5320_s26, %s8244_s26   ;;  %s5203_s25 = sphi %s5318_s25, %s8243_s25   ;;  %s5199_s24 = sphi %s5316_s24, %s8242_s24   ;;  %s5195_s23 = sphi %s5314_s23, %s8241_s23   ;;  %s5191_s22 = sphi %s5312_s22, %s8240_s22   ;;  %s5187_s21 = sphi %s5310_s21, %s8230_s21   ;;  %s5183_s20 = sphi %s5308_s20, %s8239_s20   ;;  %s5179_s19 = sphi %s5306_s19, %s8238_s19   ;;  %s5175_s18 = sphi %s5304_s18, %s8237_s18   ;;  %s5171_s17 = sphi %s5302_s17, %s8229_s17   ;;  %s5167_s16 = sphi %s5300_s16, %s8228_s16   ;;  %s5163_s3 = sphi %s5298_s3, %s8227_s3  }
  0x35   : > { %8069 = sst [smem:[#allocation30_spill]] %s5167_s16  ;;  %s54_s11 = sadd.s32 1, %s5219_s29 }
  0x36   : > { %8070 = sst [smem:[#allocation31_spill]] %s5171_s17  ;;  %s61_s0 = sadd.s32 1, %s5223_s30 }
  0x37   : > { %8071 = sst [smem:[#allocation32_spill]] %s5191_s22  ;;  %p55_p1 = scmp.ge.s32.totalorder %s54_s11, 3 }
  0x38   : > { %8072 = sst [smem:[#allocation33_spill]] %s5195_s23  ;;  %p8035_p2 = scmp.eq.s32.totalorder %s5227_s8, 0 }
  0x39   : > { %8073 = sst [smem:[#allocation34_spill]] %s5211_s27  ;;  %p8034_p3 = scmp.eq.s32.totalorder %s5382_s9, 0 }
  0x3a   : > { %8074 = sst [smem:[#allocation35_spill]] %s5215_s28  ;;  %s8249_s11 = smov (%p55_p1, %s54_s11), 0 }
  0x3b   : > { %8075 = sst [smem:[#allocation36_spill]] %s5223_s30  ;;  %s8251_s0 = smov (!%p55_p1, %s61_s0), %s5223_s30 }
  0x3c   : > { %s97_s12 = sld [smem:[#allocation7 + %s5219_s29]]  ;;  %s106_s1 = sadd.s32 1, %s5195_s23 }
  0x3d   : > { %8076 = sst [smem:[#allocation37_spill]] %s8249_s11  ;;  %p63_p4 = scmp.ge.s32.totalorder %s8251_s0, 2 }
  0x3e   : > { %s98_s13 = sld [smem:[#allocation7 + %s8249_s11]]  ;;  %p113_p5 = scmp.ne.s32.totalorder %s5195_s23, %s5191_s22 }
  0x3f   : > { %p119_p6 = scmp.ne.s32.totalorder %s5191_s22, %s5187_s21  ;;  %s129_s2 = sld [smem:[#allocation7 + %s5219_s29]] }
  0x40   : > { %s8253_s0 = smov (%p63_p4, %s8251_s0), 0  ;;  %p5403_p7 = por %p113_p5, %p8035_p2 }
  0x41   : > { %8077 = sst [smem:[#allocation38_spill]] %s8253_s0  ;;  %p5409_p8 = por %p119_p6, %p8034_p3 }
  0x42   : > { %s5415_s10 = ssub.s32 %s5223_s30, %s8253_s0  ;;  %s130_s21 = sld [smem:[#allocation7 + %s8249_s11]] }
  0x43   : > { %s8079_s15 = scalar_select %p5409_p8, 1, 0 }
  0x44   : > { %s100_s7 = ssub.s32 %s97_s12, %s98_s13  ;;  %s161_s28 = sld [smem:[#allocation6 + %s5219_s29]] }
  0x45   : > { %8080 = sst [smem:[#allocation39_spill]] %s8079_s15  ;;  %s101_s27 = sor.u32 %s100_s7, %s5415_s10 }
  0x46   : > { %s162_s22 = sld [smem:[#allocation6 + %s8249_s11]]  ;;  %p104_p9 = scmp.eq.s32.totalorder %s101_s27, 0 }
  0x47   : > { %s170_s6 = sadd.s32 1, %s5171_s17  ;;  %p180_p10 = scmp.ne.s32.totalorder %s5171_s17, %s5167_s16 }
  0x48   : > { %p181_p11 = scmp.eq.s32.totalorder %s5382_s9, 5  ;;  %s132_s15 = ssub.s32 %s129_s2, %s130_s21 }
  0x49   : > { %s5426_s0 = scalar_select %p104_p9, %s5195_s23, %s106_s1  }
  0x4a   : > { %p5428_p12 = por %p181_p11, %p180_p10  ;;  %s5433_s7 = sor.u32 %s132_s15, %s5415_s10 }
  0x4b   : > { %8081 = sst [smem:[#allocation40_spill]] %s5426_s0  ;;  %p186_p13 = scmp.ne.s32.totalorder %s5167_s16, %s5163_s3 }
  0x4c   : > { %s8082_s12 = scalar_select %p5428_p12, 1, 0 }
  0x4d   : > { %s164_s27 = ssub.s32 %s161_s28, %s162_s22  ;;  %s8084_s1 = sadd.s32 4294967294, %s5227_s8  }
  0x4e   : > { %8083 = sst [smem:[#allocation41_spill]] %s8082_s12  ;;  %s165_s13 = sor.u32 %s164_s27, %s5415_s10 }
  0x4f   : > { %p187_p1 = scmp.eq.s32.totalorder %s8084_s1, 5  ;;  %p168_p4 = scmp.eq.s32.totalorder %s165_s13, 0 }
  0x50   : > { %p8033_p6 = scmp.lt.s32.totalorder %s5227_s8, 6  ;;  %s5450_s21 = sshll.u32 %s5223_s30, 5 }
  0x51   : > { %p5441_p5 = por %p187_p1, %p186_p13  ;;  %s232_s0 = sand.u32 1, %s5227_s8  }
  0x52   : > { %s5447_s15 = scalar_select %p168_p4, %s5171_s17, %s170_s6  }
  0x53   : > { %s8085_s2 = scalar_select %p5441_p5, 1, 0 }
  0x54   : > { %8087 = sst [smem:[#allocation43_spill]] %s5447_s15  ;;  %s234_s3 = sand.u32 1, %s5195_s23  }
  0x55   : > { %8086 = sst [smem:[#allocation42_spill]] %s8085_s2  ;;  %s3843_s12 = sshll.u32 %s234_s3, 6 }
  0x56   : > { %p5458_p9 = pnand %p8033_p6, %p5403_p7  ;;  %p3851_p10 = scmp.ge.s32.totalorder %s5227_s8, 1 }
  0x57   : > { %s4383_s28 = scalar_select %p5403_p7, [#allocation7], [#allocation18] }
  0x58   : > { %s4384_s6 = scalar_select %p5403_p7, %s5219_s29, 0 }
  0x59   : > { %s8255_s28 = smov (!%p8033_p6, %s4383_s28), [#allocation22]  ;;  %s236_s27 = scalar_lea.vmem [#allocation13], %s3843_s12 }
  0x5a   : > { %s8257_s6 = smov (!%p8033_p6, %s4384_s6), 0  ;;  %s247_s3 = sshll.u32 %s236_s27, 4  ;;  %s5472_s3 = int_to_ptr.vmem [resolvable:$true] %s247_s3 }
  0x5b   : > { %s237_s13 = sld [smem:[%s8255_s28 + %s8257_s6]]  ;;  %p280_p11 = scmp.lt.s32.totalorder %s5227_s8, 7 }
  0x5c   : > { %s5481_s14 = sld [smem:[#allocation6 + %s5219_s29]]  ;;  %s5491_s28 = scalar_lea.sflag [#allocation14], %s232_s0 }
  0x5d   : > { %p5475_p13 = pnand %p3851_p10, %p280_p11  ;;  %s8090_s5 = sld [smem:[#allocation59_spill]] }
  0x5e   : > { %s5489_s12 = sld [smem:[#allocation6 + %s8249_s11]]  ;;  %p4967_p1 = pneg %p5458_p9 }
  0x5f   : > { %s8089_s1 = scalar_select %p5475_p13, 1, 0 }
  0x61   : > { %s3844_s30 = sshll.u32 %s237_s13, 4 }
  0x62   : > { %s244_s23 = sadd.s32 %s3844_s30, %s5450_s21 }
  0x63   : > { %s3846_s15 = sshll.u32 %s244_s23, 6  ;;  %s4970_s27 = scalar_lea.hbm %s8090_s5, 4096 }
  0x64   : > { %s5486_s16 = scalar_lea.hbm %s8090_s5, %s3846_s15 }
  0x65   : > { %s4965_s6 = scalar_lea.hbm %s5486_s16, 1024  ;;  %p4971_p11 = scmp.lt.s32.totalorder %s5486_s16, %s8090_s5 }
  0x66   : > { %p4966_p7 = scmp.ne.s32.totalorder %s5486_s16, %s4965_s6  ;;  %p4972_p0 = scmp.lt.s32.totalorder %s4970_s27, %s4965_s6 }
  0x68   : > { %p4968_p4 = pnand %p4967_p1, %p4966_p7  ;;  %p4973_p6 = por %p4972_p0, %p4971_p11 }
  0x6a   : > { %p4969_p10 = pneg %p4968_p4 }
  0x6c   : > { %p4974_p3 = pnand %p4973_p6, %p4969_p10 }
  0x6e   : > { %4977 = shalt.err (!%p4974_p3)
}
  0x6f   : > { %s4978_s0 = scalar_lea.vmem %s5472_s3, 1024  ;;  %s5233_s15 = smov [#allocation13]  }
  0x70   : > { %p4979_p2 = scmp.ne.s32.totalorder %s5472_s3, %s4978_s0  ;;  %s4983_s13 = sshll.u32 %s5233_s15, 4  ;;  %s4984_s13 = int_to_ptr.vmem [resolvable:$false] %s4983_s13 }
  0x71   : > { %s4985_s23 = scalar_lea.vmem %s4984_s13, 2048  ;;  %p4986_p4 = scmp.lt.s32.totalorder %s5472_s3, %s4984_s13 }
  0x72   : > { %p4981_p5 = pnand %p4979_p2, %p4967_p1  ;;  %p4987_p12 = scmp.lt.s32.totalorder %s4985_s23, %s4978_s0 }
  0x74   : > { %p4982_p7 = pneg %p4981_p5  ;;  %p4988_p8 = por %p4987_p12, %p4986_p4 }
  0x76   : > { %p4989_p13 = pnand %p4988_p8, %p4982_p7 }
  0x78   : > { %4992 = shalt.err (!%p4989_p13)
}
  0x79   : > { %s8038_s6 = smov 64   ;;  %s8040_s30 = smov 4  }
  0x7a   : > { %4406 = dma.hbm_to_vmem [thread:$0]  (!%p5458_p9), %s5486_s16, 1024, %s5472_s3, %s5491_s28, %s8038_s6, %s8038_s6, %s8040_s30  }
  0x7b   : > { %s74_s27 = sadd.s32 1, %s5207_s26  ;;  %p81_p2 = scmp.ne.s32.totalorder %s5207_s26, %s5203_s25 }
  0x7c   : > { %p87_p3 = scmp.ne.s32.totalorder %s5203_s25, %s5199_s24  ;;  %s207_s17 = sand.u32 1, %s5207_s26  }
  0x7d   : > { %p8091_p8 = scmp.eq.s32.totalorder %s5227_s8, 0  ;;  %p8093_p0 = scmp.eq.s32.totalorder %s5382_s9, 0 }
  0x7e   : > { %s3839_s22 = sshll.u32 %s207_s17, 6  ;;  %s68_s24 = ssub.s32 %s5481_s14, %s5489_s12 }
  0x7f   : > { %p5523_p12 = por %p8091_p8, %p81_p2  ;;  %p5529_p5 = por %p8093_p0, %p87_p3 }
  0x80   : > { %s69_s3 = sor.u32 %s68_s24, %s5415_s10  ;;  %s211_s0 = scalar_lea.vmem [#allocation10], %s3839_s22 }
  0x81   : > { %s8094_s16 = scalar_select %p5529_p5, 1, 0 }
  0x82   : > { %s222_s15 = sshll.u32 %s211_s0, 4  ;;  %p72_p6 = scmp.eq.s32.totalorder %s69_s3, 0  ;;  %s5536_s15 = int_to_ptr.vmem [resolvable:$true] %s222_s15 }
  0x83   : > { %s4380_s13 = scalar_select %p5523_p12, [#allocation6], [#allocation17] }
  0x84   : > { %s5541_s23 = scalar_select %p72_p6, %s5207_s26, %s74_s27  }
  0x85   : > { %s4381_s6 = scalar_select %p5523_p12, %s5219_s29, 0 }
  0x86   : > { %p8095_p9 = scmp.lt.s32.totalorder %s5227_s8, 6  ;;  %s138_s12 = sadd.s32 1, %s5183_s20 }
  0x87   : > { %p8099_p11 = scmp.eq.s32.totalorder %s5433_s7, 0  ;;  %p145_p7 = scmp.ne.s32.totalorder %s5183_s20, %s5179_s19 }
  0x88   : > { %s8259_s13 = smov (!%p8095_p9, %s4380_s13), [#allocation21]  ;;  %p8096_p13 = pmov %p8095_p9 }
  0x89   : > { %p8097_p1 = pmov %p8095_p9  ;;  %p151_p4 = scmp.ne.s32.totalorder %s5179_s19, %s5175_s18 }
  0x8a   : > { %s8261_s6 = smov (!%p8096_p13, %s4381_s6), 0  ;;  %p8100_p2 = pmov %p8091_p8 }
  0x8b   : > { %p5554_p10 = pnand %p8097_p1, %p5523_p12  ;;  %s212_s14 = sld [smem:[%s8259_s13 + %s8261_s6]] }
  0x8c   : > { %s5562_s22 = scalar_select %p8099_p11, %s5183_s20, %s138_s12  }
  0x8d   : > { %p5572_p3 = por %p145_p7, %p8100_p2  ;;  %p8102_p8 = pmov %p8093_p0 }
  0x8e   : > { %s8104_s4 = sld [smem:[#allocation58_spill]]  ;;  %s5587_s18 = scalar_lea.sflag [#allocation11], %s207_s17 }
  0x8f   : > { %s8101_s0 = scalar_select %p5572_p3, 1, 0 }
  0x90   : > { %p5578_p12 = por %p151_p4, %p8102_p8  ;;  %p4995_p6 = pneg %p5554_p10 }
  0x91   : > { %s3840_s27 = sshll.u32 %s212_s14, 4 }
  0x92   : > { %s219_s3 = sadd.s32 %s5450_s21, %s3840_s27 }
  0x93   : > { %s3842_s2 = sshll.u32 %s219_s3, 6 }
  0x94   : > { %s8103_s30 = scalar_select %p5578_p12, 1, 0 }
  0x95   : > { %s5585_s13 = scalar_lea.hbm %s8104_s4, %s3842_s2  ;;  %s4998_s3 = scalar_lea.hbm %s8104_s4, 4096 }
  0x96   : > { %s4993_s14 = scalar_lea.hbm %s5585_s13, 1024  ;;  %p4999_p1 = scmp.lt.s32.totalorder %s5585_s13, %s8104_s4 }
  0x97   : > { %p4994_p0 = scmp.ne.s32.totalorder %s5585_s13, %s4993_s14  ;;  %p5000_p11 = scmp.lt.s32.totalorder %s4998_s3, %s4993_s14 }
  0x99   : > { %p4996_p9 = pnand %p4995_p6, %p4994_p0  ;;  %p5001_p7 = por %p5000_p11, %p4999_p1 }
  0x9b   : > { %p4997_p13 = pneg %p4996_p9 }
  0x9d   : > { %p5002_p4 = pnand %p5001_p7, %p4997_p13 }
  0x9f   : > { %5005 = shalt.err (!%p5002_p4)
}
  0xa0   : > { %s5006_s17 = scalar_lea.vmem %s5536_s15, 1024  ;;  %s5236_s2 = smov [#allocation10]  }
  0xa1   : > { %p5007_p2 = scmp.ne.s32.totalorder %s5536_s15, %s5006_s17  ;;  %s5011_s6 = sshll.u32 %s5236_s2, 4  ;;  %s5012_s6 = int_to_ptr.vmem [resolvable:$false] %s5011_s6 }
  0xa2   : > { %s5013_s7 = scalar_lea.vmem %s5012_s6, 2048  ;;  %p5014_p9 = scmp.lt.s32.totalorder %s5536_s15, %s5012_s6 }
  0xa3   : > { %p5009_p8 = pnand %p5007_p2, %p4995_p6  ;;  %p5015_p12 = scmp.lt.s32.totalorder %s5013_s7, %s5006_s17 }
  0xa5   : > { %p5010_p0 = pneg %p5009_p8  ;;  %p5016_p5 = por %p5015_p12, %p5014_p9 }
  0xa7   : > { %p5017_p3 = pnand %p5016_p5, %p5010_p0 }
  0xa9   : > { %5020 = shalt.err (!%p5017_p3)
}
  0xaa   : > { %s8105_s5 = smov 4   ;;  %s8106_s24 = smov 64  }
  0xab   : > { %4401 = dma.hbm_to_vmem [thread:$0]  (!%p5554_p10), %s5585_s13, 1024, %s5536_s15, %s5587_s18, %s8106_s24, %s8106_s24, %s8105_s5  }
  0xac   : > { %s8107_s14 = sand.u32 1, %s5183_s20   ;;  %p8108_p5 = scmp.ne.s32.totalorder %s8101_s0, 0 }
  0xad   : > { %s3847_s12 = sshll.u32 %s8107_s14, 6  ;;  %p8109_p3 = scmp.lt.s32.totalorder %s5227_s8, 6 }
  0xae   : > { %s4386_s27 = scalar_select %p8108_p5, [#allocation7], [#allocation19] }
  0xaf   : > { %p5617_p12 = pnand %p8109_p3, %p8108_p5  ;;  %p8111_p6 = pmov %p8109_p3 }
  0xb0   : > { %s4387_s3 = scalar_select %p8108_p5, %s5219_s29, 0 }
  0xb1   : > { %s8263_s27 = smov (!%p8111_p6, %s4386_s27), [#allocation23]  ;;  %p8112_p13 = pmov %p8109_p3 }
  0xb2   : > { %s261_s2 = scalar_lea.vmem [#allocation15], %s3847_s12  ;;  %s8113_s4 = sld [smem:[#allocation60_spill]] }
  0xb3   : > { %s8265_s3 = smov (!%p8112_p13, %s4387_s3), 0  ;;  %s272_s15 = sshll.u32 %s261_s2, 4  ;;  %s5631_s15 = int_to_ptr.vmem [resolvable:$true] %s272_s15 }
  0xb4   : > { %s262_s17 = sld [smem:[%s8263_s27 + %s8265_s3]]  ;;  %p5023_p1 = pneg %p5617_p12 }
  0xba   : > { %s3848_s13 = sshll.u32 %s262_s17, 4 }
  0xbb   : > { %s269_s18 = sadd.s32 %s3848_s13, %s5450_s21  ;;  %s5026_s21 = scalar_lea.hbm %s8113_s4, 4096 }
  0xbc   : > { %s3850_s6 = sshll.u32 %s269_s18, 6 }
  0xbd   : > { %s5636_s11 = scalar_lea.hbm %s8113_s4, %s3850_s6 }
  0xbe   : > { %s5021_s0 = scalar_lea.hbm %s5636_s11, 1024  ;;  %p5027_p4 = scmp.lt.s32.totalorder %s5636_s11, %s8113_s4 }
  0xbf   : > { %p5022_p10 = scmp.ne.s32.totalorder %s5636_s11, %s5021_s0  ;;  %p5028_p2 = scmp.lt.s32.totalorder %s5026_s21, %s5021_s0 }
  0xc1   : > { %p5024_p11 = pnand %p5023_p1, %p5022_p10  ;;  %p5029_p8 = por %p5028_p2, %p5027_p4 }
  0xc3   : > { %p5025_p7 = pneg %p5024_p11 }
  0xc5   : > { %p5030_p0 = pnand %p5029_p8, %p5025_p7 }
  0xc7   : > { %5033 = shalt.err (!%p5030_p0)
}
  0xc8   : > { %s5034_s2 = scalar_lea.vmem %s5631_s15, 1024  ;;  %s5237_s13 = smov [#allocation15]  }
  0xc9   : > { %p5035_p9 = scmp.ne.s32.totalorder %s5631_s15, %s5034_s2  ;;  %s5039_s18 = sshll.u32 %s5237_s13, 4  ;;  %s5040_s18 = int_to_ptr.vmem [resolvable:$false] %s5039_s18 }
  0xca   : > { %s5041_s6 = scalar_lea.vmem %s5040_s18, 2048  ;;  %p5042_p6 = scmp.lt.s32.totalorder %s5631_s15, %s5040_s18 }
  0xcb   : > { %p5037_p5 = pnand %p5035_p9, %p5023_p1  ;;  %p5043_p13 = scmp.lt.s32.totalorder %s5041_s6, %s5034_s2 }
  0xcd   : > { %p5038_p3 = pneg %p5037_p5  ;;  %p5044_p10 = por %p5043_p13, %p5042_p6 }
  0xcf   : > { %p5045_p11 = pnand %p5044_p10, %p5038_p3 }
  0xd1   : > { %5048 = shalt.err (!%p5045_p11)
}
  0xd2   : > { %4411 = dma.hbm_to_vmem [thread:$0]  (!%p5617_p12), %s5636_s11, 1024, %s5631_s15, %s5491_s28, %s8106_s24, %s8106_s24, %s8105_s5  }
  0xd3   : > { %p8114_p1 = scmp.ne.s32.totalorder %s8089_s1, 0 }
  0xd4   : > { %s286_s7 = sand.u32 (!%p8114_p1), 1, %s5203_s25   ;;  %p8115_p7 = scmp.ne.s32.totalorder (!%p8114_p1), %s8094_s16, 0 }
  0xd5   : > { %284 = sbr.rel (%p8114_p1) target bundleno = 2740 (0xab4), region = 32  ;;  %s3852_s14 = sshll.u32 (!%p8114_p1), %s286_s7, 6 }
  0xd6   : > { %s287_s0 = scalar_lea.sflag (!%p8114_p1), [#allocation11], %s286_s7  ;;  %s5663_s12 = scalar_lea.vmem (!%p8114_p1), [#allocation10], %s3852_s14 }
  0xda   : > { %5146 = dma.done.wait (%p8115_p7), %s287_s0, 1024  }
  0xdb   : > { %5148 = vsyncadd (%p8115_p7), %s287_s0, 4294966272  ;;  %s8116_s10 = sld [smem:[#allocation32_spill]]  ;;  %s295_s21 = sand.u32 1, %s5382_s9  }
  0xdc   : > { %s8117_s27 = sld [smem:[#allocation39_spill]]  ;;  %s296_s1 = scalar_lea.sflag [#allocation14], %s295_s21 }
  0xe1   : > { %s297_s11 = sand.u32 1, %s8116_s10  }
  0xe2   : > { %s3853_s28 = sshll.u32 %s297_s11, 6  ;;  %p8118_p12 = scmp.ne.s32.totalorder %s8117_s27, 0 }
  0xe3   : > { %s5671_s5 = scalar_lea.vmem [#allocation13], %s3853_s28 }
  0xe4   : > { %5150 = dma.done.wait (%p8118_p12), %s296_s1, 1024  }
  0xe5   : > { %5152 = vsyncadd (%p8118_p12), %s296_s1, 4294966272  ;;  %s306_s24 = sand.u32 1, %s5179_s19   ;;  %p8119_p4 = scmp.ne.s32.totalorder %s8103_s30, 0 }
  0xe6   : > { %s3854_s15 = sshll.u32 %s306_s24, 6 }
  0xe7   : > { %s5678_s16 = scalar_lea.vmem [#allocation15], %s3854_s15 }
  0xe8   : > { %5154 = dma.done.wait (%p8119_p4), %s296_s1, 1024  }
  0xe9   : > { %5156 = vsyncadd (%p8119_p4), %s296_s1, 4294966272  ;;  %s8120_s9 = sld [smem:[#allocation30_spill]] }
  0xea   : > { %s8121_s3 = sld [smem:[#allocation34_spill]] }
  0xef   : > { %s338_s17 = sand.u32 1, %s8120_s9  }
  0xf0   : > { %s5686_s2 = sld [smem:[#allocation6 + %s8121_s3]]  ;;  %s3855_s13 = sshll.u32 %s338_s17, 6 }
  0xf1   : > { %s5691_s18 = sld [smem:[#allocation7 + %s8121_s3]]  ;;  %s5693_s6 = scalar_lea.vmem [#allocation16], %s3855_s13 }
  0xf7   : > { %p3856_p2 = scmp.ne.s32.totalorder %s5691_s18, 0 }
  0xf9   : > { %356 = sbr.rel (%p3856_p2) target bundleno = 303 (0x12f), region = 48 }
  0xfe   : > { %vm421_vm0 = vcmask 523264   ;;  %v5238_v0 = vmov -2.3819763e+38   ;;  %v5239_v1 = vmov 0.0  }
  0xff   : > { %357 = vst [vmem:[#allocation2 + $0xb0] sm:$0xff] %v5238_v0  ;;  %358 = vst [vmem:[#allocation2] sm:$0xff] %v5238_v0 }
 0x100   : > { %359 = vst [vmem:[#allocation2 + $0xd8] sm:$0xff] %v5238_v0  ;;  %360 = vst [vmem:[#allocation2 + $0x18] sm:$0xff] %v5238_v0 }
 0x101   : > { %361 = vst [vmem:[#allocation2 + $0x50] sm:$0xff] %v5238_v0  ;;  %362 = vst [vmem:[#allocation2 + $0x68] sm:$0xff] %v5238_v0 }
 0x102   : > { %363 = vst [vmem:[#allocation2 + $0x30] sm:$0xff] %v5238_v0  ;;  %364 = vst [vmem:[#allocation2 + $0x48] sm:$0xff] %v5238_v0 }
 0x103   : > { %365 = vst [vmem:[#allocation2 + $0x80] sm:$0xff] %v5238_v0  ;;  %366 = vst [vmem:[#allocation2 + $0x88] sm:$0xff] %v5238_v0 }
 0x104   : > { %367 = vst [vmem:[#allocation2 + $0xe8] sm:$0xff] %v5238_v0  ;;  %368 = vst [vmem:[#allocation2 + $0xb8] sm:$0xff] %v5238_v0 }
 0x105   : > { %369 = vst [vmem:[#allocation2 + $0x60] sm:$0xff] %v5238_v0  ;;  %370 = vst [vmem:[#allocation2 + $0xf0] sm:$0xff] %v5238_v0 }
 0x106   : > { %371 = vst [vmem:[#allocation2 + $0x8] sm:$0xff] %v5238_v0  ;;  %372 = vst [vmem:[#allocation2 + $0x78] sm:$0xff] %v5238_v0 }
 0x107   : > { %373 = vst [vmem:[#allocation2 + $0x38] sm:$0xff] %v5238_v0  ;;  %374 = vst [vmem:[#allocation2 + $0x58] sm:$0xff] %v5238_v0 }
 0x108   : > { %375 = vst [vmem:[#allocation2 + $0x40] sm:$0xff] %v5238_v0  ;;  %376 = vst [vmem:[#allocation2 + $0xc8] sm:$0xff] %v5238_v0 }
 0x109   : > { %377 = vst [vmem:[#allocation2 + $0xe0] sm:$0xff] %v5238_v0  ;;  %378 = vst [vmem:[#allocation2 + $0x90] sm:$0xff] %v5238_v0 }
 0x10a   : > { %379 = vst [vmem:[#allocation2 + $0x70] sm:$0xff] %v5238_v0  ;;  %380 = vst [vmem:[#allocation2 + $0xc0] sm:$0xff] %v5238_v0 }
 0x10b   : > { %381 = vst [vmem:[#allocation2 + $0xa8] sm:$0xff] %v5238_v0  ;;  %382 = vst [vmem:[#allocation2 + $0xd0] sm:$0xff] %v5238_v0 }
 0x10c   : > { %383 = vst [vmem:[#allocation2 + $0x10] sm:$0xff] %v5238_v0  ;;  %384 = vst [vmem:[#allocation2 + $0x28] sm:$0xff] %v5238_v0 }
 0x10d   : > { %385 = vst [vmem:[#allocation2 + $0xa0] sm:$0xff] %v5238_v0  ;;  %386 = vst [vmem:[#allocation2 + $0xf8] sm:$0xff] %v5238_v0 }
 0x10e   : > { %387 = vst [vmem:[#allocation2 + $0x20] sm:$0xff] %v5238_v0  ;;  %388 = vst [vmem:[#allocation2 + $0x98] sm:$0xff] %v5238_v0 }
 0x10f   : > { %389 = vst [vmem:[#allocation3 + $0x80] sm:$0xff] %v5239_v1  ;;  %390 = vst [vmem:[#allocation3 + $0xc8] sm:$0xff] %v5239_v1 }
 0x110   : > { %391 = vst [vmem:[#allocation3 + $0xe8] sm:$0xff] %v5239_v1  ;;  %392 = vst [vmem:[#allocation3 + $0x78] sm:$0xff] %v5239_v1 }
 0x111   : > { %393 = vst [vmem:[#allocation3 + $0x8] sm:$0xff] %v5239_v1  ;;  %394 = vst [vmem:[#allocation3 + $0x90] sm:$0xff] %v5239_v1 }
 0x112   : > { %395 = vst [vmem:[#allocation3 + $0x58] sm:$0xff] %v5239_v1  ;;  %396 = vst [vmem:[#allocation3 + $0xa8] sm:$0xff] %v5239_v1 }
 0x113   : > { %397 = vst [vmem:[#allocation3 + $0xd0] sm:$0xff] %v5239_v1  ;;  %398 = vst [vmem:[#allocation3 + $0xb0] sm:$0xff] %v5239_v1 }
 0x114   : > { %399 = vst [vmem:[#allocation3 + $0x38] sm:$0xff] %v5239_v1  ;;  %400 = vst [vmem:[#allocation3 + $0x40] sm:$0xff] %v5239_v1 }
 0x115   : > { %401 = vst [vmem:[#allocation3 + $0xe0] sm:$0xff] %v5239_v1  ;;  %402 = vst [vmem:[#allocation3 + $0x60] sm:$0xff] %v5239_v1 }
 0x116   : > { %403 = vst [vmem:[#allocation3 + $0x18] sm:$0xff] %v5239_v1  ;;  %404 = vst [vmem:[#allocation3 + $0x68] sm:$0xff] %v5239_v1 }
 0x117   : > { %405 = vst [vmem:[#allocation3 + $0x10] sm:$0xff] %v5239_v1  ;;  %406 = vst [vmem:[#allocation3 + $0x70] sm:$0xff] %v5239_v1 }
 0x118   : > { %407 = vst [vmem:[#allocation3 + $0x50] sm:$0xff] %v5239_v1  ;;  %408 = vst [vmem:[#allocation3 + $0xa0] sm:$0xff] %v5239_v1 }
 0x119   : > { %409 = vst [vmem:[#allocation3 + $0xd8] sm:$0xff] %v5239_v1  ;;  %410 = vst [vmem:[#allocation3 + $0x30] sm:$0xff] %v5239_v1 }
 0x11a   : > { %411 = vst [vmem:[#allocation3 + $0x20] sm:$0xff] %v5239_v1  ;;  %412 = vst [vmem:[#allocation3 + $0xf0] sm:$0xff] %v5239_v1 }
 0x11b   : > { %413 = vst [vmem:[#allocation3 + $0x88] sm:$0xff] %v5239_v1  ;;  %414 = vst [vmem:[#allocation3 + $0x48] sm:$0xff] %v5239_v1 }
 0x11c   : > { %415 = vst [vmem:[#allocation3 + $0xf8] sm:$0xff] %v5239_v1  ;;  %416 = vst [vmem:[#allocation3 + $0xc0] sm:$0xff] %v5239_v1 }
 0x11d   : > { %417 = vst [vmem:[#allocation3 + $0xb8] sm:$0xff] %v5239_v1  ;;  %418 = vst [vmem:[#allocation3] sm:$0xff] %v5239_v1 }
 0x11e   : > { %419 = vst [vmem:[#allocation3 + $0x28] sm:$0xff] %v5239_v1  ;;  %420 = vst [vmem:[#allocation3 + $0x98] sm:$0xff] %v5239_v1 }
 0x11f   : > { %422 = vst.msk [vmem:[#allocation4] sm:$0xff] %vm421_vm0, %v5239_v1  ;;  %423 = vst.msk [vmem:[#allocation4 + $0x8] sm:$0xff] %vm421_vm0, %v5239_v1 }
 0x120   : > { %424 = vst.msk [vmem:[#allocation4 + $0x10] sm:$0xff] %vm421_vm0, %v5239_v1  ;;  %425 = vst.msk [vmem:[#allocation4 + $0x18] sm:$0xff] %vm421_vm0, %v5239_v1 }
 0x121   : > { %426 = vst.msk [vmem:[#allocation4 + $0x20] sm:$0xff] %vm421_vm0, %v5239_v1  ;;  %427 = vst.msk [vmem:[#allocation4 + $0x28] sm:$0xff] %vm421_vm0, %v5239_v1 }
 0x122   : > { %428 = vst.msk [vmem:[#allocation4 + $0x30] sm:$0xff] %vm421_vm0, %v5239_v1  ;;  %429 = vst.msk [vmem:[#allocation4 + $0x38] sm:$0xff] %vm421_vm0, %v5239_v1 }
 0x123   : > { %430 = vst.msk [vmem:[#allocation4 + $0x40] sm:$0xff] %vm421_vm0, %v5239_v1  ;;  %431 = vst.msk [vmem:[#allocation4 + $0x48] sm:$0xff] %vm421_vm0, %v5239_v1 }
 0x124   : > { %432 = vst.msk [vmem:[#allocation4 + $0x50] sm:$0xff] %vm421_vm0, %v5239_v1  ;;  %433 = vst.msk [vmem:[#allocation4 + $0x58] sm:$0xff] %vm421_vm0, %v5239_v1 }
 0x125   : > { %434 = vst.msk [vmem:[#allocation4 + $0x60] sm:$0xff] %vm421_vm0, %v5239_v1  ;;  %435 = vst.msk [vmem:[#allocation4 + $0x68] sm:$0xff] %vm421_vm0, %v5239_v1 }
 0x126   : > { %436 = vst.msk [vmem:[#allocation4 + $0x70] sm:$0xff] %vm421_vm0, %v5239_v1  ;;  %437 = vst.msk [vmem:[#allocation4 + $0x78] sm:$0xff] %vm421_vm0, %v5239_v1 }
 0x127   : > { %438 = vst.msk [vmem:[#allocation4 + $0x80] sm:$0xff] %vm421_vm0, %v5239_v1  ;;  %439 = vst.msk [vmem:[#allocation4 + $0x88] sm:$0xff] %vm421_vm0, %v5239_v1 }
 0x128   : > { %440 = vst.msk [vmem:[#allocation4 + $0x90] sm:$0xff] %vm421_vm0, %v5239_v1  ;;  %441 = vst.msk [vmem:[#allocation4 + $0x98] sm:$0xff] %vm421_vm0, %v5239_v1 }
 0x129   : > { %442 = vst.msk [vmem:[#allocation4 + $0xa0] sm:$0xff] %vm421_vm0, %v5239_v1  ;;  %443 = vst.msk [vmem:[#allocation4 + $0xa8] sm:$0xff] %vm421_vm0, %v5239_v1 }
 0x12a   : > { %444 = vst.msk [vmem:[#allocation4 + $0xb0] sm:$0xff] %vm421_vm0, %v5239_v1  ;;  %445 = vst.msk [vmem:[#allocation4 + $0xb8] sm:$0xff] %vm421_vm0, %v5239_v1 }
 0x12b   : > { %446 = vst.msk [vmem:[#allocation4 + $0xc0] sm:$0xff] %vm421_vm0, %v5239_v1  ;;  %447 = vst.msk [vmem:[#allocation4 + $0xc8] sm:$0xff] %vm421_vm0, %v5239_v1 }
 0x12c   : > { %448 = vst.msk [vmem:[#allocation4 + $0xd0] sm:$0xff] %vm421_vm0, %v5239_v1  ;;  %449 = vst.msk [vmem:[#allocation4 + $0xd8] sm:$0xff] %vm421_vm0, %v5239_v1 }
 0x12d   : > { %450 = vst.msk [vmem:[#allocation4 + $0xe0] sm:$0xff] %vm421_vm0, %v5239_v1  ;;  %451 = vst.msk [vmem:[#allocation4 + $0xe8] sm:$0xff] %vm421_vm0, %v5239_v1 }
 0x12e   : > { %452 = vst.msk [vmem:[#allocation4 + $0xf0] sm:$0xff] %vm421_vm0, %v5239_v1  ;;  %453 = vst.msk [vmem:[#allocation4 + $0xf8] sm:$0xff] %vm421_vm0, %v5239_v1 }
 0x12f PF: > { %s8122_s30 = sld [smem:[#allocation34_spill]] }
 0x135   : > { %s5793_s7 = sld [smem:[#allocation9 + %s8122_s30]] }
 0x13b   : > { %p3857_p8 = scmp.ne.s32.totalorder %s5793_s7, 1 }
 0x13d   : > { %458 = sbr.rel (%p3857_p8) target bundleno = 1426 (0x592), region = 52 }
 0x142   : > { %v4567_v2 = vld [vmem:[%s5671_s5 + $0x38] sm:$0xff]   ;;  %vm659_vm1 = vcmask 523264   ;;  %v4568_v3 = vld [vmem:[%s5671_s5 + $0x30] sm:$0xff]   ;;  %s5240_s14 = smov 64   ;;  %v4569_v5 = vld [vmem:[%s5671_s5 + $0x28] sm:$0xff]   ;;  %v524_v58 = vlaneseq  ;;  %s3859_s0 = sshll.u32 %s5691_s18, 7 }
 0x143   : > { %4348 = vmatprep.subr.msk.bf16.mxu0 %vm659_vm1, %v4567_v2  ;;  %v706_v4 = vsel %vm659_vm1, %v4567_v2, 0  ;;  %1340 = vrot.lane.b32.xlu0 %v4567_v2, %s5240_s14  ;;  %v703_v6 = vsel %vm659_vm1, %v4568_v3, 0  ;;  %v459_v7 = vld [vmem:[%s5663_s12] sm:$0xf]  ;;  %v460_v8 = vld [vmem:[%s5663_s12 + $0x4] sm:$0xf]  ;;  %v561_v61 = vstv %s3859_s0 }
 0x144   : > { %4093 = vmatpush3.bf16.xpose.msra.mxu0 %v706_v4  ;;  %1338 = vrot.lane.b32.xlu1 %v4568_v3, %s5240_s14  ;;  %v475_v9 = vmul.bf16 1040203264, %v459_v7  ;;  %v476_v10 = vmul.bf16 1040203264, %v460_v8  ;;  %v700_v12 = vsel %vm659_vm1, %v4569_v5, 0  ;;  %v5815_v13 = vld [vmem:[%s5671_s5 + $0x20] sm:$0xff]  }
 0x145   : > { %4349 = vmatprep.subr.msk.bf16.mxu0 %vm659_vm1, %v4568_v3  ;;  %v697_v14 = vsel %vm659_vm1, %v5815_v13, 0  ;;  %v5822_v15 = vld [vmem:[%s5671_s5 + $0x18] sm:$0xff]   ;;  %v5829_v17 = vld [vmem:[%s5671_s5 + $0x10] sm:$0xff]   ;;  %v5836_v19 = vld [vmem:[%s5671_s5 + $0x8] sm:$0xff]   ;;  %s3858_s10 = sshll.u32 %s5686_s2, 7  ;;  %v5893_v59 = vshrl.u32 %v524_v58, 7 }
 0x146   : > { %v5808_v11 = vcombine.low %v475_v9, %v476_v10  ;;  %v694_v16 = vsel %vm659_vm1, %v5822_v15, 0  ;;  %v691_v18 = vsel %vm659_vm1, %v5829_v17, 0  ;;  %v688_v20 = vsel %vm659_vm1, %v5836_v19, 0  ;;  %v5843_v21 = vld [vmem:[%s5671_s5] sm:$0xff]   ;;  %v461_v22 = vld [vmem:[%s5663_s12 + $0x8] sm:$0xf] }
 0x147   : > { %1336 = vrot.lane.b32.xlu0 %v4569_v5, %s5240_s14  ;;  %v462_v23 = vld [vmem:[%s5663_s12 + $0xc] sm:$0xf]  ;;  %v685_v24 = vsel %vm659_vm1, %v5843_v21, 0  ;;  %v463_v25 = vld [vmem:[%s5663_s12 + $0x10] sm:$0xf]  ;;  %v560_v60 = vand.u32 127, %v524_v58  ;;  %v5903_v2 = vstv %s3858_s10 }
 0x148   : > { %4108 = vmatprep.mubr.msk.bf16.mxu0 %vm659_vm1, %v5808_v11  ;;  %v464_v26 = vld [vmem:[%s5663_s12 + $0x14] sm:$0xf]  ;;  %v477_v27 = vmul.bf16 1040203264, %v461_v22  ;;  %v478_v28 = vmul.bf16 1040203264, %v462_v23  ;;  %v5954_v22 = vadd.s32 %v5903_v2, %v5893_v59 }
 0x149   : > { %v479_v29 = vmul.bf16 1040203264, %v463_v25  ;;  %v480_v30 = vmul.bf16 1040203264, %v464_v26  ;;  %v465_v33 = vld [vmem:[%s5663_s12 + $0x18] sm:$0xf]  ;;  %v5906_v3 = vadd.s32 %v561_v61, %v560_v60 }
 0x14a   : > { %v5853_v31 = vcombine.low %v477_v27, %v478_v28  ;;  %v466_v34 = vld [vmem:[%s5663_s12 + $0x1c] sm:$0xf]  ;;  %v467_v35 = vld [vmem:[%s5663_s12 + $0x20] sm:$0xf]  ;;  %v468_v36 = vld [vmem:[%s5663_s12 + $0x24] sm:$0xf] }
 0x14b   : > { %v5855_v32 = vcombine.low %v479_v29, %v480_v30  ;;  %v481_v37 = vmul.bf16 1040203264, %v465_v33  ;;  %v482_v38 = vmul.bf16 1040203264, %v466_v34  ;;  %v483_v39 = vmul.bf16 1040203264, %v467_v35 }
 0x14c   : > { %4095 = vmatpush3.bf16.xpose.msra.mxu0 %v703_v6  ;;  %v484_v40 = vmul.bf16 1040203264, %v468_v36  ;;  %v469_v43 = vld [vmem:[%s5663_s12 + $0x28] sm:$0xf]  ;;  %v470_v44 = vld [vmem:[%s5663_s12 + $0x2c] sm:$0xf]  ;;  %vm563_vm5 = vcmp.le.s32.totalorder %v5906_v3, %v5954_v22 }
 0x14d   : > { %4350 = vmatprep.subr.msk.bf16.mxu0 %vm659_vm1, %v4569_v5  ;;  %v5865_v41 = vcombine.low %v481_v37, %v482_v38  ;;  %v471_v45 = vld [vmem:[%s5663_s12 + $0x30] sm:$0xf]  ;;  %v472_v46 = vld [vmem:[%s5663_s12 + $0x34] sm:$0xf]  ;;  %v485_v47 = vmul.bf16 1040203264, %v469_v43 }
 0x14e   : > { %v5867_v42 = vcombine.low %v483_v39, %v484_v40  ;;  %v486_v48 = vmul.bf16 1040203264, %v470_v44  ;;  %v487_v49 = vmul.bf16 1040203264, %v471_v45  ;;  %v488_v50 = vmul.bf16 1040203264, %v472_v46 }
 0x14f   : > { %v473_v53 = vld [vmem:[%s5663_s12 + $0x38] sm:$0xf]  ;;  %v474_v54 = vld [vmem:[%s5663_s12 + $0x3c] sm:$0xf]  ;;  %v5899_v63 = vld [vmem:[%s5678_s16 + $0x30] sm:$0xff]   ;;  %v533_v0 = vadd.s32 64, %v5893_v59 }
 0x150   : > { %v5877_v51 = vcombine.low %v485_v47, %v486_v48  ;;  %v5879_v52 = vcombine.low %v487_v49, %v488_v50  ;;  %v489_v55 = vmul.bf16 1040203264, %v473_v53  ;;  %v490_v56 = vmul.bf16 1040203264, %v474_v54  ;;  %v5896_v62 = vld [vmem:[%s5678_s16 + $0x38] sm:$0xff]   ;;  %v5922_v6 = vld [vmem:[%s5678_s16 + $0x28] sm:$0xff]  }
 0x151   : > { %v536_v1 = vadd.s32 88, %v5893_v59  ;;  %4124 = vmatprep.subr.bf16.mxu1 %v5896_v62  ;;  %v5910_v4 = vadd.s32 %v5903_v2, %v533_v0  ;;  %v5927_v7 = vld [vmem:[%s5678_s16 + $0x20] sm:$0xff]   ;;  %v5932_v8 = vld [vmem:[%s5678_s16 + $0x18] sm:$0xff]   ;;  %v5935_v9 = vld [vmem:[%s5678_s16 + $0x10] sm:$0xff]   ;;  %v526_v23 = vadd.s32 8, %v5893_v59  ;;  %v531_v25 = vadd.s32 48, %v5893_v59 }
 0x152   : > { %v5887_v57 = vcombine.low %v489_v55, %v490_v56  ;;  %4125 = vmatpush3.bf16.msra.mxu1 %v5896_v62  ;;  %v4581_v10 = vld [vmem:[%s5678_s16 + $0x8] sm:$0xff]   ;;  %v529_v28 = vadd.s32 32, %v5893_v59  ;;  %v532_v37 = vadd.s32 56, %v5893_v59  ;;  %v530_v45 = vadd.s32 40, %v5893_v59 }
 0x153   : > { %v5913_v5 = vadd.s32 %v5903_v2, %v536_v1  ;;  %4126 = vmatprep.subr.bf16.mxu1 %v5899_v63  ;;  %vm571_vm2 = vcmp.le.s32.totalorder %v5906_v3, %v5910_v4  ;;  %v5966_v27 = vadd.s32 %v5903_v2, %v526_v23  ;;  %v5978_v33 = vadd.s32 %v5903_v2, %v531_v25 }
 0x154   : > { %4097 = vmatpush3.bf16.xpose.msra.mxu0 %v700_v12  ;;  %v4582_v12 = vld [vmem:[%s5678_s16] sm:$0xff]   ;;  %v5989_v36 = vadd.s32 %v5903_v2, %v529_v28  ;;  %v6009_v44 = vadd.s32 %v5903_v2, %v532_v37  ;;  %v6026_v50 = vadd.s32 %v5903_v2, %v530_v45  ;;  %v534_v53 = vadd.s32 72, %v5893_v59 }
 0x155   : > { %4351 = vmatprep.subr.msk.bf16.mxu0 %vm659_vm1, %v5815_v13  ;;  %vm574_vm3 = vcmp.le.s32.totalorder %v5906_v3, %v5913_v5  ;;  %vm564_vm7 = vcmp.le.s32.totalorder %v5906_v3, %v5966_v27  ;;  %vm569_vm8 = vcmp.le.s32.totalorder %v5906_v3, %v5978_v33  ;;  %v539_v60 = vadd.s32 112, %v5893_v59 }
 0x156   : > { %4127 = vmatpush3.bf16.msra.mxu1 %v5899_v63  ;;  %vm567_vm9 = vcmp.le.s32.totalorder %v5906_v3, %v5989_v36  ;;  %vm570_vm10 = vcmp.le.s32.totalorder %v5906_v3, %v6009_v44  ;;  %vm568_vm11 = vcmp.le.s32.totalorder %v5906_v3, %v6026_v50  ;;  %v6038_v58 = vadd.s32 %v5903_v2, %v534_v53 }
 0x157   : > { %4128 = vmatprep.subr.bf16.mxu1 %v5922_v6  ;;  %v538_v37 = vadd.s32 104, %v5893_v59  ;;  %v535_v53 = vadd.s32 80, %v5893_v59 }
 0x158   : > { %vm572_vm12 = vcmp.le.s32.totalorder %v5906_v3, %v6038_v58 }
 0x159   : > { %v6088_v45 = vadd.s32 %v5903_v2, %v538_v37 }
 0x15a   : > { %4129 = vmatpush3.bf16.msra.mxu1 %v5922_v6 }
 0x15b   : > { %4130 = vmatprep.subr.bf16.mxu1 %v5927_v7  ;;  %8125 = vst [vmem:[#allocation46_spill] sm:$0xff] %v6088_v45  ;;  %vm576_vm0 = vcmp.le.s32.totalorder %v5906_v3, %v6088_v45 }
 0x15c   : > { %4099 = vmatpush3.bf16.xpose.msra.mxu0 %v697_v14 }
 0x15d   : > { %4352 = vmatprep.subr.msk.bf16.mxu0 %vm659_vm1, %v5822_v15 }
 0x15e   : > { %4131 = vmatpush3.bf16.msra.mxu1 %v5927_v7 }
 0x15f   : > { %4132 = vmatprep.subr.bf16.mxu1 %v5932_v8 }
 0x162   : > { %4133 = vmatpush3.bf16.msra.mxu1 %v5932_v8 }
 0x163   : > { %4134 = vmatprep.subr.bf16.mxu1 %v5935_v9 }
 0x164   : > { %4101 = vmatpush3.bf16.xpose.msra.mxu0 %v694_v16  ;;  %v527_v16 = vadd.s32 16, %v5893_v59 }
 0x165   : > { %4353 = vmatprep.subr.msk.bf16.mxu0 %vm659_vm1, %v5829_v17 }
 0x166   : > { %4135 = vmatpush3.bf16.msra.mxu1 %v5935_v9 }
 0x167   : > { %4136 = vmatprep.subr.bf16.mxu1 %v4581_v10 }
 0x16a   : > { %4137 = vmatpush3.bf16.msra.mxu1 %v4581_v10  ;;  %v6050_v10 = vadd.s32 %v5903_v2, %v539_v60 }
 0x16b   : > { %4138 = vmatprep.subr.bf16.mxu1 %v4582_v12 }
 0x16c   : > { %4103 = vmatpush3.bf16.xpose.msra.mxu0 %v691_v18  ;;  %v5949_v18 = vadd.s32 %v5903_v2, %v527_v16  ;;  %8123 = vst [vmem:[#allocation44_spill] sm:$0xff] %v6050_v10  ;;  %vm577_vm13 = vcmp.le.s32.totalorder %v5906_v3, %v6050_v10 }
 0x16d   : > { %4354 = vmatprep.subr.msk.bf16.mxu0 %vm659_vm1, %v5836_v19 }
 0x16e   : > { %4139 = vmatpush3.bf16.msra.mxu1 %v4582_v12  ;;  %vm565_vm4 = vcmp.le.s32.totalorder %v5906_v3, %v5949_v18  ;;  %v537_v12 = vadd.s32 96, %v5893_v59 }
 0x170   : > { %v6062_v25 = vadd.s32 %v5903_v2, %v537_v12 }
 0x172   : > { %vm575_vm14 = vcmp.le.s32.totalorder %v5906_v3, %v6062_v25 }
 0x174   : > { %4105 = vmatpush3.bf16.xpose.msra.mxu0 %v688_v20  ;;  %v528_v20 = vadd.s32 24, %v5893_v59 }
 0x175   : > { %4355 = vmatprep.subr.msk.bf16.mxu0 %vm659_vm1, %v5843_v21 }
 0x17c   : > { %4107 = vmatpush3.bf16.xpose.msra.mxu0 %v685_v24  ;;  %v5960_v24 = vadd.s32 %v5903_v2, %v528_v20 }
 0x17e   : > { %vm566_vm6 = vcmp.le.s32.totalorder %v5906_v3, %v5960_v24 }
 0x183   : > { %4109 = vmatmul.mubr.msk.bf16.vlgmr.msra.gmra.mxu0 %vm659_vm1, %v5853_v31 }
 0x184   : > { %4112 = vmatprep.mubr.msk.bf16.mxu0 %vm659_vm1, %v5855_v32 }
 0x18b   : > { %4113 = vmatmul.mubr.msk.bf16.gmra.mxu0 %vm659_vm1, %v5865_v41 }
 0x18c   : > { %4116 = vmatprep.mubr.msk.bf16.mxu0 %vm659_vm1, %v5867_v42 }
 0x193   : > { %4117 = vmatmul.mubr.msk.bf16.gmra.mxu0 %vm659_vm1, %v5877_v51 }
 0x194   : > { %4120 = vmatprep.mubr.msk.bf16.mxu0 %vm659_vm1, %v5879_v52 }
 0x19b   : > { %4121 = vmatmul.mubr.msk.bf16.gmra.mxu0 %vm659_vm1, %v5887_v57 }
 0x1b5   : > { %v5943_v14 = vpop.permute.xlu0 %1340 }
 0x1b6   : > { %4356 = vmatprep.subr.msk.bf16.mxu1 %vm659_vm1, %v5943_v14 }
 0x243   : > { %v4110_v26 = vpop.f32.mrf.mxu0 }
 0x244   : > { %v5972_v29 = vsel %vm565_vm4, %v4110_v26, -2.3819763e+38  ;;  %v540_v26 = vadd.s32 120, %v5893_v59 }
 0x245   : > { %857 = vmax.xlane.f32.xlu1 %v5972_v29  ;;  %v742_v30 = vpop.f32.mrf.mxu0 }
 0x246   : > { %v5983_v34 = vsel %vm563_vm5, %v742_v30, -2.3819763e+38 }
 0x247   : > { %853 = vmax.xlane.f32.xlu0 %v5983_v34  ;;  %v4111_v35 = vpop.f32.mrf.mxu0 }
 0x248   : > { %v5995_v38 = vsel %vm566_vm6, %v4111_v35, -2.3819763e+38  ;;  %v6074_v35 = vadd.s32 %v5903_v2, %v540_v26 }
 0x249   : > { %859 = vmax.xlane.f32.xlu1 %v5995_v38  ;;  %v745_v39 = vpop.f32.mrf.mxu0 }
 0x24a   : > { %v6003_v40 = vsel %vm564_vm7, %v745_v39, -2.3819763e+38  ;;  %8124 = vst [vmem:[#allocation45_spill] sm:$0xff] %v6074_v35  ;;  %vm8046_vm15 = vcmp.le.s32.totalorder %v5906_v3, %v6074_v35 }
 0x24b   : > { %855 = vmax.xlane.f32.xlu0 %v6003_v40  ;;  %v4114_v43 = vpop.f32.mrf.mxu0 }
 0x24c   : > { %v6015_v46 = vsel %vm569_vm8, %v4114_v43, -2.3819763e+38 }
 0x24d   : > { %865 = vmax.xlane.f32.xlu1 %v6015_v46  ;;  %v758_v47 = vpop.f32.mrf.mxu0 }
 0x24e   : > { %v6021_v48 = vsel %vm567_vm9, %v758_v47, -2.3819763e+38 }
 0x24f   : > { %v4115_v49 = vpop.f32.mrf.mxu0 }
 0x250   : > { %v6033_v55 = vsel %vm570_vm10, %v4115_v49, -2.3819763e+38 }
 0x251   : > { %861 = vmax.xlane.f32.xlu1 %v6021_v48  ;;  %v761_v54 = vpop.f32.mrf.mxu0 }
 0x252   : > { %v6045_v0 = vsel %vm568_vm11, %v761_v54, -2.3819763e+38  ;;  %v6107_v54 = vadd.s32 %v5903_v2, %v535_v53 }
 0x253   : > { %v4118_v56 = vpop.f32.mrf.mxu0 }
 0x255   : > { %867 = vmax.xlane.f32.xlu1 %v6033_v55  ;;  %v774_v61 = vpop.f32.mrf.mxu0 }
 0x256   : > { %v6124_v59 = vsel %vm571_vm2, %v774_v61, -2.3819763e+38 }
 0x257   : > { %v4119_v1 = vpop.f32.mrf.mxu0 }
 0x259   : > { %863 = vmax.xlane.f32.xlu1 %v6045_v0  ;;  %v777_v16 = vpop.f32.mrf.mxu0 }
 0x25a   : > { %v6057_v20 = vsel %vm572_vm12, %v777_v16, -2.3819763e+38 }
 0x25b   : > { %v4122_v23 = vpop.f32.mrf.mxu0 }
 0x25c   : > { %v6069_v28 = vsel %vm577_vm13, %v4122_v23, -2.3819763e+38 }
 0x25d   : > { %871 = vmax.xlane.f32.xlu1 %v6057_v20  ;;  %v790_v30 = vpop.f32.mrf.mxu0 }
 0x25e   : > { %v6083_v39 = vsel %vm575_vm14, %v790_v30, -2.3819763e+38  ;;  %v6214_v30 = vld [vmem:[#allocation2 + $0x50] sm:$0xff] }
 0x25f   : > { %v4123_v43 = vpop.f32.mrf.mxu0 }
 0x261   : > { %1334 = vrot.lane.b32.xlu0 %v5815_v13, %s5240_s14  ;;  %881 = vmax.xlane.f32.xlu1 %v6069_v28  ;;  %v6094_v13 = vsel %vm8046_vm15, %v4123_v43, -2.3819763e+38  ;;  %v793_v47 = vpop.f32.mrf.mxu0  ;;  %vm573_vm15 = vcmp.le.s32.totalorder %v5906_v3, %v6107_v54 }
 0x262   : > { %v6102_v49 = vsel %vm576_vm0, %v793_v47, -2.3819763e+38  ;;  %v6116_v60 = vsel %vm573_vm15, %v4118_v56, -2.3819763e+38 }
 0x265   : > { %877 = vmax.xlane.f32.xlu1 %v6083_v39 }
 0x269   : > { %883 = vmax.xlane.f32.xlu1 %v6094_v13 }
 0x26d   : > { %879 = vmax.xlane.f32.xlu1 %v6102_v49 }
 0x27e   : > { %1332 = vrot.lane.b32.xlu1 %v5822_v15, %s5240_s14  ;;  %v6132_v15 = vsel %vm574_vm3, %v4119_v1, -2.3819763e+38 }
 0x280   : > { %873 = vmax.xlane.f32.xlu0 %v6116_v60 }
 0x282   : > { %1312 = vrot.lane.b32.xlu1 %v5853_v31, %s5240_s14  ;;  %v6171_v31 = vld [vmem:[#allocation2 + $0xb0] sm:$0xff] }
 0x284   : > { %869 = vmax.xlane.f32.xlu0 %v6124_v59 }
 0x286   : > { %1316 = vrot.lane.b32.xlu1 %v5865_v41, %s5240_s14 }
 0x288   : > { %875 = vmax.xlane.f32.xlu0 %v6132_v15 }
 0x28a   : > { %1320 = vrot.lane.b32.xlu1 %v5877_v51, %s5240_s14 }
 0x28e   : > { %1324 = vrot.lane.b32.xlu1 %v5887_v57, %s5240_s14 }
 0x292   : > { %1814 = vrot.lane.b32.xlu1 %v5899_v63, %s5240_s14 }
 0x296   : > { %1810 = vrot.lane.b32.xlu1 %v5927_v7, %s5240_s14 }
 0x29a   : > { %1806 = vrot.lane.b32.xlu1 %v5935_v9, %s5240_s14 }
 0x29e   : > { %1330 = vrot.lane.b32.xlu0 %v5829_v17, %s5240_s14  ;;  %v6165_v17 = vpop.permute.xlu1 %1338 }
 0x2a2   : > { %1328 = vrot.lane.b32.xlu0 %v5836_v19, %s5240_s14  ;;  %v6169_v19 = vld [vmem:[#allocation2 + $0xd8] sm:$0xff] }
 0x2a6   : > { %1326 = vrot.lane.b32.xlu0 %v5843_v21, %s5240_s14 }
 0x2aa   : > { %1310 = vrot.lane.b32.xlu0 %v5808_v11, %s5240_s14  ;;  %v6167_v11 = vpop.permute.xlu0 %1336 }
 0x2ae   : > { %1314 = vrot.lane.b32.xlu0 %v5855_v32, %s5240_s14 }
 0x2b2   : > { %1318 = vrot.lane.b32.xlu0 %v5867_v42, %s5240_s14 }
 0x2b6   : > { %1322 = vrot.lane.b32.xlu0 %v5879_v52, %s5240_s14  ;;  %v6182_v52 = vld [vmem:[#allocation2 + $0x18] sm:$0xff] }
 0x2ba   : > { %1816 = vrot.lane.b32.xlu0 %v5896_v62, %s5240_s14  ;;  %v6184_v62 = vld [vmem:[#allocation2] sm:$0xff] }
 0x2be   : > { %1812 = vrot.lane.b32.xlu0 %v5922_v6, %s5240_s14 }
 0x2c2   : > { %1808 = vrot.lane.b32.xlu0 %v5932_v8, %s5240_s14  ;;  %v6194_v8 = vld [vmem:[#allocation2 + $0x30] sm:$0xff] }
 0x2ce   : > { %v858_v21 = vpop.xlane.xlu1 %857 }
 0x2cf   : > { %v6174_v32 = vmax.f32 %v6169_v19, %v858_v21  ;;  %v6274_v21 = vld [vmem:[#allocation2 + $0x60] sm:$0xff] }
 0x2d0   : > { %v854_v41 = vpop.xlane.xlu0 %853 }
 0x2d1   : > { %1296 = vst [vmem:[#allocation2 + $0xd8] sm:$0xff] %v6174_v32  ;;  %v6180_v51 = vmax.f32 %v6171_v31, %v854_v41  ;;  %v951_v56 = vsub.f32 %v5972_v29, %v6174_v32 }
 0x2d2   : > { %v860_v57 = vpop.xlane.xlu1 %859 }
 0x2d3   : > { %v949_v2 = vsub.f32 %v5983_v34, %v6180_v51  ;;  %1294 = vst [vmem:[#allocation2 + $0xb0] sm:$0xff] %v6180_v51  ;;  %v6192_v6 = vmax.f32 %v6182_v52, %v860_v57  ;;  %v969_v43 = vmul.f32 1.442695, %v951_v56 }
 0x2d4   : > { %v856_v7 = vpop.xlane.xlu0 %855 }
 0x2d5   : > { %v6197_v9 = vmax.f32 %v6184_v62, %v856_v7  ;;  %v952_v34 = vsub.f32 %v5995_v38, %v6192_v6  ;;  %1297 = vst [vmem:[#allocation2 + $0x18] sm:$0xff] %v6192_v6  ;;  %v965_v12 = vmul.f32 1.442695, %v949_v2  ;;  %v6232_v7 = vld [vmem:[#allocation2 + $0x68] sm:$0xff]  ;;  %v6286_v38 = vld [vmem:[#allocation2 + $0x78] sm:$0xff] }
 0x2d6   : > { %v866_v1 = vpop.xlane.xlu1 %865 }
 0x2d7   : > { %v950_v23 = vsub.f32 %v6003_v40, %v6197_v9  ;;  %1295 = vst [vmem:[#allocation2] sm:$0xff] %v6197_v9  ;;  %v6212_v29 = vmax.f32 %v6194_v8, %v866_v1  ;;  %v971_v26 = vmul.f32 1.442695, %v952_v34  ;;  %4583 = vpow2.f32 %v965_v12  ;;  %v6222_v40 = vld [vmem:[#allocation2 + $0x48] sm:$0xff] }
 0x2d9   : > { %v967_v37 = vmul.f32 1.442695, %v950_v23  ;;  %1300 = vst [vmem:[#allocation2 + $0x30] sm:$0xff] %v6212_v29  ;;  %4585 = vpow2.f32 %v971_v26  ;;  %v955_v12 = vsub.f32 %v6015_v46, %v6212_v29 }
 0x2da   : > { %v862_v47 = vpop.xlane.xlu1 %861 }
 0x2db   : > { %v6220_v53 = vmax.f32 %v6214_v30, %v862_v47  ;;  %4587 = vpow2.f32 %v967_v37  ;;  %v6244_v37 = vld [vmem:[#allocation2 + $0x88] sm:$0xff] }
 0x2dc   : > { %4589 = vpow2.f32 %v969_v43  ;;  %v1385_v43 = vsel %vm659_vm1, %v6165_v17, 0 }
 0x2dd   : > { %1298 = vst [vmem:[#allocation2 + $0x50] sm:$0xff] %v6220_v53  ;;  %v953_v2 = vsub.f32 %v6021_v48, %v6220_v53 }
 0x2de   : > { %v868_v41 = vpop.xlane.xlu1 %867 }
 0x2df   : > { %v6228_v57 = vmax.f32 %v6222_v40, %v868_v41  ;;  %v973_v26 = vmul.f32 1.442695, %v953_v2  ;;  %v977_v41 = vmul.f32 1.442695, %v955_v12  ;;  %v6256_v2 = vld [vmem:[#allocation2 + $0x8] sm:$0xff] }
 0x2e1   : > { %v956_v34 = vsub.f32 %v6033_v55, %v6228_v57  ;;  %1301 = vst [vmem:[#allocation2 + $0x48] sm:$0xff] %v6228_v57  ;;  %4591 = vpow2.f32 %v973_v26 }
 0x2e2   : > { %v864_v1 = vpop.xlane.xlu1 %863 }
 0x2e3   : > { %v6242_v23 = vmax.f32 %v6232_v7, %v864_v1  ;;  %v979_v48 = vmul.f32 1.442695, %v956_v34 }
 0x2e4   : > { %v6254_v1 = vpop.eup %4583 }
 0x2e5   : > { %v954_v47 = vsub.f32 %v6045_v0, %v6242_v23  ;;  %1299 = vst [vmem:[#allocation2 + $0x68] sm:$0xff] %v6242_v23  ;;  %8126 = vst [vmem:[#allocation47_spill] sm:$0xff] %v6254_v1  ;;  %4593 = vpow2.f32 %v979_v48 }
 0x2e6   : > { %v872_v55 = vpop.xlane.xlu1 %871  ;;  %v6258_v34 = vpop.eup %4585 }
 0x2e7   : > { %v975_v56 = vmul.f32 1.442695, %v954_v47  ;;  %v6252_v46 = vmax.f32 %v6244_v37, %v872_v55  ;;  %8127 = vst [vmem:[#allocation48_spill] sm:$0xff] %v6258_v34 }
 0x2e8   : > { %v6263_v0 = vpop.eup %4587 }
 0x2e9   : > { %1303 = vst [vmem:[#allocation2 + $0x88] sm:$0xff] %v6252_v46  ;;  %8128 = vst [vmem:[#allocation49_spill] sm:$0xff] %v6263_v0  ;;  %4595 = vpow2.f32 %v975_v56  ;;  %v6265_v47 = vpop.eup %4589  ;;  %v1029_v26 = vpack.c.bf16 %v6263_v0, %v6254_v1  ;;  %v1388_v56 = vsel %vm659_vm1, %v5943_v14, 0  ;;  %v6294_v14 = vld [vmem:[#allocation2 + $0xf0] sm:$0xff] }
 0x2ea   : > { %v882_v12 = vpop.xlane.xlu1 %881  ;;  %8129 = vst [vmem:[#allocation50_spill] sm:$0xff] %v6265_v47  ;;  %4597 = vpow2.f32 %v977_v41  ;;  %v1030_v48 = vpack.c.bf16 %v6258_v34, %v6265_v47 }
 0x2eb   : > { %v6268_v55 = vmax.f32 %v6256_v2, %v882_v12  ;;  %4140 = vmatprep.mubr.bf16.mxu1 %v1029_v26 }
 0x2ec   : > { %4141 = vmatmul.mubr.bf16.vlgmr.msra.gmra.mxu1 %v1030_v48 }
 0x2ed   : > { %1308 = vst [vmem:[#allocation2 + $0x8] sm:$0xff] %v6268_v55  ;;  %4157 = vmatpush3.bf16.xpose.msra.mxu1 %v1388_v56 }
 0x2ee   : > { %v878_v41 = vpop.xlane.xlu1 %877  ;;  %4357 = vmatprep.subr.msk.bf16.mxu1 %vm659_vm1, %v6165_v17  ;;  %v6296_v48 = vpop.eup %4591 }
 0x2ef   : > { %v6282_v12 = vmax.f32 %v6274_v21, %v878_v41  ;;  %8130 = vst [vmem:[#allocation51_spill] sm:$0xff] %v6296_v48 }
 0x2f1   : > { %1306 = vst [vmem:[#allocation2 + $0x60] sm:$0xff] %v6282_v12  ;;  %v961_v1 = vsub.f32 %v6083_v39, %v6282_v12 }
 0x2f2   : > { %v884_v26 = vpop.xlane.xlu1 %883  ;;  %v6301_v41 = vpop.eup %4593 }
 0x2f3   : > { %v6292_v16 = vmax.f32 %v6286_v38, %v884_v26  ;;  %8131 = vst [vmem:[#allocation52_spill] sm:$0xff] %v6301_v41  ;;  %v989_v35 = vmul.f32 1.442695, %v961_v1 }
 0x2f5   : > { %1309 = vst [vmem:[#allocation2 + $0x78] sm:$0xff] %v6292_v16  ;;  %4159 = vmatpush3.bf16.xpose.msra.mxu1 %v1385_v43  ;;  %v1335_v43 = vpop.permute.xlu0 %1334 }
 0x2f6   : > { %v880_v61 = vpop.xlane.xlu1 %879  ;;  %v6305_v63 = vpop.eup %4595  ;;  %4358 = vmatprep.subr.msk.bf16.mxu1 %vm659_vm1, %v6167_v11 }
 0x2f7   : > { %8132 = vst [vmem:[#allocation53_spill] sm:$0xff] %v6305_v63  ;;  %v6308_v26 = vmax.f32 %v6294_v14, %v880_v61  ;;  %v6310_v42 = vpop.eup %4597  ;;  %v1031_v56 = vpack.c.bf16 %v6305_v63, %v6296_v48  ;;  %v1382_v61 = vsel %vm659_vm1, %v6167_v11, 0  ;;  %v1379_v48 = vsel %vm659_vm1, %v1335_v43, 0  ;;  %v6325_v63 = vld [vmem:[#allocation2 + $0xe8] sm:$0xff] }
 0x2f8   : > { %8133 = vst [vmem:[#allocation54_spill] sm:$0xff] %v6310_v42  ;;  %v1032_v17 = vpack.c.bf16 %v6301_v41, %v6310_v42  ;;  %v958_v11 = vsub.f32 %v6057_v20, %v6252_v46  ;;  %v6344_v41 = vld [vmem:[#allocation2 + $0xb8] sm:$0xff] }
 0x2f9   : > { %1307 = vst [vmem:[#allocation2 + $0xf0] sm:$0xff] %v6308_v26  ;;  %4144 = vmatprep.mubr.bf16.mxu1 %v1031_v56  ;;  %v6331_v56 = vld [vmem:[#allocation2 + $0x80] sm:$0xff] }
 0x2fa   : > { %4145 = vmatmul.mubr.bf16.gmra.mxu1 %v1032_v17  ;;  %v1333_v34 = vpop.permute.xlu1 %1332  ;;  %v983_v0 = vmul.f32 1.442695, %v958_v11 }
 0x2fc   : > { %4599 = vpow2.f32 %v983_v0  ;;  %v964_v0 = vsub.f32 %v6094_v13, %v6292_v16 }
 0x2fd   : > { %4161 = vmatpush3.bf16.xpose.msra.mxu1 %v1382_v61 }
 0x2fe   : > { %4359 = vmatprep.subr.msk.bf16.mxu1 %vm659_vm1, %v1335_v43  ;;  %v995_v1 = vmul.f32 1.442695, %v964_v0 }
 0x305   : > { %4163 = vmatpush3.bf16.xpose.msra.mxu1 %v1379_v48  ;;  %v1376_v48 = vsel %vm659_vm1, %v1333_v34, 0 }
 0x306   : > { %4360 = vmatprep.subr.msk.bf16.mxu1 %vm659_vm1, %v1333_v34 }
 0x309   : > { %v874_v47 = vpop.xlane.xlu0 %873  ;;  %v6372_v13 = vpop.eup %4599 }
 0x30a   : > { %v6329_v42 = vmax.f32 %v6325_v63, %v874_v47  ;;  %v962_v47 = vsub.f32 %v6102_v49, %v6308_v26 }
 0x30c   : > { %1304 = vst [vmem:[#allocation2 + $0xe8] sm:$0xff] %v6329_v42  ;;  %v959_v20 = vsub.f32 %v6116_v60, %v6329_v42  ;;  %v991_v11 = vmul.f32 1.442695, %v962_v47  ;;  %v963_v47 = vsub.f32 %v6069_v28, %v6268_v55 }
 0x30d   : > { %v870_v61 = vpop.xlane.xlu0 %869  ;;  %4165 = vmatpush3.bf16.xpose.msra.mxu1 %v1376_v48 }
 0x30e   : > { %v6340_v43 = vmax.f32 %v6331_v56, %v870_v61  ;;  %v985_v48 = vmul.f32 1.442695, %v959_v20  ;;  %v993_v20 = vmul.f32 1.442695, %v963_v47 }
 0x310   : > { %v957_v34 = vsub.f32 %v6124_v59, %v6340_v43  ;;  %1302 = vst [vmem:[#allocation2 + $0x80] sm:$0xff] %v6340_v43 }
 0x311   : > { %v876_v61 = vpop.xlane.xlu0 %875 }
 0x312   : > { %v981_v49 = vmul.f32 1.442695, %v957_v34  ;;  %v6356_v45 = vmax.f32 %v6344_v41, %v876_v61 }
 0x314   : > { %v912_v60 = vsub.f32 %v6344_v41, %v6356_v45  ;;  %v960_v17 = vsub.f32 %v6132_v15, %v6356_v45  ;;  %1305 = vst [vmem:[#allocation2 + $0xb8] sm:$0xff] %v6356_v45  ;;  %4601 = vpow2.f32 %v981_v49  ;;  %v8147_v45 = vsub.f32 %v6286_v38, %v6292_v16  ;;  %v1096_v16 = vld [vmem:[#allocation4 + $0x58] sm:$0xff] }
 0x315   : > { %v1331_v59 = vpop.permute.xlu0 %1330  ;;  %4603 = vpow2.f32 %v991_v11 }
 0x316   : > { %v987_v10 = vmul.f32 1.442695, %v960_v17  ;;  %v1373_v39 = vsel %vm659_vm1, %v1331_v59, 0  ;;  %4361 = vmatprep.subr.msk.bf16.mxu1 %vm659_vm1, %v1331_v59  ;;  %4605 = vpow2.f32 %v985_v48  ;;  %v947_v41 = vmul.f32 1.442695, %v8147_v45 }
 0x317   : > { %4167 = vmatpush3.bf16.xpose.msra.mxu1 %v1373_v39 }
 0x318   : > { %4607 = vpow2.f32 %v987_v10 }
 0x319   : > { %v1329_v15 = vpop.permute.xlu0 %1328  ;;  %4609 = vpow2.f32 %v989_v35 }
 0x31a   : > { %4362 = vmatprep.subr.msk.bf16.mxu1 %vm659_vm1, %v1329_v15  ;;  %v1370_v17 = vsel %vm659_vm1, %v1329_v15, 0  ;;  %4611 = vpow2.f32 %v995_v1 }
 0x31b   : > { %4613 = vpow2.f32 %v993_v20 }
 0x31d   : > { %v1327_v34 = vpop.permute.xlu0 %1326 }
 0x31e   : > { %v1367_v35 = vsel %vm659_vm1, %v1327_v34, 0 }
 0x31f   : > { %4169 = vmatpush3.bf16.xpose.msra.mxu1 %v1370_v17  ;;  %v1313_v17 = vpop.permute.xlu1 %1312 }
 0x320   : > { %4363 = vmatprep.subr.msk.bf16.mxu1 %vm659_vm1, %v1327_v34 }
 0x321   : > { %v6374_v61 = vpop.eup %4601  ;;  %v1311_v1 = vpop.permute.xlu0 %1310 }
 0x322   : > { %v1033_v10 = vpack.c.bf16 %v6372_v13, %v6374_v61  ;;  %v6378_v28 = vpop.eup %4603 }
 0x323   : > { %v6381_v49 = vpop.eup %4605  ;;  %v1317_v34 = vpop.permute.xlu1 %1316 }
 0x324   : > { %4148 = vmatprep.mubr.bf16.mxu1 %v1033_v10 }
 0x325   : > { %v6383_v11 = vpop.eup %4607  ;;  %v1315_v20 = vpop.permute.xlu0 %1314 }
 0x326   : > { %v6385_v48 = vpop.eup %4609  ;;  %v1034_v59 = vpack.c.bf16 %v6383_v11, %v6381_v49 }
 0x327   : > { %4171 = vmatpush3.bf16.xpose.msra.mxu1 %v1367_v35  ;;  %v1035_v39 = vpack.c.bf16 %v6378_v28, %v6385_v48  ;;  %v6391_v0 = vpop.eup %4611  ;;  %v1321_v35 = vpop.permute.xlu1 %1320 }
 0x328   : > { %4149 = vmatmul.mubr.bf16.gmra.mxu1 %v1034_v59  ;;  %v6393_v47 = vpop.eup %4613 }
 0x329   : > { %4152 = vmatprep.mubr.bf16.mxu1 %v1035_v39  ;;  %v1036_v15 = vpack.c.bf16 %v6391_v0, %v6393_v47  ;;  %v1319_v10 = vpop.permute.xlu0 %1318 }
 0x32b   : > { %v1325_v39 = vpop.permute.xlu1 %1324 }
 0x32d   : > { %v1323_v59 = vpop.permute.xlu0 %1322 }
 0x330   : > { %4153 = vmatmul.mubr.bf16.gmra.mxu1 %v1036_v15  ;;  %v8134_v15 = vsub.f32 %v6169_v19, %v6174_v32  ;;  %v8138_v19 = vsub.f32 %v6194_v8, %v6212_v29  ;;  %v1085_v29 = vld [vmem:[#allocation4] sm:$0xff] }
 0x331   : > { %4172 = vmatprep.mubr.msk.bf16.mxu1 %vm659_vm1, %v1311_v1 }
 0x332   : > { %v921_v1 = vmul.f32 1.442695, %v8134_v15  ;;  %v929_v32 = vmul.f32 1.442695, %v8138_v19  ;;  %v1087_v15 = vld [vmem:[#allocation4 + $0x10] sm:$0xff] }
 0x334   : > { %4615 = vpow2.f32 %v921_v1 }
 0x338   : > { %4173 = vmatmul.mubr.msk.bf16.vlgmr.msra.gmra.mxu1 %vm659_vm1, %v1313_v17  ;;  %v8135_v17 = vsub.f32 %v6171_v31, %v6180_v51  ;;  %v8139_v31 = vsub.f32 %v6214_v30, %v6220_v53 }
 0x339   : > { %4176 = vmatprep.mubr.msk.bf16.mxu1 %vm659_vm1, %v1315_v20 }
 0x33a   : > { %v917_v20 = vmul.f32 1.442695, %v8135_v17  ;;  %v925_v51 = vmul.f32 1.442695, %v8139_v31  ;;  %v1088_v17 = vld [vmem:[#allocation4 + $0x18] sm:$0xff] }
 0x33c   : > { %4617 = vpow2.f32 %v917_v20 }
 0x340   : > { %4177 = vmatmul.mubr.msk.bf16.gmra.mxu1 %vm659_vm1, %v1317_v34  ;;  %v8136_v34 = vsub.f32 %v6182_v52, %v6192_v6  ;;  %v8140_v52 = vsub.f32 %v6222_v40, %v6228_v57 }
 0x341   : > { %4180 = vmatprep.mubr.msk.bf16.mxu1 %vm659_vm1, %v1319_v10 }
 0x342   : > { %v923_v10 = vmul.f32 1.442695, %v8136_v34  ;;  %v931_v6 = vmul.f32 1.442695, %v8140_v52 }
 0x344   : > { %4619 = vpow2.f32 %v923_v10  ;;  %v1086_v10 = vld [vmem:[#allocation4 + $0x8] sm:$0xff] }
 0x348   : > { %4181 = vmatmul.mubr.msk.bf16.gmra.mxu1 %vm659_vm1, %v1321_v35  ;;  %v8137_v35 = vsub.f32 %v6184_v62, %v6197_v9  ;;  %v8141_v9 = vsub.f32 %v6232_v7, %v6242_v23 }
 0x349   : > { %4184 = vmatprep.mubr.msk.bf16.mxu1 %vm659_vm1, %v1323_v59 }
 0x34a   : > { %v919_v59 = vmul.f32 1.442695, %v8137_v35  ;;  %v927_v8 = vmul.f32 1.442695, %v8141_v9  ;;  %v1817_v35 = vpop.permute.xlu0 %1816  ;;  %v1091_v9 = vld [vmem:[#allocation4 + $0x30] sm:$0xff] }
 0x34b   : > { %4188 = vmatprep.subr.bf16.mxu0 %v1817_v35 }
 0x34c   : > { %4621 = vpow2.f32 %v919_v59  ;;  %v1815_v59 = vpop.permute.xlu1 %1814  ;;  %4189 = vmatpush3.bf16.msra.mxu0 %v1817_v35  ;;  %v1090_v35 = vld [vmem:[#allocation4 + $0x28] sm:$0xff] }
 0x34d   : > { %4623 = vpow2.f32 %v929_v32  ;;  %4190 = vmatprep.subr.bf16.mxu0 %v1815_v59 }
 0x34e   : > { %4625 = vpow2.f32 %v925_v51 }
 0x34f   : > { %4627 = vpow2.f32 %v931_v6  ;;  %v1813_v6 = vpop.permute.xlu0 %1812 }
 0x350   : > { %4185 = vmatmul.mubr.msk.bf16.gmra.mxu1 %vm659_vm1, %v1325_v39  ;;  %v6423_v39 = vpop.eup %4615  ;;  %4629 = vpow2.f32 %v927_v8  ;;  %4191 = vmatpush3.bf16.msra.mxu0 %v1815_v59 }
 0x351   : > { %v6428_v62 = vpop.eup %4617  ;;  %v1103_v1 = vmul.f32 %v6423_v39, %v1087_v15  ;;  %4192 = vmatprep.subr.bf16.mxu0 %v1813_v6 }
 0x352   : > { %v6434_v30 = vpop.eup %4619  ;;  %v1101_v40 = vmul.f32 %v6428_v62, %v1085_v29  ;;  %v1089_v29 = vld [vmem:[#allocation4 + $0x20] sm:$0xff] }
 0x353   : > { %v1104_v23 = vmul.f32 %v6434_v30, %v1088_v17  ;;  %v1809_v59 = vpop.permute.xlu0 %1808 }
 0x354   : > { %4193 = vmatpush3.bf16.msra.mxu0 %v1813_v6 }
 0x359   : > { %v6437_v57 = vpop.eup %4621 }
 0x35a   : > { %v1102_v31 = vmul.f32 %v6437_v57, %v1086_v10  ;;  %v6444_v15 = vpop.eup %4623 }
 0x35b   : > { %v6447_v8 = vpop.eup %4625 }
 0x35c   : > { %v6450_v17 = vpop.eup %4627  ;;  %v1105_v10 = vmul.f32 %v6447_v8, %v1089_v29  ;;  %v8142_v29 = vsub.f32 %v6325_v63, %v6329_v42  ;;  %v8145_v42 = vsub.f32 %v6256_v2, %v6268_v55  ;;  %v1095_v2 = vld [vmem:[#allocation4 + $0x50] sm:$0xff] }
 0x35e   : > { %v945_v63 = vmul.f32 1.442695, %v8145_v42 }
 0x3ac   : > { %v4142_v53 = vpop.f32.mrf.mxu1 }
 0x3ad   : > { %v1264_v20 = vadd.f32 %v4142_v53, %v1103_v1  ;;  %v1811_v1 = vpop.permute.xlu1 %1810  ;;  %v1107_v53 = vmul.f32 %v6444_v15, %v1091_v9 }
 0x3ae   : > { %v1199_v34 = vpop.f32.mrf.mxu1  ;;  %4194 = vmatprep.subr.bf16.mxu0 %v1811_v1 }
 0x3af   : > { %1280 = vst.msk [vmem:[#allocation4 + $0x10] sm:$0xff] %vm659_vm1, %v1264_v20  ;;  %v1262_v7 = vadd.f32 %v1199_v34, %v1101_v40  ;;  %v1092_v40 = vld [vmem:[#allocation4 + $0x38] sm:$0xff]  ;;  %4195 = vmatpush3.bf16.msra.mxu0 %v1811_v1  ;;  %v8143_v1 = vsub.f32 %v6331_v56, %v6340_v43  ;;  %v8146_v56 = vsub.f32 %v6274_v21, %v6282_v12 }
 0x3b0   : > { %v4143_v19 = vpop.f32.mrf.mxu1  ;;  %4196 = vmatprep.subr.bf16.mxu0 %v1809_v59 }
 0x3b1   : > { %1278 = vst.msk [vmem:[#allocation4] sm:$0xff] %vm659_vm1, %v1262_v7  ;;  %v1265_v32 = vadd.f32 %v4143_v19, %v1104_v23  ;;  %v6453_v7 = vpop.eup %4629  ;;  %v941_v43 = vmul.f32 1.442695, %v8146_v56 }
 0x3b2   : > { %v1202_v51 = vpop.f32.mrf.mxu1 }
 0x3b3   : > { %1281 = vst.msk [vmem:[#allocation4 + $0x18] sm:$0xff] %vm659_vm1, %v1265_v32  ;;  %v1263_v52 = vadd.f32 %v1202_v51, %v1102_v31  ;;  %v1108_v32 = vmul.f32 %v6450_v17, %v1092_v40  ;;  %4197 = vmatpush3.bf16.msra.mxu0 %v1809_v59  ;;  %v933_v40 = vmul.f32 1.442695, %v8143_v1 }
 0x3b5   : > { %1279 = vst.msk [vmem:[#allocation4 + $0x8] sm:$0xff] %vm659_vm1, %v1263_v52  ;;  %v1106_v52 = vmul.f32 %v6453_v7, %v1090_v35  ;;  %v1093_v35 = vld [vmem:[#allocation4 + $0x40] sm:$0xff] }
 0x3ba   : > { %v4146_v20 = vpop.f32.mrf.mxu1 }
 0x3bb   : > { %v1268_v34 = vadd.f32 %v4146_v20, %v1107_v53  ;;  %v937_v53 = vmul.f32 1.442695, %v8142_v29  ;;  %v1807_v20 = vpop.permute.xlu1 %1806 }
 0x3bc   : > { %v1215_v23 = vpop.f32.mrf.mxu1  ;;  %4198 = vmatprep.subr.bf16.mxu0 %v1807_v20 }
 0x3bd   : > { %1284 = vst.msk [vmem:[#allocation4 + $0x30] sm:$0xff] %vm659_vm1, %v1268_v34  ;;  %v1266_v19 = vadd.f32 %v1215_v23, %v1105_v10  ;;  %4199 = vmatpush3.bf16.msra.mxu0 %v1807_v20  ;;  %4631 = vpow2.f32 %v937_v53  ;;  %v939_v34 = vmul.f32 1.442695, %v912_v60  ;;  %v8144_v10 = vsub.f32 %v6244_v37, %v6252_v46 }
 0x3be   : > { %v4147_v31 = vpop.f32.mrf.mxu1  ;;  %4633 = vpow2.f32 %v933_v40  ;;  %v8148_v37 = vsub.f32 %v6294_v14, %v6308_v26  ;;  %v1094_v26 = vld [vmem:[#allocation4 + $0x48] sm:$0xff]  ;;  %v1097_v40 = vld [vmem:[#allocation4 + $0x60] sm:$0xff] }
 0x3bf   : > { %1282 = vst.msk [vmem:[#allocation4 + $0x20] sm:$0xff] %vm659_vm1, %v1266_v19  ;;  %v1269_v51 = vadd.f32 %v4147_v31, %v1108_v32  ;;  %v935_v23 = vmul.f32 1.442695, %v8144_v10  ;;  %4635 = vpow2.f32 %v939_v34 }
 0x3c0   : > { %v1218_v6 = vpop.f32.mrf.mxu1  ;;  %v943_v46 = vmul.f32 1.442695, %v8148_v37  ;;  %v1098_v37 = vld [vmem:[#allocation4 + $0x68] sm:$0xff] }
 0x3c1   : > { %1285 = vst.msk [vmem:[#allocation4 + $0x38] sm:$0xff] %vm659_vm1, %v1269_v51  ;;  %v1267_v9 = vadd.f32 %v1218_v6, %v1106_v52  ;;  %4637 = vpow2.f32 %v935_v23 }
 0x3c2   : > { %4639 = vpow2.f32 %v945_v63  ;;  %v1100_v63 = vld [vmem:[#allocation4 + $0x78] sm:$0xff] }
 0x3c3   : > { %1283 = vst.msk [vmem:[#allocation4 + $0x28] sm:$0xff] %vm659_vm1, %v1267_v9  ;;  %4641 = vpow2.f32 %v941_v43  ;;  %v1099_v9 = vld [vmem:[#allocation4 + $0x70] sm:$0xff] }
 0x3c4   : > { %4643 = vpow2.f32 %v947_v41 }
 0x3c5   : > { %4645 = vpow2.f32 %v943_v46 }
 0x3ca   : > { %v6485_v60 = vpop.eup %4631 }
 0x3cb   : > { %v6487_v55 = vpop.eup %4633  ;;  %v1111_v21 = vmul.f32 %v6485_v60, %v1095_v2 }
 0x3cc   : > { %v6490_v12 = vpop.eup %4635  ;;  %v1109_v19 = vmul.f32 %v6487_v55, %v1093_v35 }
 0x3cd   : > { %v1112_v51 = vmul.f32 %v6490_v12, %v1096_v16 }
 0x3ce   : > { %v6493_v32 = vpop.eup %4637 }
 0x3cf   : > { %v6497_v52 = vpop.eup %4639  ;;  %v1110_v53 = vmul.f32 %v6493_v32, %v1094_v26 }
 0x3d0   : > { %v6501_v20 = vpop.eup %4641  ;;  %v1115_v10 = vmul.f32 %v6497_v52, %v1099_v9 }
 0x3d1   : > { %v6505_v23 = vpop.eup %4643  ;;  %v1113_v43 = vmul.f32 %v6501_v20, %v1097_v40 }
 0x3d2   : > { %v6509_v45 = vpop.eup %4645  ;;  %v1116_v2 = vmul.f32 %v6505_v23, %v1100_v63 }
 0x3e8   : > { %v4150_v59 = vpop.f32.mrf.mxu1 }
 0x3e9   : > { %v1272_v38 = vadd.f32 %v4150_v59, %v1111_v21  ;;  %v1114_v59 = vmul.f32 %v6509_v45, %v1098_v37 }
 0x3ea   : > { %v1231_v14 = vpop.f32.mrf.mxu1 }
 0x3eb   : > { %1288 = vst.msk [vmem:[#allocation4 + $0x50] sm:$0xff] %vm659_vm1, %v1272_v38  ;;  %v1270_v31 = vadd.f32 %v1231_v14, %v1109_v19 }
 0x3ec   : > { %v4151_v6 = vpop.f32.mrf.mxu1 }
 0x3ed   : > { %1286 = vst.msk [vmem:[#allocation4 + $0x40] sm:$0xff] %vm659_vm1, %v1270_v31  ;;  %v1273_v29 = vadd.f32 %v4151_v6, %v1112_v51 }
 0x3ee   : > { %v1234_v1 = vpop.f32.mrf.mxu1 }
 0x3ef   : > { %1289 = vst.msk [vmem:[#allocation4 + $0x58] sm:$0xff] %vm659_vm1, %v1273_v29  ;;  %v1271_v34 = vadd.f32 %v1234_v1, %v1110_v53 }
 0x3f0   : > { %v4154_v42 = vpop.f32.mrf.mxu1 }
 0x3f1   : > { %1287 = vst.msk [vmem:[#allocation4 + $0x48] sm:$0xff] %vm659_vm1, %v1271_v34  ;;  %v1276_v56 = vadd.f32 %v4154_v42, %v1115_v10 }
 0x3f2   : > { %v1247_v41 = vpop.f32.mrf.mxu1 }
 0x3f3   : > { %1292 = vst.msk [vmem:[#allocation4 + $0x70] sm:$0xff] %vm659_vm1, %v1276_v56  ;;  %v1274_v46 = vadd.f32 %v1247_v41, %v1113_v43 }
 0x3f4   : > { %v4155_v35 = vpop.f32.mrf.mxu1 }
 0x3f5   : > { %1290 = vst.msk [vmem:[#allocation4 + $0x60] sm:$0xff] %vm659_vm1, %v1274_v46  ;;  %v1277_v21 = vadd.f32 %v4155_v35, %v1116_v2  ;;  %v8150_v46 = vld [vmem:[#allocation45_spill] sm:$0xff] }
 0x3f6   : > { %v1250_v16 = vpop.f32.mrf.mxu1 }
 0x3f7   : > { %1293 = vst.msk [vmem:[#allocation4 + $0x78] sm:$0xff] %vm659_vm1, %v1277_v21  ;;  %v1275_v38 = vadd.f32 %v1250_v16, %v1114_v59  ;;  %v4711_v21 = vld [vmem:[%s5678_s16] sm:$0xff]   ;;  %v4712_v59 = vld [vmem:[%s5678_s16 + $0x8] sm:$0xff]   ;;  %v8153_v16 = vld [vmem:[#allocation47_spill] sm:$0xff] }
 0x3f8   : > { %v4174_v19 = vpop.f32.mrf.mxu1 }
 0x3f9   : > { %1291 = vst.msk [vmem:[#allocation4 + $0x68] sm:$0xff] %vm659_vm1, %v1275_v38  ;;  %v6520_v14 = vsel %vm565_vm4, %v4174_v19, -2.3819763e+38  ;;  %v8154_v38 = vld [vmem:[#allocation49_spill] sm:$0xff]  ;;  %v8155_v19 = vld [vmem:[#allocation48_spill] sm:$0xff] }
 0x3fa   : > { %1541 = vmax.xlane.f32.xlu0 %v6520_v14  ;;  %v1424_v26 = vpop.f32.mrf.mxu1 }
 0x3fb   : > { %v6526_v51 = vsel %vm563_vm5, %v1424_v26, -2.3819763e+38  ;;  %v8156_v26 = vld [vmem:[#allocation50_spill] sm:$0xff] }
 0x3fc   : > { %v4175_v31 = vpop.f32.mrf.mxu1 }
 0x3fd   : > { %v6538_v29 = vsel %vm566_vm6, %v4175_v31, -2.3819763e+38  ;;  %v8157_v31 = vld [vmem:[#allocation53_spill] sm:$0xff] }
 0x3fe   : > { %1537 = vmax.xlane.f32.xlu0 %v6526_v51  ;;  %v1427_v6 = vpop.f32.mrf.mxu1 }
 0x3ff   : > { %v6532_v9 = vsel %vm564_vm7, %v1427_v6, -2.3819763e+38  ;;  %v8159_v6 = vld [vmem:[#allocation52_spill] sm:$0xff] }
 0x400   : > { %1539 = vmax.xlane.f32.xlu1 %v6532_v9  ;;  %v4178_v18 = vpop.f32.mrf.mxu1 }
 0x401   : > { %v6550_v1 = vsel %vm569_vm8, %v4178_v18, -2.3819763e+38  ;;  %v8160_v18 = vld [vmem:[#allocation54_spill] sm:$0xff] }
 0x402   : > { %1543 = vmax.xlane.f32.xlu0 %v6538_v29  ;;  %v1440_v22 = vpop.f32.mrf.mxu1 }
 0x403   : > { %v6544_v53 = vsel %vm567_vm9, %v1440_v22, -2.3819763e+38  ;;  %v6633_v22 = vld [vmem:[#allocation2 + $0x40] sm:$0xff] }
 0x404   : > { %1545 = vmax.xlane.f32.xlu1 %v6544_v53  ;;  %v4179_v27 = vpop.f32.mrf.mxu1 }
 0x405   : > { %v6556_v40 = vsel %vm570_vm10, %v4179_v27, -2.3819763e+38 }
 0x406   : > { %1549 = vmax.xlane.f32.xlu0 %v6550_v1  ;;  %v1443_v24 = vpop.f32.mrf.mxu1 }
 0x407   : > { %v6562_v34 = vsel %vm568_vm11, %v1443_v24, -2.3819763e+38 }
 0x408   : > { %1551 = vmax.xlane.f32.xlu1 %v6556_v40  ;;  %v4182_v36 = vpop.f32.mrf.mxu1 }
 0x409   : > { %v6574_v42 = vsel %vm573_vm15, %v4182_v36, -2.3819763e+38 }
 0x40a   : > { %1547 = vmax.xlane.f32.xlu0 %v6562_v34  ;;  %v1456_v33 = vpop.f32.mrf.mxu1 }
 0x40b   : > { %v6568_v10 = vsel %vm571_vm2, %v1456_v33, -2.3819763e+38  ;;  %vm8151_vm2 = vcmp.le.s32.totalorder %v5906_v3, %v8150_v46  ;;  %v8158_v3 = vld [vmem:[#allocation51_spill] sm:$0xff]  ;;  %v6670_v46 = vld [vmem:[#allocation2 + $0x70] sm:$0xff] }
 0x40c   : > { %1553 = vmax.xlane.f32.xlu1 %v6568_v10  ;;  %v4183_v44 = vpop.f32.mrf.mxu1 }
 0x40d   : > { %v6580_v63 = vsel %vm574_vm3, %v4183_v44, -2.3819763e+38  ;;  %v6658_v44 = vld [vmem:[#allocation2 + $0xc8] sm:$0xff] }
 0x40e   : > { %1557 = vmax.xlane.f32.xlu0 %v6574_v42  ;;  %v1459_v50 = vpop.f32.mrf.mxu1 }
 0x40f   : > { %v6586_v56 = vsel %vm572_vm12, %v1459_v50, -2.3819763e+38 }
 0x410   : > { %1559 = vmax.xlane.f32.xlu1 %v6580_v63  ;;  %v4186_v4 = vpop.f32.mrf.mxu1 }
 0x411   : > { %v6598_v37 = vsel %vm577_vm13, %v4186_v4, -2.3819763e+38  ;;  %v6660_v4 = vld [vmem:[#allocation2 + $0xe0] sm:$0xff] }
 0x412   : > { %1555 = vmax.xlane.f32.xlu0 %v6586_v56  ;;  %v1472_v54 = vpop.f32.mrf.mxu1 }
 0x413   : > { %v6592_v43 = vsel %vm575_vm14, %v1472_v54, -2.3819763e+38 }
 0x414   : > { %1561 = vmax.xlane.f32.xlu1 %v6592_v43  ;;  %v4187_v5 = vpop.f32.mrf.mxu1 }
 0x415   : > { %v6604_v2 = vsel %vm8151_vm2, %v4187_v5, -2.3819763e+38 }
 0x416   : > { %1565 = vmax.xlane.f32.xlu0 %v6598_v37  ;;  %v1475_v58 = vpop.f32.mrf.mxu1 }
 0x417   : > { %v6610_v35 = vsel %vm576_vm0, %v1475_v58, -2.3819763e+38 }
 0x418   : > { %1567 = vmax.xlane.f32.xlu1 %v6604_v2 }
 0x41a   : > { %1563 = vmax.xlane.f32.xlu0 %v6610_v35 }
 0x429   : > { %1802 = vrot.lane.b32.xlu1 %v4711_v21, %s5240_s14 }
 0x430   : > { %1804 = vrot.lane.b32.xlu0 %v4712_v59, %s5240_s14  ;;  %v6763_v59 = vld [vmem:[#allocation2 + $0x98] sm:$0xff] }
 0x431   : > { %8162 = vst [vmem:[#allocation45_spill] sm:$0xff] %v6763_v59 }
 0x44d   : > { %997 = vadd.xlane.f32.xlu1 %v8153_v16 }
 0x44f   : > { %999 = vadd.xlane.f32.xlu0 %v8154_v38 }
 0x451   : > { %1003 = vadd.xlane.f32.xlu1 %v8155_v19 }
 0x453   : > { %1001 = vadd.xlane.f32.xlu0 %v8156_v26  ;;  %v6686_v26 = vld [vmem:[#allocation2 + $0xc0] sm:$0xff] }
 0x455   : > { %1007 = vadd.xlane.f32.xlu1 %v8157_v31 }
 0x457   : > { %1005 = vadd.xlane.f32.xlu0 %v8158_v3 }
 0x459   : > { %1011 = vadd.xlane.f32.xlu1 %v8159_v6  ;;  %v6688_v6 = vld [vmem:[#allocation2 + $0x90] sm:$0xff] }
 0x45b   : > { %1009 = vadd.xlane.f32.xlu0 %v8160_v18 }
 0x45d   : > { %1015 = vadd.xlane.f32.xlu1 %v6372_v13  ;;  %v6638_v13 = vld [vmem:[#allocation2 + $0x38] sm:$0xff] }
 0x45f   : > { %1013 = vadd.xlane.f32.xlu0 %v6374_v61 }
 0x461   : > { %1019 = vadd.xlane.f32.xlu1 %v6383_v11  ;;  %v6645_v11 = vld [vmem:[#allocation2 + $0x58] sm:$0xff] }
 0x463   : > { %1017 = vadd.xlane.f32.xlu0 %v6381_v49 }
 0x465   : > { %1023 = vadd.xlane.f32.xlu1 %v6378_v28 }
 0x467   : > { %1021 = vadd.xlane.f32.xlu0 %v6385_v48 }
 0x469   : > { %1027 = vadd.xlane.f32.xlu1 %v6391_v0 }
 0x46b   : > { %1025 = vadd.xlane.f32.xlu0 %v6393_v47 }
 0x483   : > { %v1542_v27 = vpop.xlane.xlu0 %1541 }
 0x484   : > { %v6636_v24 = vmax.f32 %v6633_v22, %v1542_v27 }
 0x486   : > { %v1635_v28 = vsub.f32 %v6520_v14, %v6636_v24  ;;  %1957 = vst [vmem:[#allocation2 + $0x40] sm:$0xff] %v6636_v24 }
 0x487   : > { %v1538_v49 = vpop.xlane.xlu0 %1537 }
 0x488   : > { %v1653_v48 = vmul.f32 1.442695, %v1635_v28  ;;  %v6648_v0 = vmax.f32 %v6638_v13, %v1538_v49 }
 0x489   : > { %v1540_v47 = vpop.xlane.xlu1 %1539 }
 0x48a   : > { %v1633_v33 = vsub.f32 %v6526_v51, %v6648_v0  ;;  %1955 = vst [vmem:[#allocation2 + $0x38] sm:$0xff] %v6648_v0  ;;  %v6656_v14 = vmax.f32 %v6645_v11, %v1540_v47  ;;  %4647 = vpow2.f32 %v1653_v48  ;;  %v6700_v48 = vld [vmem:[#allocation2 + $0xa8] sm:$0xff] }
 0x48b   : > { %v1544_v50 = vpop.xlane.xlu0 %1543 }
 0x48c   : > { %v1649_v54 = vmul.f32 1.442695, %v1633_v33  ;;  %v1634_v41 = vsub.f32 %v6532_v9, %v6656_v14  ;;  %1956 = vst [vmem:[#allocation2 + $0x58] sm:$0xff] %v6656_v14  ;;  %v6668_v51 = vmax.f32 %v6658_v44, %v1544_v50 }
 0x48d   : > { %v1546_v58 = vpop.xlane.xlu1 %1545 }
 0x48e   : > { %v1651_v25 = vmul.f32 1.442695, %v1634_v41  ;;  %v6673_v21 = vmax.f32 %v6660_v4, %v1546_v58  ;;  %4649 = vpow2.f32 %v1649_v54  ;;  %v1636_v16 = vsub.f32 %v6538_v29, %v6668_v51  ;;  %1958 = vst [vmem:[#allocation2 + $0xc8] sm:$0xff] %v6668_v51  ;;  %v6716_v58 = vld [vmem:[#allocation2 + $0x10] sm:$0xff] }
 0x48f   : > { %v1550_v9 = vpop.xlane.xlu0 %1549 }
 0x490   : > { %1959 = vst [vmem:[#allocation2 + $0xe0] sm:$0xff] %v6673_v21  ;;  %v6684_v19 = vmax.f32 %v6670_v46, %v1550_v9  ;;  %4651 = vpow2.f32 %v1651_v25  ;;  %v1655_v31 = vmul.f32 1.442695, %v1636_v16  ;;  %v1637_v27 = vsub.f32 %v6544_v53, %v6673_v21 }
 0x491   : > { %v1552_v3 = vpop.xlane.xlu1 %1551 }
 0x492   : > { %v1639_v18 = vsub.f32 %v6550_v1, %v6684_v19  ;;  %1961 = vst [vmem:[#allocation2 + $0x70] sm:$0xff] %v6684_v19  ;;  %v6698_v28 = vmax.f32 %v6686_v26, %v1552_v3  ;;  %4653 = vpow2.f32 %v1655_v31  ;;  %v1657_v25 = vmul.f32 1.442695, %v1637_v27  ;;  %v6720_v31 = vld [vmem:[#allocation2 + $0x28] sm:$0xff] }
 0x493   : > { %v1548_v49 = vpop.xlane.xlu0 %1547 }
 0x494   : > { %v1661_v47 = vmul.f32 1.442695, %v1639_v18  ;;  %v6703_v33 = vmax.f32 %v6688_v6, %v1548_v49  ;;  %v1640_v1 = vsub.f32 %v6556_v40, %v6698_v28  ;;  %1962 = vst [vmem:[#allocation2 + $0xc0] sm:$0xff] %v6698_v28 }
 0x495   : > { %v1554_v53 = vpop.xlane.xlu1 %1553 }
 0x496   : > { %1960 = vst [vmem:[#allocation2 + $0x90] sm:$0xff] %v6703_v33  ;;  %v6714_v41 = vmax.f32 %v6700_v48, %v1554_v53  ;;  %v1638_v16 = vsub.f32 %v6562_v34, %v6703_v33  ;;  %4655 = vpow2.f32 %v1661_v47  ;;  %v1663_v3 = vmul.f32 1.442695, %v1640_v1  ;;  %v6731_v53 = vld [vmem:[#allocation2 + $0xd0] sm:$0xff]  ;;  %v6753_v1 = vld [vmem:[#allocation2 + $0x20] sm:$0xff] }
 0x497   : > { %v1558_v9 = vpop.xlane.xlu0 %1557  ;;  %v6722_v40 = vpop.eup %4647  ;;  %4657 = vpow2.f32 %v1657_v25  ;;  %8161 = vst [vmem:[#allocation44_spill] sm:$0xff] %v6753_v1 }
 0x498   : > { %1963 = vst [vmem:[#allocation2 + $0xa8] sm:$0xff] %v6714_v41  ;;  %v6728_v49 = vmax.f32 %v6716_v58, %v1558_v9  ;;  %1685 = vadd.xlane.f32.xlu0 %v6722_v40  ;;  %v1641_v34 = vsub.f32 %v6568_v10, %v6714_v41  ;;  %v1659_v47 = vmul.f32 1.442695, %v1638_v16  ;;  %4659 = vpow2.f32 %v1663_v3  ;;  %v6751_v16 = vld [vmem:[#allocation2 + $0xa0] sm:$0xff] }
 0x499   : > { %v1560_v27 = vpop.xlane.xlu1 %1559 }
 0x49a   : > { %v6736_v54 = vmax.f32 %v6720_v31, %v1560_v27  ;;  %v1643_v9 = vsub.f32 %v6574_v42, %v6728_v49  ;;  %1965 = vst [vmem:[#allocation2 + $0x10] sm:$0xff] %v6728_v49  ;;  %v1665_v3 = vmul.f32 1.442695, %v1641_v34  ;;  %4661 = vpow2.f32 %v1659_v47 }
 0x49b   : > { %v1556_v18 = vpop.xlane.xlu0 %1555  ;;  %v4650_v50 = vpop.eup %4649 }
 0x49c   : > { %v1644_v10 = vsub.f32 %v6580_v63, %v6736_v54  ;;  %1966 = vst [vmem:[#allocation2 + $0x28] sm:$0xff] %v6736_v54  ;;  %v6749_v25 = vmax.f32 %v6731_v53, %v1556_v18  ;;  %v1669_v27 = vmul.f32 1.442695, %v1643_v9  ;;  %1681 = vadd.xlane.f32.xlu0 %v4650_v50 }
 0x49d   : > { %v1562_v42 = vpop.xlane.xlu1 %1561  ;;  %v4652_v29 = vpop.eup %4651 }
 0x49e   : > { %1964 = vst [vmem:[#allocation2 + $0xd0] sm:$0xff] %v6749_v25  ;;  %v1642_v63 = vsub.f32 %v6586_v56, %v6749_v25  ;;  %v6761_v18 = vmax.f32 %v6751_v16, %v1562_v42  ;;  %v1713_v9 = vpack.c.bf16 %v4652_v29, %v4650_v50  ;;  %4663 = vpow2.f32 %v1669_v27 }
 0x49f   : > { %v1566_v5 = vpop.xlane.xlu0 %1565  ;;  %v1671_v36 = vmul.f32 1.442695, %v1644_v10  ;;  %v4654_v61 = vpop.eup %4653  ;;  %v6779_v10 = vld [vmem:[#allocation2 + $0xf8] sm:$0xff]  ;;  %4665 = vpow2.f32 %v1665_v3 }
 0x4a0   : > { %v6766_v34 = vmax.f32 %v6753_v1, %v1566_v5  ;;  %v1645_v47 = vsub.f32 %v6592_v43, %v6761_v18  ;;  %1967 = vst [vmem:[#allocation2 + $0xa0] sm:$0xff] %v6761_v18  ;;  %4204 = vmatprep.mubr.bf16.mxu0 %v1713_v9  ;;  %1687 = vadd.xlane.f32.xlu1 %v4654_v61  ;;  %v1667_v27 = vmul.f32 1.442695, %v1642_v63 }
 0x4a1   : > { %v1568_v56 = vpop.xlane.xlu1 %1567  ;;  %4667 = vpow2.f32 %v1671_v36 }
 0x4a2   : > { %1969 = vst [vmem:[#allocation2 + $0x20] sm:$0xff] %v6766_v34  ;;  %v6777_v5 = vmax.f32 %v6763_v59, %v1568_v56  ;;  %v1647_v43 = vsub.f32 %v6598_v37, %v6766_v34  ;;  %v1673_v9 = vmul.f32 1.442695, %v1645_v47  ;;  %4669 = vpow2.f32 %v1667_v27 }
 0x4a3   : > { %v1564_v42 = vpop.xlane.xlu0 %1563  ;;  %v4656_v50 = vpop.eup %4655 }
 0x4a4   : > { %8163 = vst [vmem:[#allocation46_spill] sm:$0xff] %v6777_v5  ;;  %1970 = vst [vmem:[#allocation2 + $0x98] sm:$0xff] %v6777_v5  ;;  %v6787_v1 = vmax.f32 %v6779_v10, %v1564_v42  ;;  %1693 = vadd.xlane.f32.xlu0 %v4656_v50  ;;  %1683 = vadd.xlane.f32.xlu1 %v4652_v29  ;;  %v1677_v3 = vmul.f32 1.442695, %v1647_v43  ;;  %v4658_v47 = vpop.eup %4657  ;;  %4671 = vpow2.f32 %v1673_v9 }
 0x4a5   : > { %v1648_v56 = vsub.f32 %v6604_v2, %v6777_v5  ;;  %v1803_v42 = vpop.permute.xlu1 %1802  ;;  %v4660_v38 = vpop.eup %4659  ;;  %v1714_v9 = vpack.c.bf16 %v4654_v61, %v6722_v40 }
 0x4a6   : > { %v1646_v37 = vsub.f32 %v6610_v35, %v6787_v1  ;;  %1968 = vst [vmem:[#allocation2 + $0xf8] sm:$0xff] %v6787_v1  ;;  %4673 = vpow2.f32 %v1677_v3 }
 0x4a7   : > { %v1805_v36 = vpop.permute.xlu0 %1804  ;;  %v4662_v27 = vpop.eup %4661  ;;  %v1679_v43 = vmul.f32 1.442695, %v1648_v56 }
 0x4a8   : > { %4200 = vmatprep.subr.bf16.mxu0 %v1805_v36  ;;  %v1675_v29 = vmul.f32 1.442695, %v1646_v37  ;;  %1689 = vadd.xlane.f32.xlu0 %v4658_v47  ;;  %v1715_v63 = vpack.c.bf16 %v4662_v27, %v4658_v47 }
 0x4a9   : > { %4201 = vmatpush3.bf16.msra.mxu0 %v1805_v36  ;;  %1695 = vadd.xlane.f32.xlu1 %v4660_v38  ;;  %v1716_v36 = vpack.c.bf16 %v4660_v38, %v4656_v50  ;;  %v840_v50 = vld [vmem:[#allocation3 + $0x78] sm:$0xff] }
 0x4aa   : > { %4202 = vmatprep.subr.bf16.mxu0 %v1803_v42  ;;  %4675 = vpow2.f32 %v1675_v29 }
 0x4ab   : > { %v4664_v35 = vpop.eup %4663  ;;  %4677 = vpow2.f32 %v1679_v43  ;;  %v838_v43 = vld [vmem:[#allocation3 + $0xc8] sm:$0xff] }
 0x4ac   : > { %1701 = vadd.xlane.f32.xlu0 %v4664_v35  ;;  %v4666_v2 = vpop.eup %4665 }
 0x4ad   : > { %4203 = vmatpush3.bf16.msra.mxu0 %v1803_v42  ;;  %1691 = vadd.xlane.f32.xlu1 %v4662_v27  ;;  %v837_v27 = vld [vmem:[#allocation3 + $0x80] sm:$0xff] }
 0x4ae   : > { %v4668_v5 = vpop.eup %4667 }
 0x4af   : > { %v4670_v37 = vpop.eup %4669  ;;  %v1718_v40 = vpack.c.bf16 %v4668_v5, %v4664_v35 }
 0x4b0   : > { %4205 = vmatmul.mubr.bf16.vlgmr.msra.gmra.mxu0 %v1714_v9  ;;  %1697 = vadd.xlane.f32.xlu0 %v4666_v2  ;;  %v1717_v56 = vpack.c.bf16 %v4670_v37, %v4666_v2  ;;  %v1037_v9 = vmul.f32 %v6428_v62, %v837_v27 }
 0x4b1   : > { %4208 = vmatprep.mubr.bf16.mxu0 %v1715_v63  ;;  %1703 = vadd.xlane.f32.xlu1 %v4668_v5  ;;  %v4672_v3 = vpop.eup %4671  ;;  %v1040_v5 = vmul.f32 %v6434_v30, %v840_v50  ;;  %v843_v30 = vld [vmem:[#allocation3 + $0x58] sm:$0xff] }
 0x4b3   : > { %v4674_v29 = vpop.eup %4673 }
 0x4b4   : > { %1705 = vadd.xlane.f32.xlu0 %v4672_v3 }
 0x4b5   : > { %1699 = vadd.xlane.f32.xlu1 %v4670_v37  ;;  %v1038_v37 = vmul.f32 %v6437_v57, %v838_v43  ;;  %v844_v57 = vld [vmem:[#allocation3 + $0xa8] sm:$0xff] }
 0x4b7   : > { %v4676_v42 = vpop.eup %4675 }
 0x4b8   : > { %4209 = vmatmul.mubr.bf16.gmra.mxu0 %v1716_v36  ;;  %1709 = vadd.xlane.f32.xlu0 %v4674_v29  ;;  %v4678_v61 = vpop.eup %4677  ;;  %v1719_v47 = vpack.c.bf16 %v4676_v42, %v4672_v3  ;;  %v842_v3 = vld [vmem:[#allocation3 + $0x90] sm:$0xff] }
 0x4b9   : > { %4212 = vmatprep.mubr.bf16.mxu0 %v1717_v56  ;;  %1707 = vadd.xlane.f32.xlu1 %v4676_v42  ;;  %v1720_v63 = vpack.c.bf16 %v4678_v61, %v4674_v29  ;;  %v839_v56 = vld [vmem:[#allocation3 + $0xe8] sm:$0xff] }
 0x4ba   : > { %v1039_v42 = vmul.f32 %v6423_v39, %v839_v56  ;;  %v846_v39 = vld [vmem:[#allocation3 + $0xb0] sm:$0xff] }
 0x4bd   : > { %1711 = vadd.xlane.f32.xlu1 %v4678_v61 }
 0x4c0   : > { %4213 = vmatmul.mubr.bf16.gmra.mxu0 %v1718_v40  ;;  %v841_v40 = vld [vmem:[#allocation3 + $0x8] sm:$0xff] }
 0x4c1   : > { %4216 = vmatprep.mubr.bf16.mxu0 %v1719_v47  ;;  %v1042_v47 = vmul.f32 %v6453_v7, %v842_v3  ;;  %v1041_v43 = vmul.f32 %v6447_v8, %v841_v40  ;;  %v845_v7 = vld [vmem:[#allocation3 + $0xd0] sm:$0xff]  ;;  %v848_v8 = vld [vmem:[#allocation3 + $0x40] sm:$0xff] }
 0x4c2   : > { %v1048_v40 = vmul.f32 %v6490_v12, %v848_v8  ;;  %v851_v12 = vld [vmem:[#allocation3 + $0x18] sm:$0xff] }
 0x4c8   : > { %4217 = vmatmul.mubr.bf16.gmra.mxu0 %v1720_v63 }
 0x4d6   : > { %v998_v38 = vpop.xlane.xlu1 %997 }
 0x4d7   : > { %v1053_v2 = vadd.f32 %v1037_v9, %v998_v38 }
 0x4d8   : > { %v1000_v36 = vpop.xlane.xlu0 %999 }
 0x4d9   : > { %1069 = vst [vmem:[#allocation3 + $0x80] sm:$0xff] %v1053_v2  ;;  %v1054_v59 = vadd.f32 %v1038_v37, %v1000_v36  ;;  %v1043_v37 = vmul.f32 %v6444_v15, %v843_v30  ;;  %v850_v15 = vld [vmem:[#allocation3 + $0x60] sm:$0xff] }
 0x4da   : > { %v1004_v35 = vpop.xlane.xlu1 %1003 }
 0x4db   : > { %1070 = vst [vmem:[#allocation3 + $0xc8] sm:$0xff] %v1054_v59  ;;  %v1056_v29 = vadd.f32 %v1040_v5, %v1004_v35  ;;  %v1044_v59 = vmul.f32 %v6450_v17, %v844_v57  ;;  %v1046_v5 = vmul.f32 %v6493_v32, %v846_v39  ;;  %v847_v17 = vld [vmem:[#allocation3 + $0x38] sm:$0xff]  ;;  %v849_v32 = vld [vmem:[#allocation3 + $0xe0] sm:$0xff] }
 0x4dc   : > { %v1002_v61 = vpop.xlane.xlu0 %1001 }
 0x4dd   : > { %1072 = vst [vmem:[#allocation3 + $0x78] sm:$0xff] %v1056_v29  ;;  %v1055_v62 = vadd.f32 %v1039_v42, %v1002_v61  ;;  %v1045_v29 = vmul.f32 %v6487_v55, %v845_v7  ;;  %v852_v55 = vld [vmem:[#allocation3 + $0x68] sm:$0xff]  ;;  %v8164_v7 = vsub.f32 %v6633_v22, %v6636_v24  ;;  %v8169_v24 = vsub.f32 %v6660_v4, %v6673_v21 }
 0x4de   : > { %v1008_v63 = vpop.xlane.xlu1 %1007  ;;  %v1052_v39 = vmul.f32 %v6505_v23, %v852_v55  ;;  %v8166_v23 = vsub.f32 %v6658_v44, %v6668_v51  ;;  %v8170_v44 = vsub.f32 %v6686_v26, %v6698_v28  ;;  %v8172_v4 = vsub.f32 %v6716_v58, %v6728_v49  ;;  %v1524_v49 = vld [vmem:[#allocation3 + $0xa0] sm:$0xff] }
 0x4df   : > { %1071 = vst [vmem:[#allocation3 + $0xe8] sm:$0xff] %v1055_v62  ;;  %v1058_v27 = vadd.f32 %v1042_v47, %v1008_v63  ;;  %v1047_v63 = vmul.f32 %v6485_v60, %v847_v17  ;;  %v1521_v17 = vld [vmem:[#allocation3 + $0x10] sm:$0xff]  ;;  %v8173_v26 = vsub.f32 %v6700_v48, %v6714_v41  ;;  %v8176_v41 = vsub.f32 %v6751_v16, %v6761_v18  ;;  %v8177_v55 = vld [vmem:[#allocation44_spill] sm:$0xff] }
 0x4e0   : > { %v1006_v9 = vpop.xlane.xlu0 %1005  ;;  %v1615_v51 = vmul.f32 1.442695, %v8170_v44  ;;  %v1621_v21 = vmul.f32 1.442695, %v8172_v4  ;;  %v8179_v16 = vsub.f32 %v6779_v10, %v6787_v1 }
 0x4e1   : > { %1074 = vst [vmem:[#allocation3 + $0x90] sm:$0xff] %v1058_v27  ;;  %v1057_v38 = vadd.f32 %v1041_v43, %v1006_v9  ;;  %v1050_v43 = vmul.f32 %v6509_v45, %v850_v15  ;;  %v1617_v28 = vmul.f32 1.442695, %v8173_v26 }
 0x4e2   : > { %v1012_v50 = vpop.xlane.xlu1 %1011  ;;  %v1627_v18 = vmul.f32 1.442695, %v8179_v16 }
 0x4e3   : > { %1073 = vst [vmem:[#allocation3 + $0x8] sm:$0xff] %v1057_v38  ;;  %v1060_v2 = vadd.f32 %v1044_v59, %v1012_v50  ;;  %v1049_v38 = vmul.f32 %v6501_v20, %v849_v32  ;;  %v8165_v20 = vsub.f32 %v6638_v13, %v6648_v0  ;;  %v1609_v13 = vmul.f32 1.442695, %v8169_v24 }
 0x4e4   : > { %v1010_v36 = vpop.xlane.xlu0 %1009 }
 0x4e5   : > { %1076 = vst [vmem:[#allocation3 + $0xa8] sm:$0xff] %v1060_v2  ;;  %v1059_v56 = vadd.f32 %v1043_v37, %v1010_v36  ;;  %v1051_v37 = vmul.f32 %v6497_v52, %v851_v12  ;;  %v8167_v52 = vsub.f32 %v6645_v11, %v6656_v14  ;;  %v8171_v11 = vsub.f32 %v6688_v6, %v6703_v33 }
 0x4e6   : > { %v1016_v35 = vpop.xlane.xlu1 %1015  ;;  %v8174_v33 = vsub.f32 %v6720_v31, %v6736_v54 }
 0x4e7   : > { %1075 = vst [vmem:[#allocation3 + $0x58] sm:$0xff] %v1059_v56  ;;  %v1062_v3 = vadd.f32 %v1046_v5, %v1016_v35  ;;  %v1605_v56 = vmul.f32 1.442695, %v8164_v7  ;;  %v1601_v5 = vmul.f32 1.442695, %v8165_v20  ;;  %v8181_v7 = vld [vmem:[#allocation46_spill] sm:$0xff] }
 0x4e8   : > { %v1014_v42 = vpop.xlane.xlu0 %1013  ;;  %v1607_v35 = vmul.f32 1.442695, %v8166_v23  ;;  %v1603_v8 = vmul.f32 1.442695, %v8167_v52  ;;  %v1611_v14 = vmul.f32 1.442695, %v8171_v11 }
 0x4e9   : > { %1078 = vst [vmem:[#allocation3 + $0xb0] sm:$0xff] %v1062_v3  ;;  %v1061_v61 = vadd.f32 %v1045_v29, %v1014_v42  ;;  %4679 = vpow2.f32 %v1605_v56  ;;  %v8168_v3 = vsub.f32 %v6670_v46, %v6684_v19  ;;  %v1523_v29 = vld [vmem:[#allocation3 + $0x50] sm:$0xff]  ;;  %v1531_v52 = vld [vmem:[#allocation3 + $0xf8] sm:$0xff] }
 0x4ea   : > { %v1020_v62 = vpop.xlane.xlu1 %1019  ;;  %4681 = vpow2.f32 %v1601_v5 }
 0x4eb   : > { %1077 = vst [vmem:[#allocation3 + $0xd0] sm:$0xff] %v1061_v61  ;;  %v1064_v47 = vadd.f32 %v1048_v40, %v1020_v62  ;;  %4683 = vpow2.f32 %v1607_v35  ;;  %v1613_v22 = vmul.f32 1.442695, %v8168_v3  ;;  %v1623_v40 = vmul.f32 1.442695, %v8174_v33  ;;  %v1533_v33 = vld [vmem:[#allocation3 + $0xb8] sm:$0xff] }
 0x4ec   : > { %v1018_v57 = vpop.xlane.xlu0 %1017  ;;  %4685 = vpow2.f32 %v1603_v8  ;;  %v1526_v8 = vld [vmem:[#allocation3 + $0x30] sm:$0xff] }
 0x4ed   : > { %1080 = vst [vmem:[#allocation3 + $0x40] sm:$0xff] %v1064_v47  ;;  %v1063_v27 = vadd.f32 %v1047_v63, %v1018_v57  ;;  %4687 = vpow2.f32 %v1613_v22  ;;  %v8175_v47 = vsub.f32 %v6731_v53, %v6749_v25  ;;  %v1625_v57 = vmul.f32 1.442695, %v8176_v41 }
 0x4ee   : > { %v1024_v9 = vpop.xlane.xlu1 %1023  ;;  %4689 = vpow2.f32 %v1609_v13  ;;  %v8178_v53 = vsub.f32 %v8177_v55, %v6766_v34 }
 0x4ef   : > { %1079 = vst [vmem:[#allocation3 + $0x38] sm:$0xff] %v1063_v27  ;;  %v1066_v30 = vadd.f32 %v1050_v43, %v1024_v9  ;;  %4691 = vpow2.f32 %v1615_v51  ;;  %v1619_v63 = vmul.f32 1.442695, %v8175_v47  ;;  %v1527_v27 = vld [vmem:[#allocation3 + $0x20] sm:$0xff]  ;;  %v1522_v43 = vld [vmem:[#allocation3 + $0x70] sm:$0xff] }
 0x4f0   : > { %v1022_v59 = vpop.xlane.xlu0 %1021  ;;  %4693 = vpow2.f32 %v1611_v14  ;;  %v1629_v25 = vmul.f32 1.442695, %v8178_v53  ;;  %v1529_v14 = vld [vmem:[#allocation3 + $0x88] sm:$0xff] }
 0x4f1   : > { %1082 = vst [vmem:[#allocation3 + $0x60] sm:$0xff] %v1066_v30  ;;  %v1065_v50 = vadd.f32 %v1049_v38, %v1022_v59  ;;  %4695 = vpow2.f32 %v1621_v21 }
 0x4f2   : > { %v1028_v2 = vpop.xlane.xlu1 %1027  ;;  %4697 = vpow2.f32 %v1617_v28 }
 0x4f3   : > { %1081 = vst [vmem:[#allocation3 + $0xe0] sm:$0xff] %v1065_v50  ;;  %v1068_v60 = vadd.f32 %v1052_v39, %v1028_v2  ;;  %4699 = vpow2.f32 %v1623_v40  ;;  %v1525_v2 = vld [vmem:[#allocation3 + $0xd8] sm:$0xff]  ;;  %v1530_v40 = vld [vmem:[#allocation3 + $0x48] sm:$0xff] }
 0x4f4   : > { %v1026_v36 = vpop.xlane.xlu0 %1025  ;;  %4701 = vpow2.f32 %v1619_v63 }
 0x4f5   : > { %1084 = vst [vmem:[#allocation3 + $0x68] sm:$0xff] %v1068_v60  ;;  %v1067_v45 = vadd.f32 %v1051_v37, %v1026_v36  ;;  %4703 = vpow2.f32 %v1625_v57  ;;  %v1528_v60 = vld [vmem:[#allocation3 + $0xf0] sm:$0xff] }
 0x4f6   : > { %v6831_v0 = vpop.eup %4679  ;;  %4705 = vpow2.f32 %v1629_v25 }
 0x4f7   : > { %1083 = vst [vmem:[#allocation3 + $0x18] sm:$0xff] %v1067_v45  ;;  %v1723_v46 = vmul.f32 %v6831_v0, %v1523_v29  ;;  %v6840_v19 = vpop.eup %4681  ;;  %v8180_v45 = vld [vmem:[#allocation45_spill] sm:$0xff]  ;;  %4707 = vpow2.f32 %v1627_v18 }
 0x4f8   : > { %v1721_v6 = vmul.f32 %v6840_v19, %v1521_v17  ;;  %v6852_v15 = vpop.eup %4683  ;;  %v8182_v1 = vsub.f32 %v8180_v45, %v8181_v7 }
 0x4f9   : > { %v6857_v48 = vpop.eup %4685  ;;  %v1724_v54 = vmul.f32 %v6852_v15, %v1524_v49 }
 0x4fa   : > { %v6863_v31 = vpop.eup %4687  ;;  %v1722_v59 = vmul.f32 %v6857_v48, %v1522_v43  ;;  %v1631_v10 = vmul.f32 1.442695, %v8182_v1  ;;  %v1773_v1 = vld [vmem:[#allocation4 + $0x98] sm:$0xff] }
 0x4fb   : > { %v6868_v30 = vpop.eup %4689  ;;  %v1727_v38 = vmul.f32 %v6863_v31, %v1527_v27  ;;  %v1534_v27 = vld [vmem:[#allocation3] sm:$0xff] }
 0x4fc   : > { %v6875_v12 = vpop.eup %4691  ;;  %v1725_v56 = vmul.f32 %v6868_v30, %v1525_v2  ;;  %4709 = vpow2.f32 %v1631_v10 }
 0x4fd   : > { %v6877_v36 = vpop.eup %4693  ;;  %v1728_v20 = vmul.f32 %v6875_v12, %v1528_v60 }
 0x4fe   : > { %v6884_v5 = vpop.eup %4695  ;;  %v1726_v44 = vmul.f32 %v6877_v36, %v1526_v8 }
 0x4ff   : > { %v6886_v24 = vpop.eup %4697  ;;  %v1731_v13 = vmul.f32 %v6884_v5, %v1531_v52  ;;  %v1789_v52 = vmul.f32 %v6852_v15, %v1773_v1 }
 0x500   : > { %v6890_v51 = vpop.eup %4699  ;;  %v1729_v17 = vmul.f32 %v6886_v24, %v1529_v14  ;;  %v1777_v14 = vld [vmem:[#allocation4 + $0xb8] sm:$0xff] }
 0x521   : > { %v1686_v42 = vpop.xlane.xlu0 %1685 }
 0x522   : > { %v1739_v61 = vadd.f32 %v1723_v46, %v1686_v42  ;;  %v1532_v46 = vld [vmem:[#allocation3 + $0xc0] sm:$0xff]  ;;  %v6892_v42 = vpop.eup %4701 }
 0x523   : > { %v6896_v26 = vpop.eup %4703  ;;  %v1730_v63 = vmul.f32 %v6892_v42, %v1530_v40  ;;  %v1778_v40 = vld [vmem:[#allocation4 + $0xc0] sm:$0xff] }
 0x524   : > { %1755 = vst [vmem:[#allocation3 + $0x50] sm:$0xff] %v1739_v61  ;;  %v1732_v61 = vmul.f32 %v6890_v51, %v1532_v46  ;;  %v6898_v49 = vpop.eup %4705  ;;  %v1733_v47 = vmul.f32 %v6896_v26, %v1533_v33 }
 0x525   : > { %v1682_v62 = vpop.xlane.xlu0 %1681  ;;  %v6902_v41 = vpop.eup %4707 }
 0x526   : > { %v1737_v58 = vadd.f32 %v1721_v6, %v1682_v62  ;;  %v1734_v53 = vmul.f32 %v6902_v41, %v1534_v27  ;;  %v6906_v25 = vpop.eup %4709 }
 0x528   : > { %1753 = vst [vmem:[#allocation3 + $0x10] sm:$0xff] %v1737_v58 }
 0x529   : > { %v1688_v32 = vpop.xlane.xlu1 %1687 }
 0x52a   : > { %v1740_v9 = vadd.f32 %v1724_v54, %v1688_v32  ;;  %v1535_v32 = vld [vmem:[#allocation3 + $0x28] sm:$0xff] }
 0x52b   : > { %v1735_v55 = vmul.f32 %v6898_v49, %v1535_v32 }
 0x52c   : > { %1756 = vst [vmem:[#allocation3 + $0xa0] sm:$0xff] %v1740_v9 }
 0x52d   : > { %v1694_v50 = vpop.xlane.xlu0 %1693  ;;  %v1684_v39 = vpop.xlane.xlu1 %1683 }
 0x52e   : > { %v1743_v34 = vadd.f32 %v1727_v38, %v1694_v50  ;;  %v1738_v37 = vadd.f32 %v1722_v59, %v1684_v39  ;;  %v1536_v38 = vld [vmem:[#allocation3 + $0x98] sm:$0xff] }
 0x52f   : > { %v1736_v39 = vmul.f32 %v6906_v25, %v1536_v38  ;;  %v1785_v38 = vld [vmem:[#allocation4 + $0xf8] sm:$0xff] }
 0x530   : > { %1759 = vst [vmem:[#allocation3 + $0x20] sm:$0xff] %v1743_v34  ;;  %1754 = vst [vmem:[#allocation3 + $0x70] sm:$0xff] %v1738_v37  ;;  %v1772_v34 = vld [vmem:[#allocation4 + $0x90] sm:$0xff]  ;;  %v1770_v37 = vld [vmem:[#allocation4 + $0x80] sm:$0xff] }
 0x531   : > { %v1690_v23 = vpop.xlane.xlu0 %1689  ;;  %v1788_v45 = vmul.f32 %v6831_v0, %v1772_v34 }
 0x532   : > { %v1696_v35 = vpop.xlane.xlu1 %1695  ;;  %v1741_v3 = vadd.f32 %v1725_v56, %v1690_v23  ;;  %v1786_v56 = vmul.f32 %v6840_v19, %v1770_v37  ;;  %v1771_v23 = vld [vmem:[#allocation4 + $0x88] sm:$0xff] }
 0x533   : > { %v1744_v22 = vadd.f32 %v1728_v20, %v1696_v35 }
 0x534   : > { %1757 = vst [vmem:[#allocation3 + $0xd8] sm:$0xff] %v1741_v3  ;;  %v1776_v3 = vld [vmem:[#allocation4 + $0xb0] sm:$0xff] }
 0x535   : > { %1760 = vst [vmem:[#allocation3 + $0xf0] sm:$0xff] %v1744_v22  ;;  %v1702_v29 = vpop.xlane.xlu0 %1701  ;;  %v1792_v19 = vmul.f32 %v6863_v31, %v1776_v3 }
 0x536   : > { %v1692_v11 = vpop.xlane.xlu1 %1691  ;;  %v1747_v4 = vadd.f32 %v1731_v13, %v1702_v29  ;;  %v1787_v13 = vmul.f32 %v6857_v48, %v1771_v23  ;;  %v1793_v48 = vmul.f32 %v6875_v12, %v1777_v14  ;;  %v1794_v12 = vmul.f32 %v6886_v24, %v1778_v40 }
 0x537   : > { %v1742_v21 = vadd.f32 %v1726_v44, %v1692_v11  ;;  %v1774_v44 = vld [vmem:[#allocation4 + $0xa0] sm:$0xff] }
 0x538   : > { %1763 = vst [vmem:[#allocation3 + $0xf8] sm:$0xff] %v1747_v4  ;;  %v1790_v15 = vmul.f32 %v6868_v30, %v1774_v44 }
 0x539   : > { %1758 = vst [vmem:[#allocation3 + $0x30] sm:$0xff] %v1742_v21  ;;  %v1698_v28 = vpop.xlane.xlu0 %1697  ;;  %v1775_v21 = vld [vmem:[#allocation4 + $0xa8] sm:$0xff] }
 0x53a   : > { %v1704_v6 = vpop.xlane.xlu1 %1703  ;;  %v1745_v62 = vadd.f32 %v1729_v17, %v1698_v28  ;;  %v1780_v28 = vld [vmem:[#allocation4 + $0xd0] sm:$0xff]  ;;  %v1791_v31 = vmul.f32 %v6877_v36, %v1775_v21 }
 0x53b   : > { %v1748_v58 = vadd.f32 %v1732_v61, %v1704_v6  ;;  %v1796_v30 = vmul.f32 %v6884_v5, %v1780_v28 }
 0x53c   : > { %1761 = vst [vmem:[#allocation3 + $0x88] sm:$0xff] %v1745_v62 }
 0x53d   : > { %1764 = vst [vmem:[#allocation3 + $0xc0] sm:$0xff] %v1748_v58  ;;  %v1706_v57 = vpop.xlane.xlu0 %1705 }
 0x53e   : > { %v1700_v54 = vpop.xlane.xlu1 %1699  ;;  %v1749_v43 = vadd.f32 %v1733_v47, %v1706_v57  ;;  %v1781_v47 = vld [vmem:[#allocation4 + $0xd8] sm:$0xff] }
 0x53f   : > { %v1746_v9 = vadd.f32 %v1730_v63, %v1700_v54  ;;  %v1779_v54 = vld [vmem:[#allocation4 + $0xc8] sm:$0xff]  ;;  %v1797_v36 = vmul.f32 %v6890_v51, %v1781_v47 }
 0x540   : > { %1765 = vst [vmem:[#allocation3 + $0xb8] sm:$0xff] %v1749_v43  ;;  %v1784_v43 = vld [vmem:[#allocation4 + $0xf0] sm:$0xff]  ;;  %v1795_v5 = vmul.f32 %v6892_v42, %v1779_v54  ;;  %v1801_v42 = vmul.f32 %v6906_v25, %v1785_v38 }
 0x541   : > { %1762 = vst [vmem:[#allocation3 + $0x48] sm:$0xff] %v1746_v9  ;;  %v1710_v16 = vpop.xlane.xlu0 %1709  ;;  %v1800_v24 = vmul.f32 %v6898_v49, %v1784_v43 }
 0x542   : > { %v1708_v18 = vpop.xlane.xlu1 %1707  ;;  %v1751_v59 = vadd.f32 %v1735_v55, %v1710_v16 }
 0x543   : > { %v1750_v50 = vadd.f32 %v1734_v53, %v1708_v18  ;;  %v1782_v53 = vld [vmem:[#allocation4 + $0xe0] sm:$0xff] }
 0x544   : > { %1767 = vst [vmem:[#allocation3 + $0x28] sm:$0xff] %v1751_v59  ;;  %v1798_v51 = vmul.f32 %v6896_v26, %v1782_v53 }
 0x545   : > { %1766 = vst [vmem:[#allocation3] sm:$0xff] %v1750_v50 }
 0x546   : > { %v1712_v2 = vpop.xlane.xlu1 %1711 }
 0x547   : > { %v1752_v60 = vadd.f32 %v1736_v39, %v1712_v2  ;;  %v1783_v39 = vld [vmem:[#allocation4 + $0xe8] sm:$0xff] }
 0x548   : > { %v1799_v49 = vmul.f32 %v6902_v41, %v1783_v39 }
 0x549   : > { %1768 = vst [vmem:[#allocation3 + $0x98] sm:$0xff] %v1752_v60 }
 0x570   : > { %v4206_v7 = vpop.f32.mrf.mxu0 }
 0x571   : > { %v1925_v10 = vadd.f32 %v4206_v7, %v1788_v45 }
 0x572   : > { %v1860_v20 = vpop.f32.mrf.mxu0 }
 0x573   : > { %1941 = vst.msk [vmem:[#allocation4 + $0x90] sm:$0xff] %vm659_vm1, %v1925_v10  ;;  %v1923_v35 = vadd.f32 %v1860_v20, %v1786_v56 }
 0x574   : > { %v4207_v8 = vpop.f32.mrf.mxu0 }
 0x575   : > { %1939 = vst.msk [vmem:[#allocation4 + $0x80] sm:$0xff] %vm659_vm1, %v1923_v35  ;;  %v1926_v22 = vadd.f32 %v4207_v8, %v1789_v52 }
 0x576   : > { %v1863_v0 = vpop.f32.mrf.mxu0 }
 0x577   : > { %1942 = vst.msk [vmem:[#allocation4 + $0x98] sm:$0xff] %vm659_vm1, %v1926_v22  ;;  %v1924_v29 = vadd.f32 %v1863_v0, %v1787_v13 }
 0x578   : > { %v4210_v11 = vpop.f32.mrf.mxu0 }
 0x579   : > { %1940 = vst.msk [vmem:[#allocation4 + $0x88] sm:$0xff] %vm659_vm1, %v1924_v29  ;;  %v1929_v46 = vadd.f32 %v4210_v11, %v1792_v19 }
 0x57a   : > { %v1876_v4 = vpop.f32.mrf.mxu0 }
 0x57b   : > { %1945 = vst.msk [vmem:[#allocation4 + $0xb0] sm:$0xff] %vm659_vm1, %v1929_v46  ;;  %v1927_v17 = vadd.f32 %v1876_v4, %v1790_v15 }
 0x57c   : > { %v4211_v61 = vpop.f32.mrf.mxu0 }
 0x57d   : > { %1943 = vst.msk [vmem:[#allocation4 + $0xa0] sm:$0xff] %vm659_vm1, %v1927_v17  ;;  %v1930_v6 = vadd.f32 %v4211_v61, %v1793_v48 }
 0x57e   : > { %v1879_v33 = vpop.f32.mrf.mxu0 }
 0x57f   : > { %1946 = vst.msk [vmem:[#allocation4 + $0xb8] sm:$0xff] %vm659_vm1, %v1930_v6  ;;  %v1928_v62 = vadd.f32 %v1879_v33, %v1791_v31 }
 0x580   : > { %v4214_v58 = vpop.f32.mrf.mxu0 }
 0x581   : > { %1944 = vst.msk [vmem:[#allocation4 + $0xa8] sm:$0xff] %vm659_vm1, %v1928_v62  ;;  %v1933_v63 = vadd.f32 %v4214_v58, %v1796_v30 }
 0x582   : > { %v1892_v57 = vpop.f32.mrf.mxu0 }
 0x583   : > { %1949 = vst.msk [vmem:[#allocation4 + $0xd0] sm:$0xff] %vm659_vm1, %v1933_v63  ;;  %v1931_v32 = vadd.f32 %v1892_v57, %v1794_v12 }
 0x584   : > { %v4215_v27 = vpop.f32.mrf.mxu0 }
 0x585   : > { %1947 = vst.msk [vmem:[#allocation4 + $0xc0] sm:$0xff] %vm659_vm1, %v1931_v32  ;;  %v1934_v9 = vadd.f32 %v4215_v27, %v1797_v36 }
 0x586   : > { %v1895_v55 = vpop.f32.mrf.mxu0 }
 0x587   : > { %1950 = vst.msk [vmem:[#allocation4 + $0xd8] sm:$0xff] %vm659_vm1, %v1934_v9  ;;  %v1932_v16 = vadd.f32 %v1895_v55, %v1795_v5 }
 0x588   : > { %v4218_v18 = vpop.f32.mrf.mxu0 }
 0x589   : > { %1948 = vst.msk [vmem:[#allocation4 + $0xc8] sm:$0xff] %vm659_vm1, %v1932_v16  ;;  %v1937_v59 = vadd.f32 %v4218_v18, %v1800_v24 }
 0x58a   : > { %v1908_v50 = vpop.f32.mrf.mxu0 }
 0x58b   : > { %1953 = vst.msk [vmem:[#allocation4 + $0xf0] sm:$0xff] %vm659_vm1, %v1937_v59  ;;  %v1935_v2 = vadd.f32 %v1908_v50, %v1798_v51 }
 0x58c   : > { %v4219_v60 = vpop.f32.mrf.mxu0 }
 0x58d   : > { %1951 = vst.msk [vmem:[#allocation4 + $0xe0] sm:$0xff] %vm659_vm1, %v1935_v2  ;;  %v1938_v34 = vadd.f32 %v4219_v60, %v1801_v42 }
 0x58e   : > { %v1911_v37 = vpop.f32.mrf.mxu0 }
 0x58f   : > { %1954 = vst.msk [vmem:[#allocation4 + $0xf8] sm:$0xff] %vm659_vm1, %v1938_v34  ;;  %v1936_v45 = vadd.f32 %v1911_v37, %v1799_v49 }
 0x591   : > { %1952 = vst.msk [vmem:[#allocation4 + $0xe8] sm:$0xff] %vm659_vm1, %v1936_v45 }
 0x592 PF: > { %p3900_p0 = scmp.eq.s32.totalorder %s5793_s7, 1 }
 0x594   : > { %1974 = sbr.rel (%p3900_p0) target bundleno = 2535 (0x9e7), region = 56 }
 0x599   : > { %v4713_v26 = vld [vmem:[%s5671_s5 + $0x38] sm:$0xff]   ;;  %vm2119_vm3 = vcmask 523264   ;;  %v4714_v25 = vld [vmem:[%s5671_s5 + $0x30] sm:$0xff]   ;;  %s5241_s27 = smov 64   ;;  %v4715_v7 = vld [vmem:[%s5671_s5 + $0x28] sm:$0xff]  }
 0x59a   : > { %4364 = vmatprep.subr.msk.bf16.mxu0 %vm2119_vm3, %v4713_v26  ;;  %v2166_v41 = vsel %vm2119_vm3, %v4713_v26, 0  ;;  %2784 = vrot.lane.b32.xlu0 %v4713_v26, %s5241_s27  ;;  %v2163_v1 = vsel %vm2119_vm3, %v4714_v25, 0  ;;  %v1975_v10 = vld [vmem:[%s5663_s12] sm:$0xf]  ;;  %v1976_v56 = vld [vmem:[%s5663_s12 + $0x4] sm:$0xf] }
 0x59b   : > { %4221 = vmatpush3.bf16.xpose.msra.mxu0 %v2166_v41  ;;  %2782 = vrot.lane.b32.xlu1 %v4714_v25, %s5241_s27  ;;  %v1991_v20 = vmul.bf16 1040203264, %v1975_v10  ;;  %v1992_v23 = vmul.bf16 1040203264, %v1976_v56  ;;  %v2160_v52 = vsel %vm2119_vm3, %v4715_v7, 0  ;;  %v6961_v8 = vld [vmem:[%s5671_s5 + $0x20] sm:$0xff]  }
 0x59c   : > { %4365 = vmatprep.subr.msk.bf16.mxu0 %vm2119_vm3, %v4714_v25  ;;  %v2157_v3 = vsel %vm2119_vm3, %v6961_v8, 0  ;;  %v6968_v22 = vld [vmem:[%s5671_s5 + $0x18] sm:$0xff]   ;;  %v6975_v0 = vld [vmem:[%s5671_s5 + $0x10] sm:$0xff]   ;;  %v6982_v29 = vld [vmem:[%s5671_s5 + $0x8] sm:$0xff]  }
 0x59d   : > { %v6954_v35 = vcombine.low %v1991_v20, %v1992_v23  ;;  %v2154_v13 = vsel %vm2119_vm3, %v6968_v22, 0  ;;  %v2151_v44 = vsel %vm2119_vm3, %v6975_v0, 0  ;;  %v2148_v19 = vsel %vm2119_vm3, %v6982_v29, 0  ;;  %v6989_v11 = vld [vmem:[%s5671_s5] sm:$0xff]   ;;  %v1977_v14 = vld [vmem:[%s5663_s12 + $0x8] sm:$0xf] }
 0x59e   : > { %2780 = vrot.lane.b32.xlu0 %v4715_v7, %s5241_s27  ;;  %v1978_v46 = vld [vmem:[%s5663_s12 + $0xc] sm:$0xf]  ;;  %v2145_v15 = vsel %vm2119_vm3, %v6989_v11, 0  ;;  %v1979_v4 = vld [vmem:[%s5663_s12 + $0x10] sm:$0xf]  ;;  %v7038_v39 = vld [vmem:[%s5678_s16 + $0x38] sm:$0xff]  }
 0x59f   : > { %4236 = vmatprep.mubr.msk.bf16.mxu0 %vm2119_vm3, %v6954_v35  ;;  %v1980_v21 = vld [vmem:[%s5663_s12 + $0x14] sm:$0xf]  ;;  %v1993_v17 = vmul.bf16 1040203264, %v1977_v14  ;;  %v1994_v48 = vmul.bf16 1040203264, %v1978_v46  ;;  %4252 = vmatprep.subr.bf16.mxu1 %v7038_v39 }
 0x5a0   : > { %v1995_v61 = vmul.bf16 1040203264, %v1979_v4  ;;  %v1996_v28 = vmul.bf16 1040203264, %v1980_v21  ;;  %v1981_v33 = vld [vmem:[%s5663_s12 + $0x18] sm:$0xf]  ;;  %4253 = vmatpush3.bf16.msra.mxu1 %v7038_v39 }
 0x5a1   : > { %v6999_v6 = vcombine.low %v1993_v17, %v1994_v48  ;;  %v1982_v40 = vld [vmem:[%s5663_s12 + $0x1c] sm:$0xf]  ;;  %v1983_v62 = vld [vmem:[%s5663_s12 + $0x20] sm:$0xf]  ;;  %v1984_v30 = vld [vmem:[%s5663_s12 + $0x24] sm:$0xf] }
 0x5a2   : > { %v7001_v31 = vcombine.low %v1995_v61, %v1996_v28  ;;  %v1997_v58 = vmul.bf16 1040203264, %v1981_v33  ;;  %v1998_v47 = vmul.bf16 1040203264, %v1982_v40  ;;  %v1999_v63 = vmul.bf16 1040203264, %v1983_v62 }
 0x5a3   : > { %4223 = vmatpush3.bf16.xpose.msra.mxu0 %v2163_v1  ;;  %v2000_v12 = vmul.bf16 1040203264, %v1984_v30  ;;  %v1985_v32 = vld [vmem:[%s5663_s12 + $0x28] sm:$0xf]  ;;  %v1986_v36 = vld [vmem:[%s5663_s12 + $0x2c] sm:$0xf] }
 0x5a4   : > { %4366 = vmatprep.subr.msk.bf16.mxu0 %vm2119_vm3, %v4715_v7  ;;  %v7011_v57 = vcombine.low %v1997_v58, %v1998_v47  ;;  %v1987_v27 = vld [vmem:[%s5663_s12 + $0x30] sm:$0xf]  ;;  %v1988_v43 = vld [vmem:[%s5663_s12 + $0x34] sm:$0xf]  ;;  %v2001_v9 = vmul.bf16 1040203264, %v1985_v32 }
 0x5a5   : > { %v7013_v54 = vcombine.low %v1999_v63, %v2000_v12  ;;  %v2002_v5 = vmul.bf16 1040203264, %v1986_v36  ;;  %v2003_v55 = vmul.bf16 1040203264, %v1987_v27  ;;  %v2004_v53 = vmul.bf16 1040203264, %v1988_v43 }
 0x5a6   : > { %v1989_v18 = vld [vmem:[%s5663_s12 + $0x38] sm:$0xf]  ;;  %v1990_v38 = vld [vmem:[%s5663_s12 + $0x3c] sm:$0xf]  ;;  %v4722_v2 = vld [vmem:[%s5678_s16 + $0x30] sm:$0xff]  }
 0x5a7   : > { %v7023_v16 = vcombine.low %v2001_v9, %v2002_v5  ;;  %v7025_v24 = vcombine.low %v2003_v55, %v2004_v53  ;;  %v2005_v59 = vmul.bf16 1040203264, %v1989_v18  ;;  %v2006_v51 = vmul.bf16 1040203264, %v1990_v38  ;;  %4254 = vmatprep.subr.bf16.mxu1 %v4722_v2  ;;  %v7044_v42 = vld [vmem:[%s5678_s16 + $0x28] sm:$0xff]   ;;  %v4724_v60 = vld [vmem:[%s5678_s16 + $0x20] sm:$0xff]  }
 0x5a8   : > { %4255 = vmatpush3.bf16.msra.mxu1 %v4722_v2  ;;  %v7050_v34 = vld [vmem:[%s5678_s16 + $0x18] sm:$0xff]   ;;  %v4726_v49 = vld [vmem:[%s5678_s16 + $0x10] sm:$0xff]   ;;  %v7056_v37 = vld [vmem:[%s5678_s16 + $0x8] sm:$0xff]  }
 0x5a9   : > { %v7033_v50 = vcombine.low %v2005_v59, %v2006_v51  ;;  %4256 = vmatprep.subr.bf16.mxu1 %v7044_v42  ;;  %v7060_v45 = vld [vmem:[%s5678_s16] sm:$0xff]   ;;  %v7169_v48 = vld [vmem:[#allocation2 + $0x18] sm:$0xff]  ;;  %v7181_v62 = vld [vmem:[#allocation2 + $0x30] sm:$0xff] }
 0x5aa   : > { %v7171_v28 = vld [vmem:[#allocation2] sm:$0xff]  ;;  %v7201_v43 = vld [vmem:[#allocation2 + $0x50] sm:$0xff] }
 0x5ab   : > { %4225 = vmatpush3.bf16.xpose.msra.mxu0 %v2160_v52 }
 0x5ac   : > { %4367 = vmatprep.subr.msk.bf16.mxu0 %vm2119_vm3, %v6961_v8  ;;  %4257 = vmatpush3.bf16.msra.mxu1 %v7044_v42 }
 0x5ad   : > { %4258 = vmatprep.subr.bf16.mxu1 %v4724_v60 }
 0x5b0   : > { %4259 = vmatpush3.bf16.msra.mxu1 %v4724_v60 }
 0x5b1   : > { %4260 = vmatprep.subr.bf16.mxu1 %v7050_v34 }
 0x5b3   : > { %4227 = vmatpush3.bf16.xpose.msra.mxu0 %v2157_v3 }
 0x5b4   : > { %4368 = vmatprep.subr.msk.bf16.mxu0 %vm2119_vm3, %v6968_v22  ;;  %4261 = vmatpush3.bf16.msra.mxu1 %v7050_v34 }
 0x5b5   : > { %4262 = vmatprep.subr.bf16.mxu1 %v4726_v49 }
 0x5b8   : > { %4263 = vmatpush3.bf16.msra.mxu1 %v4726_v49 }
 0x5b9   : > { %4264 = vmatprep.subr.bf16.mxu1 %v7056_v37 }
 0x5bb   : > { %4229 = vmatpush3.bf16.xpose.msra.mxu0 %v2154_v13 }
 0x5bc   : > { %4369 = vmatprep.subr.msk.bf16.mxu0 %vm2119_vm3, %v6975_v0  ;;  %4265 = vmatpush3.bf16.msra.mxu1 %v7056_v37 }
 0x5bd   : > { %4266 = vmatprep.subr.bf16.mxu1 %v7060_v45 }
 0x5c0   : > { %4267 = vmatpush3.bf16.msra.mxu1 %v7060_v45 }
 0x5c3   : > { %4231 = vmatpush3.bf16.xpose.msra.mxu0 %v2151_v44 }
 0x5c4   : > { %4370 = vmatprep.subr.msk.bf16.mxu0 %vm2119_vm3, %v6982_v29 }
 0x5cb   : > { %4233 = vmatpush3.bf16.xpose.msra.mxu0 %v2148_v19 }
 0x5cc   : > { %4371 = vmatprep.subr.msk.bf16.mxu0 %vm2119_vm3, %v6989_v11 }
 0x5d3   : > { %4235 = vmatpush3.bf16.xpose.msra.mxu0 %v2145_v15 }
 0x5da   : > { %4237 = vmatmul.mubr.msk.bf16.vlgmr.msra.gmra.mxu0 %vm2119_vm3, %v6999_v6 }
 0x5db   : > { %4240 = vmatprep.mubr.msk.bf16.mxu0 %vm2119_vm3, %v7001_v31 }
 0x5e2   : > { %4241 = vmatmul.mubr.msk.bf16.gmra.mxu0 %vm2119_vm3, %v7011_v57 }
 0x5e3   : > { %4244 = vmatprep.mubr.msk.bf16.mxu0 %vm2119_vm3, %v7013_v54 }
 0x5ea   : > { %4245 = vmatmul.mubr.msk.bf16.gmra.mxu0 %vm2119_vm3, %v7023_v16 }
 0x5eb   : > { %4248 = vmatprep.mubr.msk.bf16.mxu0 %vm2119_vm3, %v7025_v24 }
 0x5f2   : > { %4249 = vmatmul.mubr.msk.bf16.gmra.mxu0 %vm2119_vm3, %v7033_v50 }
 0x60c   : > { %v7064_v26 = vpop.permute.xlu0 %2784 }
 0x60d   : > { %4372 = vmatprep.subr.msk.bf16.mxu1 %vm2119_vm3, %v7064_v26 }
 0x69a   : > { %v7069_v25 = vpop.f32.mrf.mxu0 }
 0x69b   : > { %2301 = vmax.xlane.f32.xlu1 %v7069_v25 }
 0x69c   : > { %v7072_v41 = vpop.f32.mrf.mxu0 }
 0x69d   : > { %2297 = vmax.xlane.f32.xlu0 %v7072_v41 }
 0x69e   : > { %v7075_v7 = vpop.f32.mrf.mxu0 }
 0x69f   : > { %2303 = vmax.xlane.f32.xlu1 %v7075_v7 }
 0x6a0   : > { %v7078_v1 = vpop.f32.mrf.mxu0 }
 0x6a1   : > { %2299 = vmax.xlane.f32.xlu0 %v7078_v1 }
 0x6a2   : > { %v7081_v10 = vpop.f32.mrf.mxu0 }
 0x6a3   : > { %2309 = vmax.xlane.f32.xlu1 %v7081_v10 }
 0x6a4   : > { %v7084_v56 = vpop.f32.mrf.mxu0 }
 0x6a6   : > { %v7086_v20 = vpop.f32.mrf.mxu0 }
 0x6a7   : > { %2305 = vmax.xlane.f32.xlu1 %v7084_v56 }
 0x6a8   : > { %v7089_v23 = vpop.f32.mrf.mxu0 }
 0x6aa   : > { %v7091_v52 = vpop.f32.mrf.mxu0 }
 0x6ab   : > { %2311 = vmax.xlane.f32.xlu1 %v7086_v20 }
 0x6ac   : > { %v7094_v3 = vpop.f32.mrf.mxu0 }
 0x6ae   : > { %v7096_v13 = vpop.f32.mrf.mxu0 }
 0x6af   : > { %2307 = vmax.xlane.f32.xlu1 %v7089_v23 }
 0x6b0   : > { %v7099_v44 = vpop.f32.mrf.mxu0 }
 0x6b2   : > { %v7102_v19 = vpop.f32.mrf.mxu0 }
 0x6b3   : > { %2315 = vmax.xlane.f32.xlu1 %v7099_v44 }
 0x6b4   : > { %v7107_v14 = vpop.f32.mrf.mxu0 }
 0x6b6   : > { %v7110_v46 = vpop.f32.mrf.mxu0 }
 0x6b7   : > { %2778 = vrot.lane.b32.xlu0 %v6961_v8, %s5241_s27  ;;  %2325 = vmax.xlane.f32.xlu1 %v7102_v19  ;;  %v7152_v8 = vpop.permute.xlu1 %2782 }
 0x6b8   : > { %v7113_v15 = vpop.f32.mrf.mxu0 }
 0x6bb   : > { %2321 = vmax.xlane.f32.xlu1 %v7107_v14 }
 0x6bf   : > { %2327 = vmax.xlane.f32.xlu1 %v7110_v46 }
 0x6c3   : > { %2323 = vmax.xlane.f32.xlu1 %v7113_v15 }
 0x6d4   : > { %2776 = vrot.lane.b32.xlu1 %v6968_v22, %s5241_s27  ;;  %v7156_v22 = vld [vmem:[#allocation2 + $0xd8] sm:$0xff] }
 0x6d6   : > { %2317 = vmax.xlane.f32.xlu0 %v7091_v52 }
 0x6d8   : > { %2756 = vrot.lane.b32.xlu1 %v6999_v6, %s5241_s27 }
 0x6da   : > { %2313 = vmax.xlane.f32.xlu0 %v7094_v3 }
 0x6dc   : > { %2760 = vrot.lane.b32.xlu1 %v7011_v57, %s5241_s27 }
 0x6de   : > { %2319 = vmax.xlane.f32.xlu0 %v7096_v13 }
 0x6e0   : > { %2764 = vrot.lane.b32.xlu1 %v7023_v16, %s5241_s27 }
 0x6e4   : > { %2768 = vrot.lane.b32.xlu1 %v7033_v50, %s5241_s27  ;;  %v7219_v50 = vld [vmem:[#allocation2 + $0x68] sm:$0xff] }
 0x6e8   : > { %3242 = vrot.lane.b32.xlu1 %v4722_v2, %s5241_s27 }
 0x6ec   : > { %3238 = vrot.lane.b32.xlu1 %v4724_v60, %s5241_s27 }
 0x6f0   : > { %3234 = vrot.lane.b32.xlu1 %v4726_v49, %s5241_s27 }
 0x6f4   : > { %2774 = vrot.lane.b32.xlu0 %v6975_v0, %s5241_s27 }
 0x6f8   : > { %2772 = vrot.lane.b32.xlu0 %v6982_v29, %s5241_s27  ;;  %v7158_v29 = vld [vmem:[#allocation2 + $0xb0] sm:$0xff] }
 0x6fc   : > { %2770 = vrot.lane.b32.xlu0 %v6989_v11, %s5241_s27 }
 0x700   : > { %2754 = vrot.lane.b32.xlu0 %v6954_v35, %s5241_s27  ;;  %v7154_v35 = vpop.permute.xlu0 %2780 }
 0x704   : > { %2758 = vrot.lane.b32.xlu0 %v7001_v31, %s5241_s27 }
 0x708   : > { %2762 = vrot.lane.b32.xlu0 %v7013_v54, %s5241_s27 }
 0x70c   : > { %2766 = vrot.lane.b32.xlu0 %v7025_v24, %s5241_s27  ;;  %v7209_v24 = vld [vmem:[#allocation2 + $0x48] sm:$0xff] }
 0x710   : > { %3244 = vrot.lane.b32.xlu0 %v7038_v39, %s5241_s27 }
 0x714   : > { %3240 = vrot.lane.b32.xlu0 %v7044_v42, %s5241_s27 }
 0x718   : > { %3236 = vrot.lane.b32.xlu0 %v7050_v34, %s5241_s27 }
 0x724   : > { %v2302_v0 = vpop.xlane.xlu1 %2301 }
 0x725   : > { %v7161_v11 = vmax.f32 %v7156_v22, %v2302_v0 }
 0x726   : > { %v2298_v4 = vpop.xlane.xlu0 %2297 }
 0x727   : > { %v2347_v21 = vsub.f32 %v7156_v22, %v7161_v11  ;;  %2740 = vst [vmem:[#allocation2 + $0xd8] sm:$0xff] %v7161_v11  ;;  %v7167_v17 = vmax.f32 %v7158_v29, %v2298_v4  ;;  %v2395_v58 = vsub.f32 %v7069_v25, %v7161_v11  ;;  %v7231_v25 = vld [vmem:[#allocation2 + $0x88] sm:$0xff] }
 0x728   : > { %v2304_v61 = vpop.xlane.xlu1 %2303 }
 0x729   : > { %v2345_v6 = vsub.f32 %v7158_v29, %v7167_v17  ;;  %v2393_v31 = vsub.f32 %v7072_v41, %v7167_v17  ;;  %2738 = vst [vmem:[#allocation2 + $0xb0] sm:$0xff] %v7167_v17  ;;  %v7179_v33 = vmax.f32 %v7169_v48, %v2304_v61  ;;  %v2413_v55 = vmul.f32 1.442695, %v2395_v58  ;;  %v7243_v61 = vld [vmem:[#allocation2 + $0x8] sm:$0xff] }
 0x72a   : > { %v2300_v40 = vpop.xlane.xlu0 %2299 }
 0x72b   : > { %v7184_v30 = vmax.f32 %v7171_v28, %v2300_v40  ;;  %v2348_v47 = vsub.f32 %v7169_v48, %v7179_v33  ;;  %v2396_v63 = vsub.f32 %v7075_v7, %v7179_v33  ;;  %2741 = vst [vmem:[#allocation2 + $0x18] sm:$0xff] %v7179_v33  ;;  %v2409_v57 = vmul.f32 1.442695, %v2393_v31  ;;  %v2531_v33 = vld [vmem:[#allocation4 + $0x10] sm:$0xff] }
 0x72c   : > { %v2310_v12 = vpop.xlane.xlu1 %2309 }
 0x72d   : > { %v2346_v54 = vsub.f32 %v7171_v28, %v7184_v30  ;;  %v2394_v32 = vsub.f32 %v7078_v1, %v7184_v30  ;;  %2739 = vst [vmem:[#allocation2] sm:$0xff] %v7184_v30  ;;  %v7199_v36 = vmax.f32 %v7181_v62, %v2310_v12  ;;  %v2415_v27 = vmul.f32 1.442695, %v2396_v63 }
 0x72e   : > { %4729 = vpow2.f32 %v2409_v57 }
 0x72f   : > { %v2411_v9 = vmul.f32 1.442695, %v2394_v32  ;;  %2744 = vst [vmem:[#allocation2 + $0x30] sm:$0xff] %v7199_v36  ;;  %4731 = vpow2.f32 %v2415_v27  ;;  %v2399_v60 = vsub.f32 %v7081_v10, %v7199_v36  ;;  %v7261_v27 = vld [vmem:[#allocation2 + $0x60] sm:$0xff]  ;;  %v8183_v22 = vsub.f32 %v7181_v62, %v7199_v36 }
 0x730   : > { %v2306_v53 = vpop.xlane.xlu1 %2305 }
 0x731   : > { %v7207_v16 = vmax.f32 %v7201_v43, %v2306_v53  ;;  %4733 = vpow2.f32 %v2411_v9  ;;  %v7331_v9 = vld [vmem:[#allocation2 + $0xb8] sm:$0xff]  ;;  %v2373_v11 = vmul.f32 1.442695, %v8183_v22 }
 0x732   : > { %4735 = vpow2.f32 %v2413_v55  ;;  %v2832_v55 = vsel %vm2119_vm3, %v7064_v26, 0  ;;  %v7281_v26 = vld [vmem:[#allocation2 + $0xf0] sm:$0xff] }
 0x733   : > { %2742 = vst [vmem:[#allocation2 + $0x50] sm:$0xff] %v7207_v16  ;;  %v2397_v51 = vsub.f32 %v7084_v56, %v7207_v16  ;;  %v8184_v29 = vsub.f32 %v7201_v43, %v7207_v16  ;;  %v2532_v16 = vld [vmem:[#allocation4 + $0x18] sm:$0xff] }
 0x734   : > { %v2312_v38 = vpop.xlane.xlu1 %2311 }
 0x735   : > { %v7215_v59 = vmax.f32 %v7209_v24, %v2312_v38  ;;  %v2417_v49 = vmul.f32 1.442695, %v2397_v51  ;;  %v7273_v51 = vld [vmem:[#allocation2 + $0x78] sm:$0xff] }
 0x737   : > { %v2400_v2 = vsub.f32 %v7086_v20, %v7215_v59  ;;  %2745 = vst [vmem:[#allocation2 + $0x48] sm:$0xff] %v7215_v59  ;;  %v2421_v20 = vmul.f32 1.442695, %v2399_v60  ;;  %4737 = vpow2.f32 %v2417_v49  ;;  %v8185_v48 = vsub.f32 %v7209_v24, %v7215_v59 }
 0x738   : > { %v2308_v42 = vpop.xlane.xlu1 %2307 }
 0x739   : > { %v7229_v34 = vmax.f32 %v7219_v50, %v2308_v42  ;;  %v2423_v41 = vmul.f32 1.442695, %v2400_v2 }
 0x73b   : > { %v2398_v1 = vsub.f32 %v7089_v23, %v7229_v34  ;;  %2743 = vst [vmem:[#allocation2 + $0x68] sm:$0xff] %v7229_v34  ;;  %v7241_v4 = vpop.eup %4729  ;;  %4739 = vpow2.f32 %v2423_v41  ;;  %v7312_v41 = vld [vmem:[#allocation2 + $0xe8] sm:$0xff]  ;;  %v8186_v30 = vsub.f32 %v7219_v50, %v7229_v34 }
 0x73c   : > { %v2316_v56 = vpop.xlane.xlu1 %2315  ;;  %v7245_v31 = vpop.eup %4731 }
 0x73d   : > { %v2419_v0 = vmul.f32 1.442695, %v2398_v1  ;;  %v7239_v10 = vmax.f32 %v7231_v25, %v2316_v56  ;;  %v2829_v56 = vsel %vm2119_vm3, %v7152_v8, 0  ;;  %v2371_v62 = vmul.f32 1.442695, %v8186_v30 }
 0x73e   : > { %v7250_v23 = vpop.eup %4733 }
 0x73f   : > { %2747 = vst [vmem:[#allocation2 + $0x88] sm:$0xff] %v7239_v10  ;;  %4741 = vpow2.f32 %v2419_v0  ;;  %v7252_v63 = vpop.eup %4735  ;;  %v2473_v57 = vpack.c.bf16 %v7250_v23, %v7241_v4 }
 0x740   : > { %v2326_v58 = vpop.xlane.xlu1 %2325  ;;  %4743 = vpow2.f32 %v2421_v20  ;;  %v2474_v32 = vpack.c.bf16 %v7245_v31, %v7252_v63 }
 0x741   : > { %v7255_v12 = vmax.f32 %v7243_v61, %v2326_v58  ;;  %4268 = vmatprep.mubr.bf16.mxu1 %v2473_v57 }
 0x742   : > { %4269 = vmatmul.mubr.bf16.vlgmr.msra.gmra.mxu1 %v2474_v32 }
 0x743   : > { %2752 = vst [vmem:[#allocation2 + $0x8] sm:$0xff] %v7255_v12  ;;  %4285 = vmatpush3.bf16.xpose.msra.mxu1 %v2832_v55 }
 0x744   : > { %v2322_v53 = vpop.xlane.xlu1 %2321  ;;  %4373 = vmatprep.subr.msk.bf16.mxu1 %vm2119_vm3, %v7152_v8  ;;  %v7283_v49 = vpop.eup %4737 }
 0x745   : > { %v7269_v38 = vmax.f32 %v7261_v27, %v2322_v53  ;;  %v2826_v53 = vsel %vm2119_vm3, %v7154_v35, 0 }
 0x747   : > { %2750 = vst [vmem:[#allocation2 + $0x60] sm:$0xff] %v7269_v38  ;;  %v2405_v7 = vsub.f32 %v7107_v14, %v7269_v38 }
 0x748   : > { %v2328_v42 = vpop.xlane.xlu1 %2327  ;;  %v7288_v1 = vpop.eup %4739 }
 0x749   : > { %v7279_v60 = vmax.f32 %v7273_v51, %v2328_v42  ;;  %v2779_v42 = vpop.permute.xlu0 %2778  ;;  %v2433_v18 = vmul.f32 1.442695, %v2405_v7 }
 0x74b   : > { %2753 = vst [vmem:[#allocation2 + $0x78] sm:$0xff] %v7279_v60  ;;  %4287 = vmatpush3.bf16.xpose.msra.mxu1 %v2829_v56 }
 0x74c   : > { %v2324_v20 = vpop.xlane.xlu1 %2323  ;;  %v7292_v0 = vpop.eup %4741  ;;  %4374 = vmatprep.subr.msk.bf16.mxu1 %vm2119_vm3, %v7154_v35  ;;  %v2402_v35 = vsub.f32 %v7099_v44, %v7239_v10 }
 0x74d   : > { %v7295_v58 = vmax.f32 %v7281_v26, %v2324_v20  ;;  %v7297_v57 = vpop.eup %4743  ;;  %v2475_v32 = vpack.c.bf16 %v7292_v0, %v7283_v49  ;;  %v2823_v20 = vsel %vm2119_vm3, %v2779_v42, 0 }
 0x74e   : > { %v2476_v8 = vpack.c.bf16 %v7288_v1, %v7297_v57  ;;  %v2427_v40 = vmul.f32 1.442695, %v2402_v35 }
 0x74f   : > { %2751 = vst [vmem:[#allocation2 + $0xf0] sm:$0xff] %v7295_v58  ;;  %4272 = vmatprep.mubr.bf16.mxu1 %v2475_v32  ;;  %v7318_v32 = vld [vmem:[#allocation2 + $0x80] sm:$0xff] }
 0x750   : > { %4273 = vmatmul.mubr.bf16.gmra.mxu1 %v2476_v8  ;;  %v2777_v56 = vpop.permute.xlu1 %2776  ;;  %4745 = vpow2.f32 %v2427_v40  ;;  %v2408_v40 = vsub.f32 %v7110_v46, %v7279_v60 }
 0x752   : > { %v2439_v7 = vmul.f32 1.442695, %v2408_v40 }
 0x753   : > { %4289 = vmatpush3.bf16.xpose.msra.mxu1 %v2826_v53  ;;  %v2820_v53 = vsel %vm2119_vm3, %v2777_v56, 0 }
 0x754   : > { %4375 = vmatprep.subr.msk.bf16.mxu1 %vm2119_vm3, %v2779_v42 }
 0x75b   : > { %4291 = vmatpush3.bf16.xpose.msra.mxu1 %v2823_v20 }
 0x75c   : > { %4376 = vmatprep.subr.msk.bf16.mxu1 %vm2119_vm3, %v2777_v56 }
 0x75d   : > { %v7359_v46 = vpop.eup %4745 }
 0x75f   : > { %v2318_v55 = vpop.xlane.xlu0 %2317 }
 0x760   : > { %v7316_v2 = vmax.f32 %v7312_v41, %v2318_v55  ;;  %v2406_v55 = vsub.f32 %v7113_v15, %v7295_v58 }
 0x762   : > { %2748 = vst [vmem:[#allocation2 + $0xe8] sm:$0xff] %v7316_v2  ;;  %v2403_v44 = vsub.f32 %v7091_v52, %v7316_v2  ;;  %v2435_v35 = vmul.f32 1.442695, %v2406_v55  ;;  %v2407_v55 = vsub.f32 %v7102_v19, %v7255_v12 }
 0x763   : > { %v2314_v42 = vpop.xlane.xlu0 %2313  ;;  %4293 = vmatpush3.bf16.xpose.msra.mxu1 %v2820_v53 }
 0x764   : > { %v7327_v20 = vmax.f32 %v7318_v32, %v2314_v42  ;;  %v2429_v53 = vmul.f32 1.442695, %v2403_v44  ;;  %v2437_v44 = vmul.f32 1.442695, %v2407_v55 }
 0x766   : > { %v2401_v56 = vsub.f32 %v7094_v3, %v7327_v20  ;;  %2746 = vst [vmem:[#allocation2 + $0x80] sm:$0xff] %v7327_v20 }
 0x767   : > { %v2320_v42 = vpop.xlane.xlu0 %2319 }
 0x768   : > { %v2425_v15 = vmul.f32 1.442695, %v2401_v56  ;;  %v7343_v39 = vmax.f32 %v7331_v9, %v2320_v42 }
 0x76a   : > { %v2356_v52 = vsub.f32 %v7331_v9, %v7343_v39  ;;  %v2404_v8 = vsub.f32 %v7096_v13, %v7343_v39  ;;  %2749 = vst [vmem:[#allocation2 + $0xb8] sm:$0xff] %v7343_v39  ;;  %4747 = vpow2.f32 %v2425_v15  ;;  %v8192_v39 = vsub.f32 %v7273_v51, %v7279_v60  ;;  %v2540_v51 = vld [vmem:[#allocation4 + $0x58] sm:$0xff] }
 0x76b   : > { %v2775_v3 = vpop.permute.xlu0 %2774  ;;  %4749 = vpow2.f32 %v2435_v35 }
 0x76c   : > { %v2431_v5 = vmul.f32 1.442695, %v2404_v8  ;;  %v2817_v14 = vsel %vm2119_vm3, %v2775_v3, 0  ;;  %4377 = vmatprep.subr.msk.bf16.mxu1 %vm2119_vm3, %v2775_v3  ;;  %4751 = vpow2.f32 %v2429_v53  ;;  %v2391_v9 = vmul.f32 1.442695, %v8192_v39 }
 0x76d   : > { %4295 = vmatpush3.bf16.xpose.msra.mxu1 %v2817_v14 }
 0x76e   : > { %4753 = vpow2.f32 %v2431_v5 }
 0x76f   : > { %v2773_v13 = vpop.permute.xlu0 %2772  ;;  %4755 = vpow2.f32 %v2433_v18 }
 0x770   : > { %4378 = vmatprep.subr.msk.bf16.mxu1 %vm2119_vm3, %v2773_v13  ;;  %v2814_v8 = vsel %vm2119_vm3, %v2773_v13, 0  ;;  %4757 = vpow2.f32 %v2439_v7 }
 0x771   : > { %4759 = vpow2.f32 %v2437_v44 }
 0x773   : > { %v2771_v56 = vpop.permute.xlu0 %2770 }
 0x774   : > { %v2811_v18 = vsel %vm2119_vm3, %v2771_v56, 0 }
 0x775   : > { %4297 = vmatpush3.bf16.xpose.msra.mxu1 %v2814_v8  ;;  %v2757_v8 = vpop.permute.xlu1 %2756 }
 0x776   : > { %4379 = vmatprep.subr.msk.bf16.mxu1 %vm2119_vm3, %v2771_v56 }
 0x777   : > { %v7361_v42 = vpop.eup %4747  ;;  %v2755_v7 = vpop.permute.xlu0 %2754 }
 0x778   : > { %v2477_v19 = vpack.c.bf16 %v7359_v46, %v7361_v42  ;;  %v7365_v5 = vpop.eup %4749 }
 0x779   : > { %v7368_v15 = vpop.eup %4751  ;;  %v2761_v56 = vpop.permute.xlu1 %2760 }
 0x77a   : > { %4276 = vmatprep.mubr.bf16.mxu1 %v2477_v19 }
 0x77b   : > { %v7370_v35 = vpop.eup %4753  ;;  %v2759_v44 = vpop.permute.xlu0 %2758 }
 0x77c   : > { %v7372_v53 = vpop.eup %4755  ;;  %v2478_v3 = vpack.c.bf16 %v7370_v35, %v7368_v15 }
 0x77d   : > { %4299 = vmatpush3.bf16.xpose.msra.mxu1 %v2811_v18  ;;  %v2479_v14 = vpack.c.bf16 %v7365_v5, %v7372_v53  ;;  %v7378_v40 = vpop.eup %4757  ;;  %v2765_v18 = vpop.permute.xlu1 %2764 }
 0x77e   : > { %4277 = vmatmul.mubr.bf16.gmra.mxu1 %v2478_v3  ;;  %v7380_v55 = vpop.eup %4759 }
 0x77f   : > { %4280 = vmatprep.mubr.bf16.mxu1 %v2479_v14  ;;  %v2480_v13 = vpack.c.bf16 %v7378_v40, %v7380_v55  ;;  %v2763_v19 = vpop.permute.xlu0 %2762 }
 0x781   : > { %v2769_v14 = vpop.permute.xlu1 %2768 }
 0x783   : > { %v2767_v3 = vpop.permute.xlu0 %2766 }
 0x786   : > { %4281 = vmatmul.mubr.bf16.gmra.mxu1 %v2480_v13  ;;  %v2365_v13 = vmul.f32 1.442695, %v2347_v21  ;;  %v2369_v21 = vmul.f32 1.442695, %v8184_v29 }
 0x787   : > { %4300 = vmatprep.mubr.msk.bf16.mxu1 %vm2119_vm3, %v2755_v7  ;;  %v2361_v7 = vmul.f32 1.442695, %v2345_v6  ;;  %v2375_v6 = vmul.f32 1.442695, %v8185_v48 }
 0x788   : > { %4761 = vpow2.f32 %v2365_v13 }
 0x789   : > { %4763 = vpow2.f32 %v2361_v7 }
 0x78e   : > { %4301 = vmatmul.mubr.msk.bf16.vlgmr.msra.gmra.mxu1 %vm2119_vm3, %v2757_v8  ;;  %v2367_v8 = vmul.f32 1.442695, %v2348_v47  ;;  %v2529_v47 = vld [vmem:[#allocation4] sm:$0xff] }
 0x78f   : > { %4304 = vmatprep.mubr.msk.bf16.mxu1 %vm2119_vm3, %v2759_v44  ;;  %v2363_v44 = vmul.f32 1.442695, %v2346_v54 }
 0x790   : > { %4765 = vpow2.f32 %v2367_v8 }
 0x791   : > { %4767 = vpow2.f32 %v2363_v44 }
 0x792   : > { %4769 = vpow2.f32 %v2373_v11 }
 0x793   : > { %4771 = vpow2.f32 %v2369_v21  ;;  %v2535_v21 = vld [vmem:[#allocation4 + $0x30] sm:$0xff] }
 0x794   : > { %4773 = vpow2.f32 %v2375_v6 }
 0x795   : > { %v7410_v17 = vpop.eup %4761  ;;  %4775 = vpow2.f32 %v2371_v62 }
 0x796   : > { %4305 = vmatmul.mubr.msk.bf16.gmra.mxu1 %vm2119_vm3, %v2761_v56  ;;  %v7415_v28 = vpop.eup %4763  ;;  %v2547_v54 = vmul.f32 %v7410_v17, %v2531_v33  ;;  %v2533_v33 = vld [vmem:[#allocation4 + $0x20] sm:$0xff] }
 0x797   : > { %4308 = vmatprep.mubr.msk.bf16.mxu1 %vm2119_vm3, %v2763_v19  ;;  %v2545_v24 = vmul.f32 %v7415_v28, %v2529_v47 }
 0x79d   : > { %v7421_v36 = vpop.eup %4765 }
 0x79e   : > { %4309 = vmatmul.mubr.msk.bf16.gmra.mxu1 %vm2119_vm3, %v2765_v18  ;;  %v7424_v59 = vpop.eup %4767  ;;  %v2530_v18 = vld [vmem:[#allocation4 + $0x8] sm:$0xff]  ;;  %v2548_v34 = vmul.f32 %v7421_v36, %v2532_v16 }
 0x79f   : > { %4312 = vmatprep.mubr.msk.bf16.mxu1 %vm2119_vm3, %v2767_v3  ;;  %v3245_v3 = vpop.permute.xlu0 %3244  ;;  %v2546_v8 = vmul.f32 %v7424_v59, %v2530_v18  ;;  %v7431_v29 = vpop.eup %4769  ;;  %v2534_v18 = vld [vmem:[#allocation4 + $0x28] sm:$0xff] }
 0x7a0   : > { %4316 = vmatprep.subr.bf16.mxu0 %v3245_v3  ;;  %v7434_v6 = vpop.eup %4771  ;;  %v2551_v30 = vmul.f32 %v7431_v29, %v2535_v21  ;;  %v8188_v21 = vsub.f32 %v7318_v32, %v7327_v20  ;;  %v8191_v32 = vsub.f32 %v7261_v27, %v7269_v38 }
 0x7a1   : > { %4317 = vmatpush3.bf16.msra.mxu0 %v3245_v3  ;;  %v7437_v62 = vpop.eup %4773  ;;  %v2549_v16 = vmul.f32 %v7434_v6, %v2533_v33  ;;  %v2383_v33 = vmul.f32 1.442695, %v2356_v52 }
 0x7a2   : > { %v2385_v20 = vmul.f32 1.442695, %v8191_v32  ;;  %v2542_v32 = vld [vmem:[#allocation4 + $0x68] sm:$0xff] }
 0x7a3   : > { %v3241_v22 = vpop.permute.xlu0 %3240 }
 0x7a6   : > { %4313 = vmatmul.mubr.msk.bf16.gmra.mxu1 %vm2119_vm3, %v2769_v14  ;;  %v3243_v14 = vpop.permute.xlu1 %3242 }
 0x7a7   : > { %4318 = vmatprep.subr.bf16.mxu0 %v3243_v14 }
 0x7a8   : > { %4319 = vmatpush3.bf16.msra.mxu0 %v3243_v14 }
 0x7a9   : > { %4320 = vmatprep.subr.bf16.mxu0 %v3241_v22 }
 0x7aa   : > { %v3239_v48 = vpop.permute.xlu1 %3238 }
 0x7ac   : > { %4321 = vmatpush3.bf16.msra.mxu0 %v3241_v22  ;;  %v8187_v22 = vsub.f32 %v7312_v41, %v7316_v2  ;;  %v8190_v2 = vsub.f32 %v7243_v61, %v7255_v12  ;;  %v2539_v61 = vld [vmem:[#allocation4 + $0x50] sm:$0xff] }
 0x7ad   : > { %4322 = vmatprep.subr.bf16.mxu0 %v3239_v48 }
 0x7ae   : > { %v2389_v41 = vmul.f32 1.442695, %v8190_v2 }
 0x7b0   : > { %4323 = vmatpush3.bf16.msra.mxu0 %v3239_v48  ;;  %v2377_v48 = vmul.f32 1.442695, %v8188_v21 }
 0x802   : > { %v4270_v43 = vpop.f32.mrf.mxu1 }
 0x803   : > { %v2708_v56 = vadd.f32 %v4270_v43, %v2547_v54  ;;  %v2536_v54 = vld [vmem:[#allocation4 + $0x38] sm:$0xff] }
 0x804   : > { %v2643_v19 = vpop.f32.mrf.mxu1 }
 0x805   : > { %2724 = vst.msk [vmem:[#allocation4 + $0x10] sm:$0xff] %vm2119_vm3, %v2708_v56  ;;  %v2706_v50 = vadd.f32 %v2643_v19, %v2545_v24  ;;  %v3237_v56 = vpop.permute.xlu0 %3236  ;;  %v7440_v24 = vpop.eup %4775 }
 0x806   : > { %v4271_v13 = vpop.f32.mrf.mxu1  ;;  %4324 = vmatprep.subr.bf16.mxu0 %v3237_v56 }
 0x807   : > { %2722 = vst.msk [vmem:[#allocation4] sm:$0xff] %vm2119_vm3, %v2706_v50  ;;  %v2709_v7 = vadd.f32 %v4271_v13, %v2548_v34  ;;  %v2552_v50 = vmul.f32 %v7437_v62, %v2536_v54  ;;  %v2550_v13 = vmul.f32 %v7440_v24, %v2534_v18  ;;  %4325 = vmatpush3.bf16.msra.mxu0 %v3237_v56  ;;  %v2537_v54 = vld [vmem:[#allocation4 + $0x40] sm:$0xff] }
 0x808   : > { %v2646_v44 = vpop.f32.mrf.mxu1 }
 0x809   : > { %2725 = vst.msk [vmem:[#allocation4 + $0x18] sm:$0xff] %vm2119_vm3, %v2709_v7  ;;  %v2707_v11 = vadd.f32 %v2646_v44, %v2546_v8  ;;  %v3235_v44 = vpop.permute.xlu1 %3234 }
 0x80a   : > { %4326 = vmatprep.subr.bf16.mxu0 %v3235_v44 }
 0x80b   : > { %2723 = vst.msk [vmem:[#allocation4 + $0x8] sm:$0xff] %vm2119_vm3, %v2707_v11  ;;  %v2381_v11 = vmul.f32 1.442695, %v8187_v22  ;;  %4327 = vmatpush3.bf16.msra.mxu0 %v3235_v44  ;;  %v2541_v44 = vld [vmem:[#allocation4 + $0x60] sm:$0xff] }
 0x80d   : > { %4777 = vpow2.f32 %v2381_v11 }
 0x80e   : > { %4779 = vpow2.f32 %v2377_v48 }
 0x80f   : > { %4781 = vpow2.f32 %v2383_v33  ;;  %v2544_v33 = vld [vmem:[#allocation4 + $0x78] sm:$0xff] }
 0x810   : > { %v4274_v47 = vpop.f32.mrf.mxu1 }
 0x811   : > { %v2712_v43 = vadd.f32 %v4274_v47, %v2551_v30  ;;  %v8189_v30 = vsub.f32 %v7231_v25, %v7239_v10  ;;  %v8193_v25 = vsub.f32 %v7281_v26, %v7295_v58  ;;  %v2538_v58 = vld [vmem:[#allocation4 + $0x48] sm:$0xff] }
 0x812   : > { %v2659_v19 = vpop.f32.mrf.mxu1 }
 0x813   : > { %2728 = vst.msk [vmem:[#allocation4 + $0x30] sm:$0xff] %vm2119_vm3, %v2712_v43  ;;  %v2710_v3 = vadd.f32 %v2659_v19, %v2549_v16  ;;  %v2379_v47 = vmul.f32 1.442695, %v8189_v30  ;;  %v2387_v10 = vmul.f32 1.442695, %v8193_v25 }
 0x814   : > { %v4275_v34 = vpop.f32.mrf.mxu1 }
 0x815   : > { %2726 = vst.msk [vmem:[#allocation4 + $0x20] sm:$0xff] %vm2119_vm3, %v2710_v3  ;;  %v2713_v14 = vadd.f32 %v4275_v34, %v2552_v50  ;;  %4783 = vpow2.f32 %v2379_v47  ;;  %v2543_v34 = vld [vmem:[#allocation4 + $0x70] sm:$0xff] }
 0x816   : > { %v2662_v7 = vpop.f32.mrf.mxu1  ;;  %4785 = vpow2.f32 %v2389_v41 }
 0x817   : > { %2729 = vst.msk [vmem:[#allocation4 + $0x38] sm:$0xff] %vm2119_vm3, %v2713_v14  ;;  %v2711_v8 = vadd.f32 %v2662_v7, %v2550_v13  ;;  %4787 = vpow2.f32 %v2385_v20 }
 0x818   : > { %4789 = vpow2.f32 %v2391_v9 }
 0x819   : > { %2727 = vst.msk [vmem:[#allocation4 + $0x28] sm:$0xff] %vm2119_vm3, %v2711_v8  ;;  %4791 = vpow2.f32 %v2387_v10 }
 0x81a   : > { %v7472_v52 = vpop.eup %4777 }
 0x81b   : > { %v7474_v12 = vpop.eup %4779  ;;  %v2555_v27 = vmul.f32 %v7472_v52, %v2539_v61 }
 0x81c   : > { %v7477_v38 = vpop.eup %4781  ;;  %v2553_v16 = vmul.f32 %v7474_v12, %v2537_v54 }
 0x81d   : > { %v2556_v18 = vmul.f32 %v7477_v38, %v2540_v51 }
 0x822   : > { %v7480_v56 = vpop.eup %4783 }
 0x823   : > { %v7484_v3 = vpop.eup %4785  ;;  %v2554_v13 = vmul.f32 %v7480_v56, %v2538_v58 }
 0x824   : > { %v7488_v7 = vpop.eup %4787  ;;  %v2559_v11 = vmul.f32 %v7484_v3, %v2543_v34 }
 0x825   : > { %v7492_v21 = vpop.eup %4789  ;;  %v2557_v47 = vmul.f32 %v7488_v7, %v2541_v44 }
 0x826   : > { %v7496_v2 = vpop.eup %4791  ;;  %v2560_v39 = vmul.f32 %v7492_v21, %v2544_v33 }
 0x827   : > { %v2558_v10 = vmul.f32 %v7496_v2, %v2542_v32 }
 0x83e   : > { %v4278_v43 = vpop.f32.mrf.mxu1 }
 0x83f   : > { %v2716_v60 = vadd.f32 %v4278_v43, %v2555_v27 }
 0x840   : > { %v2675_v26 = vpop.f32.mrf.mxu1 }
 0x841   : > { %2732 = vst.msk [vmem:[#allocation4 + $0x50] sm:$0xff] %vm2119_vm3, %v2716_v60  ;;  %v2714_v19 = vadd.f32 %v2675_v26, %v2553_v16 }
 0x842   : > { %v4279_v50 = vpop.f32.mrf.mxu1 }
 0x843   : > { %2730 = vst.msk [vmem:[#allocation4 + $0x40] sm:$0xff] %vm2119_vm3, %v2714_v19  ;;  %v2717_v14 = vadd.f32 %v4279_v50, %v2556_v18 }
 0x844   : > { %v2678_v8 = vpop.f32.mrf.mxu1 }
 0x845   : > { %2733 = vst.msk [vmem:[#allocation4 + $0x58] sm:$0xff] %vm2119_vm3, %v2717_v14  ;;  %v2715_v22 = vadd.f32 %v2678_v8, %v2554_v13 }
 0x846   : > { %v4282_v48 = vpop.f32.mrf.mxu1 }
 0x847   : > { %2731 = vst.msk [vmem:[#allocation4 + $0x48] sm:$0xff] %vm2119_vm3, %v2715_v22  ;;  %v2720_v30 = vadd.f32 %v4282_v48, %v2559_v11 }
 0x848   : > { %v2691_v41 = vpop.f32.mrf.mxu1 }
 0x849   : > { %2736 = vst.msk [vmem:[#allocation4 + $0x70] sm:$0xff] %vm2119_vm3, %v2720_v30  ;;  %v2718_v20 = vadd.f32 %v2691_v41, %v2557_v47  ;;  %v7605_v47 = vld [vmem:[#allocation2 + $0x70] sm:$0xff] }
 0x84a   : > { %v4283_v9 = vpop.f32.mrf.mxu1 }
 0x84b   : > { %2734 = vst.msk [vmem:[#allocation4 + $0x60] sm:$0xff] %vm2119_vm3, %v2718_v20  ;;  %v2721_v25 = vadd.f32 %v4283_v9, %v2560_v39  ;;  %v7698_v20 = vld [vmem:[#allocation2 + $0x98] sm:$0xff] }
 0x84c   : > { %v2694_v61 = vpop.f32.mrf.mxu1  ;;  %8195 = vst [vmem:[#allocation56_spill] sm:$0xff] %v7698_v20 }
 0x84d   : > { %2737 = vst.msk [vmem:[#allocation4 + $0x78] sm:$0xff] %vm2119_vm3, %v2721_v25  ;;  %v2719_v54 = vadd.f32 %v2694_v61, %v2558_v10  ;;  %v7621_v61 = vld [vmem:[#allocation2 + $0xc0] sm:$0xff] }
 0x84e   : > { %v4302_v27 = vpop.f32.mrf.mxu1 }
 0x84f   : > { %2735 = vst.msk [vmem:[#allocation4 + $0x68] sm:$0xff] %vm2119_vm3, %v2719_v54  ;;  %2969 = vmax.xlane.f32.xlu0 %v4302_v27 }
 0x850   : > { %v7504_v43 = vpop.f32.mrf.mxu1 }
 0x852   : > { %v7506_v51 = vpop.f32.mrf.mxu1 }
 0x853   : > { %2965 = vmax.xlane.f32.xlu0 %v7504_v43 }
 0x854   : > { %v7509_v60 = vpop.f32.mrf.mxu1 }
 0x855   : > { %2967 = vmax.xlane.f32.xlu1 %v7509_v60 }
 0x856   : > { %v7512_v16 = vpop.f32.mrf.mxu1 }
 0x857   : > { %2971 = vmax.xlane.f32.xlu0 %v7506_v51 }
 0x858   : > { %v7515_v26 = vpop.f32.mrf.mxu1 }
 0x859   : > { %2973 = vmax.xlane.f32.xlu1 %v7515_v26 }
 0x85a   : > { %v7518_v58 = vpop.f32.mrf.mxu1 }
 0x85b   : > { %2977 = vmax.xlane.f32.xlu0 %v7512_v16 }
 0x85c   : > { %v7521_v19 = vpop.f32.mrf.mxu1 }
 0x85d   : > { %2979 = vmax.xlane.f32.xlu1 %v7518_v58 }
 0x85e   : > { %v7524_v18 = vpop.f32.mrf.mxu1 }
 0x85f   : > { %2975 = vmax.xlane.f32.xlu0 %v7521_v19 }
 0x860   : > { %v7527_v50 = vpop.f32.mrf.mxu1 }
 0x861   : > { %2981 = vmax.xlane.f32.xlu1 %v7527_v50 }
 0x862   : > { %v7530_v34 = vpop.f32.mrf.mxu1 }
 0x863   : > { %2985 = vmax.xlane.f32.xlu0 %v7524_v18 }
 0x864   : > { %v7533_v14 = vpop.f32.mrf.mxu1 }
 0x865   : > { %2987 = vmax.xlane.f32.xlu1 %v7530_v34 }
 0x866   : > { %v7536_v13 = vpop.f32.mrf.mxu1 }
 0x867   : > { %2983 = vmax.xlane.f32.xlu0 %v7533_v14 }
 0x868   : > { %v7539_v8 = vpop.f32.mrf.mxu1 }
 0x869   : > { %2989 = vmax.xlane.f32.xlu1 %v7539_v8 }
 0x86a   : > { %v7542_v44 = vpop.f32.mrf.mxu1 }
 0x86b   : > { %2993 = vmax.xlane.f32.xlu0 %v7536_v13 }
 0x86c   : > { %v7546_v22 = vpop.f32.mrf.mxu1 }
 0x86d   : > { %2995 = vmax.xlane.f32.xlu1 %v7542_v44 }
 0x86f   : > { %2991 = vmax.xlane.f32.xlu0 %v7546_v22 }
 0x87e   : > { %3230 = vrot.lane.b32.xlu1 %v7060_v45, %s5241_s27 }
 0x885   : > { %3232 = vrot.lane.b32.xlu0 %v7056_v37, %s5241_s27  ;;  %v7569_v37 = vld [vmem:[#allocation2 + $0x40] sm:$0xff] }
 0x8a2   : > { %2441 = vadd.xlane.f32.xlu1 %v7241_v4 }
 0x8a4   : > { %2443 = vadd.xlane.f32.xlu0 %v7250_v23 }
 0x8a6   : > { %2447 = vadd.xlane.f32.xlu1 %v7245_v31  ;;  %v7574_v31 = vld [vmem:[#allocation2 + $0x38] sm:$0xff] }
 0x8a8   : > { %2445 = vadd.xlane.f32.xlu0 %v7252_v63 }
 0x8aa   : > { %2451 = vadd.xlane.f32.xlu1 %v7292_v0 }
 0x8ac   : > { %2449 = vadd.xlane.f32.xlu0 %v7283_v49 }
 0x8ae   : > { %2455 = vadd.xlane.f32.xlu1 %v7288_v1  ;;  %v7580_v1 = vld [vmem:[#allocation2 + $0x58] sm:$0xff] }
 0x8b0   : > { %2453 = vadd.xlane.f32.xlu0 %v7297_v57 }
 0x8b2   : > { %2459 = vadd.xlane.f32.xlu1 %v7359_v46 }
 0x8b4   : > { %2457 = vadd.xlane.f32.xlu0 %v7361_v42 }
 0x8b6   : > { %2463 = vadd.xlane.f32.xlu1 %v7370_v35  ;;  %v7593_v35 = vld [vmem:[#allocation2 + $0xc8] sm:$0xff] }
 0x8b8   : > { %2461 = vadd.xlane.f32.xlu0 %v7368_v15 }
 0x8ba   : > { %2467 = vadd.xlane.f32.xlu1 %v7365_v5 }
 0x8bc   : > { %2465 = vadd.xlane.f32.xlu0 %v7372_v53 }
 0x8be   : > { %2471 = vadd.xlane.f32.xlu1 %v7378_v40  ;;  %v7595_v40 = vld [vmem:[#allocation2 + $0xe0] sm:$0xff] }
 0x8c0   : > { %2469 = vadd.xlane.f32.xlu0 %v7380_v55 }
 0x8d8   : > { %v2970_v45 = vpop.xlane.xlu0 %2969 }
 0x8d9   : > { %v7572_v4 = vmax.f32 %v7569_v37, %v2970_v45 }
 0x8db   : > { %v3063_v63 = vsub.f32 %v4302_v27, %v7572_v4  ;;  %3385 = vst [vmem:[#allocation2 + $0x40] sm:$0xff] %v7572_v4 }
 0x8dc   : > { %v2966_v49 = vpop.xlane.xlu0 %2965 }
 0x8dd   : > { %v3081_v0 = vmul.f32 1.442695, %v3063_v63  ;;  %v7583_v57 = vmax.f32 %v7574_v31, %v2966_v49 }
 0x8de   : > { %v2968_v46 = vpop.xlane.xlu1 %2967 }
 0x8df   : > { %v3061_v5 = vsub.f32 %v7504_v43, %v7583_v57  ;;  %3383 = vst [vmem:[#allocation2 + $0x38] sm:$0xff] %v7583_v57  ;;  %v7591_v15 = vmax.f32 %v7580_v1, %v2968_v46  ;;  %4793 = vpow2.f32 %v3081_v0  ;;  %v7623_v43 = vld [vmem:[#allocation2 + $0x90] sm:$0xff]  ;;  %v7635_v0 = vld [vmem:[#allocation2 + $0xa8] sm:$0xff] }
 0x8e0   : > { %v2972_v53 = vpop.xlane.xlu0 %2971 }
 0x8e1   : > { %v3077_v55 = vmul.f32 1.442695, %v3061_v5  ;;  %v3062_v48 = vsub.f32 %v7509_v60, %v7591_v15  ;;  %3384 = vst [vmem:[#allocation2 + $0x58] sm:$0xff] %v7591_v15  ;;  %v7603_v33 = vmax.f32 %v7593_v35, %v2972_v53 }
 0x8e2   : > { %v2974_v30 = vpop.xlane.xlu1 %2973 }
 0x8e3   : > { %v3079_v41 = vmul.f32 1.442695, %v3062_v48  ;;  %v7608_v32 = vmax.f32 %v7595_v40, %v2974_v30  ;;  %4795 = vpow2.f32 %v3077_v55  ;;  %v3064_v39 = vsub.f32 %v7506_v51, %v7603_v33  ;;  %3386 = vst [vmem:[#allocation2 + $0xc8] sm:$0xff] %v7603_v33  ;;  %v7651_v30 = vld [vmem:[#allocation2 + $0x10] sm:$0xff] }
 0x8e4   : > { %v2978_v9 = vpop.xlane.xlu0 %2977 }
 0x8e5   : > { %3387 = vst [vmem:[#allocation2 + $0xe0] sm:$0xff] %v7608_v32  ;;  %v7619_v10 = vmax.f32 %v7605_v47, %v2978_v9  ;;  %4797 = vpow2.f32 %v3079_v41  ;;  %v3083_v54 = vmul.f32 1.442695, %v3064_v39  ;;  %v3065_v45 = vsub.f32 %v7515_v26, %v7608_v32 }
 0x8e6   : > { %v2980_v27 = vpop.xlane.xlu1 %2979 }
 0x8e7   : > { %v3067_v60 = vsub.f32 %v7512_v16, %v7619_v10  ;;  %3389 = vst [vmem:[#allocation2 + $0x70] sm:$0xff] %v7619_v10  ;;  %v7633_v63 = vmax.f32 %v7621_v61, %v2980_v27  ;;  %4799 = vpow2.f32 %v3083_v54  ;;  %v3085_v41 = vmul.f32 1.442695, %v3065_v45  ;;  %v7655_v54 = vld [vmem:[#allocation2 + $0x28] sm:$0xff] }
 0x8e8   : > { %v2976_v49 = vpop.xlane.xlu0 %2975 }
 0x8e9   : > { %v3089_v46 = vmul.f32 1.442695, %v3067_v60  ;;  %v7638_v5 = vmax.f32 %v7623_v43, %v2976_v49  ;;  %v3068_v16 = vsub.f32 %v7518_v58, %v7633_v63  ;;  %3390 = vst [vmem:[#allocation2 + $0xc0] sm:$0xff] %v7633_v63 }
 0x8ea   : > { %v2982_v26 = vpop.xlane.xlu1 %2981 }
 0x8eb   : > { %3388 = vst [vmem:[#allocation2 + $0x90] sm:$0xff] %v7638_v5  ;;  %v7649_v48 = vmax.f32 %v7635_v0, %v2982_v26  ;;  %v3066_v39 = vsub.f32 %v7521_v19, %v7638_v5  ;;  %4801 = vpow2.f32 %v3089_v46  ;;  %v3091_v27 = vmul.f32 1.442695, %v3068_v16  ;;  %v7666_v26 = vld [vmem:[#allocation2 + $0xd0] sm:$0xff]  ;;  %v7688_v16 = vld [vmem:[#allocation2 + $0x20] sm:$0xff] }
 0x8ec   : > { %v2986_v9 = vpop.xlane.xlu0 %2985  ;;  %v7657_v58 = vpop.eup %4793  ;;  %4803 = vpow2.f32 %v3085_v41  ;;  %8194 = vst [vmem:[#allocation55_spill] sm:$0xff] %v7688_v16 }
 0x8ed   : > { %3391 = vst [vmem:[#allocation2 + $0xa8] sm:$0xff] %v7649_v48  ;;  %v7663_v49 = vmax.f32 %v7651_v30, %v2986_v9  ;;  %3113 = vadd.xlane.f32.xlu0 %v7657_v58  ;;  %v3069_v19 = vsub.f32 %v7527_v50, %v7649_v48  ;;  %v3087_v46 = vmul.f32 1.442695, %v3066_v39  ;;  %4805 = vpow2.f32 %v3091_v27  ;;  %v7686_v39 = vld [vmem:[#allocation2 + $0xa0] sm:$0xff] }
 0x8ee   : > { %v2988_v45 = vpop.xlane.xlu1 %2987 }
 0x8ef   : > { %v7671_v55 = vmax.f32 %v7655_v54, %v2988_v45  ;;  %v3071_v9 = vsub.f32 %v7524_v18, %v7663_v49  ;;  %3393 = vst [vmem:[#allocation2 + $0x10] sm:$0xff] %v7663_v49  ;;  %v3093_v27 = vmul.f32 1.442695, %v3069_v19  ;;  %4807 = vpow2.f32 %v3087_v46 }
 0x8f0   : > { %v2984_v60 = vpop.xlane.xlu0 %2983  ;;  %v4796_v53 = vpop.eup %4795 }
 0x8f1   : > { %v3072_v50 = vsub.f32 %v7530_v34, %v7671_v55  ;;  %3394 = vst [vmem:[#allocation2 + $0x28] sm:$0xff] %v7671_v55  ;;  %v7684_v41 = vmax.f32 %v7666_v26, %v2984_v60  ;;  %v3097_v45 = vmul.f32 1.442695, %v3071_v9  ;;  %3109 = vadd.xlane.f32.xlu0 %v4796_v53 }
 0x8f2   : > { %v2990_v18 = vpop.xlane.xlu1 %2989  ;;  %v4798_v51 = vpop.eup %4797 }
 0x8f3   : > { %3392 = vst [vmem:[#allocation2 + $0xd0] sm:$0xff] %v7684_v41  ;;  %v3070_v34 = vsub.f32 %v7533_v14, %v7684_v41  ;;  %v7696_v60 = vmax.f32 %v7686_v39, %v2990_v18  ;;  %v3141_v9 = vpack.c.bf16 %v4798_v51, %v4796_v53  ;;  %4809 = vpow2.f32 %v3097_v45 }
 0x8f4   : > { %v2994_v11 = vpop.xlane.xlu0 %2993  ;;  %v3099_v42 = vmul.f32 1.442695, %v3072_v50  ;;  %v4800_v23 = vpop.eup %4799  ;;  %v7714_v50 = vld [vmem:[#allocation2 + $0xf8] sm:$0xff]  ;;  %4811 = vpow2.f32 %v3093_v27 }
 0x8f5   : > { %v7701_v19 = vmax.f32 %v7688_v16, %v2994_v11  ;;  %v3073_v46 = vsub.f32 %v7539_v8, %v7696_v60  ;;  %3395 = vst [vmem:[#allocation2 + $0xa0] sm:$0xff] %v7696_v60  ;;  %4332 = vmatprep.mubr.bf16.mxu0 %v3141_v9  ;;  %3115 = vadd.xlane.f32.xlu1 %v4800_v23  ;;  %v3095_v45 = vmul.f32 1.442695, %v3070_v34 }
 0x8f6   : > { %v2996_v14 = vpop.xlane.xlu1 %2995  ;;  %4813 = vpow2.f32 %v3099_v42 }
 0x8f7   : > { %3397 = vst [vmem:[#allocation2 + $0x20] sm:$0xff] %v7701_v19  ;;  %v7712_v11 = vmax.f32 %v7698_v20, %v2996_v14  ;;  %v3075_v8 = vsub.f32 %v7536_v13, %v7701_v19  ;;  %v3101_v9 = vmul.f32 1.442695, %v3073_v46  ;;  %4815 = vpow2.f32 %v3095_v45 }
 0x8f8   : > { %v2992_v18 = vpop.xlane.xlu0 %2991  ;;  %v4802_v53 = vpop.eup %4801 }
 0x8f9   : > { %8196 = vst [vmem:[#allocation57_spill] sm:$0xff] %v7712_v11  ;;  %3398 = vst [vmem:[#allocation2 + $0x98] sm:$0xff] %v7712_v11  ;;  %v7722_v16 = vmax.f32 %v7714_v50, %v2992_v18  ;;  %3121 = vadd.xlane.f32.xlu0 %v4802_v53  ;;  %3111 = vadd.xlane.f32.xlu1 %v4798_v51  ;;  %v3105_v27 = vmul.f32 1.442695, %v3075_v8  ;;  %v4804_v46 = vpop.eup %4803  ;;  %4817 = vpow2.f32 %v3101_v9 }
 0x8fa   : > { %v3076_v14 = vsub.f32 %v7542_v44, %v7712_v11  ;;  %v3231_v18 = vpop.permute.xlu1 %3230  ;;  %v4806_v25 = vpop.eup %4805  ;;  %v3142_v9 = vpack.c.bf16 %v4800_v23, %v7657_v58 }
 0x8fb   : > { %v3074_v13 = vsub.f32 %v7546_v22, %v7722_v16  ;;  %3396 = vst [vmem:[#allocation2 + $0xf8] sm:$0xff] %v7722_v16  ;;  %4819 = vpow2.f32 %v3105_v27 }
 0x8fc   : > { %v3233_v42 = vpop.permute.xlu0 %3232  ;;  %v4808_v45 = vpop.eup %4807  ;;  %v3107_v8 = vmul.f32 1.442695, %v3076_v14 }
 0x8fd   : > { %4328 = vmatprep.subr.bf16.mxu0 %v3233_v42  ;;  %v3103_v51 = vmul.f32 1.442695, %v3074_v13  ;;  %3117 = vadd.xlane.f32.xlu0 %v4804_v46  ;;  %v3143_v34 = vpack.c.bf16 %v4808_v45, %v4804_v46 }
 0x8fe   : > { %4329 = vmatpush3.bf16.msra.mxu0 %v3233_v42  ;;  %3123 = vadd.xlane.f32.xlu1 %v4806_v25  ;;  %v3144_v42 = vpack.c.bf16 %v4806_v25, %v4802_v53  ;;  %v2284_v53 = vld [vmem:[#allocation3 + $0x78] sm:$0xff] }
 0x8ff   : > { %4330 = vmatprep.subr.bf16.mxu0 %v3231_v18  ;;  %4821 = vpow2.f32 %v3103_v51 }
 0x900   : > { %v4810_v22 = vpop.eup %4809  ;;  %4823 = vpow2.f32 %v3107_v8  ;;  %v2282_v8 = vld [vmem:[#allocation3 + $0xc8] sm:$0xff] }
 0x901   : > { %3129 = vadd.xlane.f32.xlu0 %v4810_v22  ;;  %v4812_v44 = vpop.eup %4811 }
 0x902   : > { %4331 = vmatpush3.bf16.msra.mxu0 %v3231_v18  ;;  %3119 = vadd.xlane.f32.xlu1 %v4808_v45  ;;  %v2281_v45 = vld [vmem:[#allocation3 + $0x80] sm:$0xff] }
 0x903   : > { %v4814_v11 = vpop.eup %4813 }
 0x904   : > { %v4816_v13 = vpop.eup %4815  ;;  %v3146_v58 = vpack.c.bf16 %v4814_v11, %v4810_v22 }
 0x905   : > { %4333 = vmatmul.mubr.bf16.vlgmr.msra.gmra.mxu0 %v3142_v9  ;;  %3125 = vadd.xlane.f32.xlu0 %v4812_v44  ;;  %v3145_v14 = vpack.c.bf16 %v4816_v13, %v4812_v44  ;;  %v2481_v9 = vmul.f32 %v7415_v28, %v2281_v45 }
 0x906   : > { %4336 = vmatprep.mubr.bf16.mxu0 %v3143_v34  ;;  %3131 = vadd.xlane.f32.xlu1 %v4814_v11  ;;  %v4818_v27 = vpop.eup %4817  ;;  %v2484_v11 = vmul.f32 %v7421_v36, %v2284_v53  ;;  %v2287_v36 = vld [vmem:[#allocation3 + $0x58] sm:$0xff] }
 0x908   : > { %v4820_v51 = vpop.eup %4819 }
 0x909   : > { %3133 = vadd.xlane.f32.xlu0 %v4818_v27 }
 0x90a   : > { %3127 = vadd.xlane.f32.xlu1 %v4816_v13  ;;  %v2482_v13 = vmul.f32 %v7424_v59, %v2282_v8  ;;  %v2288_v59 = vld [vmem:[#allocation3 + $0xa8] sm:$0xff] }
 0x90c   : > { %v4822_v18 = vpop.eup %4821 }
 0x90d   : > { %4337 = vmatmul.mubr.bf16.gmra.mxu0 %v3144_v42  ;;  %3137 = vadd.xlane.f32.xlu0 %v4820_v51  ;;  %v4824_v23 = vpop.eup %4823  ;;  %v3147_v46 = vpack.c.bf16 %v4822_v18, %v4818_v27  ;;  %v2286_v27 = vld [vmem:[#allocation3 + $0x90] sm:$0xff] }
 0x90e   : > { %4340 = vmatprep.mubr.bf16.mxu0 %v3145_v14  ;;  %3135 = vadd.xlane.f32.xlu1 %v4822_v18  ;;  %v3148_v34 = vpack.c.bf16 %v4824_v23, %v4820_v51  ;;  %v2283_v14 = vld [vmem:[#allocation3 + $0xe8] sm:$0xff] }
 0x90f   : > { %v2483_v18 = vmul.f32 %v7410_v17, %v2283_v14  ;;  %v2290_v17 = vld [vmem:[#allocation3 + $0xb0] sm:$0xff] }
 0x912   : > { %3139 = vadd.xlane.f32.xlu1 %v4824_v23 }
 0x915   : > { %4341 = vmatmul.mubr.bf16.gmra.mxu0 %v3146_v58  ;;  %v2285_v58 = vld [vmem:[#allocation3 + $0x8] sm:$0xff] }
 0x916   : > { %4344 = vmatprep.mubr.bf16.mxu0 %v3147_v46  ;;  %v2486_v46 = vmul.f32 %v7440_v24, %v2286_v27  ;;  %v2485_v8 = vmul.f32 %v7434_v6, %v2285_v58  ;;  %v2289_v24 = vld [vmem:[#allocation3 + $0xd0] sm:$0xff]  ;;  %v2292_v6 = vld [vmem:[#allocation3 + $0x40] sm:$0xff] }
 0x917   : > { %v2492_v58 = vmul.f32 %v7477_v38, %v2292_v6  ;;  %v2295_v38 = vld [vmem:[#allocation3 + $0x18] sm:$0xff] }
 0x91d   : > { %4345 = vmatmul.mubr.bf16.gmra.mxu0 %v3148_v34 }
 0x92b   : > { %v2442_v25 = vpop.xlane.xlu1 %2441 }
 0x92c   : > { %v2497_v44 = vadd.f32 %v2481_v9, %v2442_v25 }
 0x92d   : > { %v2444_v42 = vpop.xlane.xlu0 %2443 }
 0x92e   : > { %2513 = vst [vmem:[#allocation3 + $0x80] sm:$0xff] %v2497_v44  ;;  %v2498_v20 = vadd.f32 %v2482_v13, %v2444_v42  ;;  %v2487_v13 = vmul.f32 %v7431_v29, %v2287_v36  ;;  %v2294_v29 = vld [vmem:[#allocation3 + $0x60] sm:$0xff] }
 0x92f   : > { %v2448_v22 = vpop.xlane.xlu1 %2447 }
 0x930   : > { %2514 = vst [vmem:[#allocation3 + $0xc8] sm:$0xff] %v2498_v20  ;;  %v2500_v51 = vadd.f32 %v2484_v11, %v2448_v22  ;;  %v2488_v20 = vmul.f32 %v7437_v62, %v2288_v59  ;;  %v2490_v11 = vmul.f32 %v7480_v56, %v2290_v17  ;;  %v2291_v62 = vld [vmem:[#allocation3 + $0x38] sm:$0xff]  ;;  %v2293_v56 = vld [vmem:[#allocation3 + $0xe0] sm:$0xff] }
 0x931   : > { %v2446_v23 = vpop.xlane.xlu0 %2445 }
 0x932   : > { %2516 = vst [vmem:[#allocation3 + $0x78] sm:$0xff] %v2500_v51  ;;  %v2499_v28 = vadd.f32 %v2483_v18, %v2446_v23  ;;  %v2489_v51 = vmul.f32 %v7474_v12, %v2289_v24  ;;  %v2296_v12 = vld [vmem:[#allocation3 + $0x68] sm:$0xff]  ;;  %v8197_v24 = vsub.f32 %v7569_v37, %v7572_v4  ;;  %v8202_v4 = vsub.f32 %v7595_v40, %v7608_v32 }
 0x933   : > { %v2452_v34 = vpop.xlane.xlu1 %2451  ;;  %v2496_v17 = vmul.f32 %v7492_v21, %v2296_v12  ;;  %v8199_v21 = vsub.f32 %v7593_v35, %v7603_v33  ;;  %v8203_v35 = vsub.f32 %v7621_v61, %v7633_v63  ;;  %v8205_v40 = vsub.f32 %v7651_v30, %v7663_v49  ;;  %v2952_v49 = vld [vmem:[#allocation3 + $0xa0] sm:$0xff] }
 0x934   : > { %2515 = vst [vmem:[#allocation3 + $0xe8] sm:$0xff] %v2499_v28  ;;  %v2502_v45 = vadd.f32 %v2486_v46, %v2452_v34  ;;  %v2491_v34 = vmul.f32 %v7472_v52, %v2291_v62  ;;  %v2949_v62 = vld [vmem:[#allocation3 + $0x10] sm:$0xff]  ;;  %v8206_v61 = vsub.f32 %v7635_v0, %v7649_v48  ;;  %v8209_v48 = vsub.f32 %v7686_v39, %v7696_v60  ;;  %v8210_v12 = vld [vmem:[#allocation55_spill] sm:$0xff] }
 0x935   : > { %v2450_v9 = vpop.xlane.xlu0 %2449  ;;  %v3043_v33 = vmul.f32 1.442695, %v8203_v35  ;;  %v3049_v32 = vmul.f32 1.442695, %v8205_v40  ;;  %v8212_v39 = vsub.f32 %v7714_v50, %v7722_v16 }
 0x936   : > { %2518 = vst [vmem:[#allocation3 + $0x90] sm:$0xff] %v2502_v45  ;;  %v2501_v25 = vadd.f32 %v2485_v8, %v2450_v9  ;;  %v2494_v8 = vmul.f32 %v7496_v2, %v2294_v29  ;;  %v3045_v63 = vmul.f32 1.442695, %v8206_v61 }
 0x937   : > { %v2456_v53 = vpop.xlane.xlu1 %2455  ;;  %v3055_v60 = vmul.f32 1.442695, %v8212_v39 }
 0x938   : > { %2517 = vst [vmem:[#allocation3 + $0x8] sm:$0xff] %v2501_v25  ;;  %v2504_v44 = vadd.f32 %v2488_v20, %v2456_v53  ;;  %v2493_v25 = vmul.f32 %v7488_v7, %v2293_v56  ;;  %v8198_v7 = vsub.f32 %v7574_v31, %v7583_v57  ;;  %v3037_v31 = vmul.f32 1.442695, %v8202_v4 }
 0x939   : > { %v2454_v42 = vpop.xlane.xlu0 %2453 }
 0x93a   : > { %2520 = vst [vmem:[#allocation3 + $0xa8] sm:$0xff] %v2504_v44  ;;  %v2503_v14 = vadd.f32 %v2487_v13, %v2454_v42  ;;  %v2495_v13 = vmul.f32 %v7484_v3, %v2295_v38  ;;  %v8200_v3 = vsub.f32 %v7580_v1, %v7591_v15  ;;  %v8204_v1 = vsub.f32 %v7623_v43, %v7638_v5 }
 0x93b   : > { %v2460_v22 = vpop.xlane.xlu1 %2459  ;;  %v8207_v5 = vsub.f32 %v7655_v54, %v7671_v55 }
 0x93c   : > { %2519 = vst [vmem:[#allocation3 + $0x58] sm:$0xff] %v2503_v14  ;;  %v2506_v27 = vadd.f32 %v2490_v11, %v2460_v22  ;;  %v3033_v14 = vmul.f32 1.442695, %v8197_v24  ;;  %v3029_v11 = vmul.f32 1.442695, %v8198_v7  ;;  %v8214_v24 = vld [vmem:[#allocation57_spill] sm:$0xff] }
 0x93d   : > { %v2458_v18 = vpop.xlane.xlu0 %2457  ;;  %v3035_v22 = vmul.f32 1.442695, %v8199_v21  ;;  %v3031_v6 = vmul.f32 1.442695, %v8200_v3  ;;  %v3039_v15 = vmul.f32 1.442695, %v8204_v1 }
 0x93e   : > { %2522 = vst [vmem:[#allocation3 + $0xb0] sm:$0xff] %v2506_v27  ;;  %v2505_v23 = vadd.f32 %v2489_v51, %v2458_v18  ;;  %4825 = vpow2.f32 %v3033_v14  ;;  %v8201_v27 = vsub.f32 %v7605_v47, %v7619_v10  ;;  %v2951_v51 = vld [vmem:[#allocation3 + $0x50] sm:$0xff]  ;;  %v2959_v3 = vld [vmem:[#allocation3 + $0xf8] sm:$0xff] }
 0x93f   : > { %v2464_v28 = vpop.xlane.xlu1 %2463  ;;  %4827 = vpow2.f32 %v3029_v11 }
 0x940   : > { %2521 = vst [vmem:[#allocation3 + $0xd0] sm:$0xff] %v2505_v23  ;;  %v2508_v46 = vadd.f32 %v2492_v58, %v2464_v28  ;;  %4829 = vpow2.f32 %v3035_v22  ;;  %v3041_v37 = vmul.f32 1.442695, %v8201_v27  ;;  %v3051_v58 = vmul.f32 1.442695, %v8207_v5  ;;  %v2961_v5 = vld [vmem:[#allocation3 + $0xb8] sm:$0xff] }
 0x941   : > { %v2462_v59 = vpop.xlane.xlu0 %2461  ;;  %4831 = vpow2.f32 %v3031_v6  ;;  %v2954_v6 = vld [vmem:[#allocation3 + $0x30] sm:$0xff] }
 0x942   : > { %2524 = vst [vmem:[#allocation3 + $0x40] sm:$0xff] %v2508_v46  ;;  %v2507_v45 = vadd.f32 %v2491_v34, %v2462_v59  ;;  %4833 = vpow2.f32 %v3041_v37  ;;  %v8208_v46 = vsub.f32 %v7666_v26, %v7684_v41  ;;  %v3053_v59 = vmul.f32 1.442695, %v8209_v48 }
 0x943   : > { %v2468_v9 = vpop.xlane.xlu1 %2467  ;;  %4835 = vpow2.f32 %v3037_v31  ;;  %v8211_v26 = vsub.f32 %v8210_v12, %v7701_v19 }
 0x944   : > { %2523 = vst [vmem:[#allocation3 + $0x38] sm:$0xff] %v2507_v45  ;;  %v2510_v36 = vadd.f32 %v2494_v8, %v2468_v9  ;;  %4837 = vpow2.f32 %v3043_v33  ;;  %v3047_v34 = vmul.f32 1.442695, %v8208_v46  ;;  %v2955_v45 = vld [vmem:[#allocation3 + $0x20] sm:$0xff]  ;;  %v2950_v8 = vld [vmem:[#allocation3 + $0x70] sm:$0xff] }
 0x945   : > { %v2466_v20 = vpop.xlane.xlu0 %2465  ;;  %4839 = vpow2.f32 %v3039_v15  ;;  %v3057_v41 = vmul.f32 1.442695, %v8211_v26  ;;  %v2957_v15 = vld [vmem:[#allocation3 + $0x88] sm:$0xff] }
 0x946   : > { %2526 = vst [vmem:[#allocation3 + $0x60] sm:$0xff] %v2510_v36  ;;  %v2509_v53 = vadd.f32 %v2493_v25, %v2466_v20  ;;  %4841 = vpow2.f32 %v3049_v32 }
 0x947   : > { %v2472_v44 = vpop.xlane.xlu1 %2471  ;;  %4843 = vpow2.f32 %v3045_v63 }
 0x948   : > { %2525 = vst [vmem:[#allocation3 + $0xe0] sm:$0xff] %v2509_v53  ;;  %v2512_v52 = vadd.f32 %v2496_v17, %v2472_v44  ;;  %4845 = vpow2.f32 %v3051_v58  ;;  %v2953_v44 = vld [vmem:[#allocation3 + $0xd8] sm:$0xff]  ;;  %v2958_v58 = vld [vmem:[#allocation3 + $0x48] sm:$0xff] }
 0x949   : > { %v2470_v42 = vpop.xlane.xlu0 %2469  ;;  %4847 = vpow2.f32 %v3047_v34 }
 0x94a   : > { %2528 = vst [vmem:[#allocation3 + $0x68] sm:$0xff] %v2512_v52  ;;  %v2511_v2 = vadd.f32 %v2495_v13, %v2470_v42  ;;  %4849 = vpow2.f32 %v3053_v59  ;;  %v2956_v52 = vld [vmem:[#allocation3 + $0xf0] sm:$0xff] }
 0x94b   : > { %v7766_v57 = vpop.eup %4825  ;;  %4851 = vpow2.f32 %v3057_v41 }
 0x94c   : > { %2527 = vst [vmem:[#allocation3 + $0x18] sm:$0xff] %v2511_v2  ;;  %v3151_v47 = vmul.f32 %v7766_v57, %v2951_v51  ;;  %v7775_v10 = vpop.eup %4827  ;;  %v8213_v2 = vld [vmem:[#allocation56_spill] sm:$0xff]  ;;  %4853 = vpow2.f32 %v3055_v60 }
 0x94d   : > { %v3149_v43 = vmul.f32 %v7775_v10, %v2949_v62  ;;  %v7787_v29 = vpop.eup %4829  ;;  %v8215_v16 = vsub.f32 %v8213_v2, %v8214_v24 }
 0x94e   : > { %v7792_v0 = vpop.eup %4831  ;;  %v3152_v55 = vmul.f32 %v7787_v29, %v2952_v49 }
 0x94f   : > { %v7798_v54 = vpop.eup %4833  ;;  %v3150_v20 = vmul.f32 %v7792_v0, %v2950_v8  ;;  %v3059_v50 = vmul.f32 1.442695, %v8215_v16  ;;  %v3201_v16 = vld [vmem:[#allocation4 + $0x98] sm:$0xff] }
 0x950   : > { %v7803_v36 = vpop.eup %4835  ;;  %v3155_v25 = vmul.f32 %v7798_v54, %v2955_v45  ;;  %v2962_v45 = vld [vmem:[#allocation3] sm:$0xff] }
 0x951   : > { %v7810_v38 = vpop.eup %4837  ;;  %v3153_v14 = vmul.f32 %v7803_v36, %v2953_v44  ;;  %4855 = vpow2.f32 %v3059_v50 }
 0x952   : > { %v7812_v42 = vpop.eup %4839  ;;  %v3156_v7 = vmul.f32 %v7810_v38, %v2956_v52 }
 0x953   : > { %v7819_v11 = vpop.eup %4841  ;;  %v3154_v35 = vmul.f32 %v7812_v42, %v2954_v6 }
 0x954   : > { %v7821_v4 = vpop.eup %4843  ;;  %v3159_v31 = vmul.f32 %v7819_v11, %v2959_v3  ;;  %v3217_v3 = vmul.f32 %v7787_v29, %v3201_v16 }
 0x955   : > { %v7825_v33 = vpop.eup %4845  ;;  %v3157_v62 = vmul.f32 %v7821_v4, %v2957_v15  ;;  %v3205_v15 = vld [vmem:[#allocation4 + $0xb8] sm:$0xff] }
 0x976   : > { %v3114_v18 = vpop.xlane.xlu0 %3113 }
 0x977   : > { %v3167_v23 = vadd.f32 %v3151_v47, %v3114_v18  ;;  %v2960_v47 = vld [vmem:[#allocation3 + $0xc0] sm:$0xff]  ;;  %v7827_v18 = vpop.eup %4847 }
 0x978   : > { %v7831_v61 = vpop.eup %4849  ;;  %v3158_v34 = vmul.f32 %v7827_v18, %v2958_v58  ;;  %v3206_v58 = vld [vmem:[#allocation4 + $0xc0] sm:$0xff] }
 0x979   : > { %3183 = vst [vmem:[#allocation3 + $0x50] sm:$0xff] %v3167_v23  ;;  %v3160_v23 = vmul.f32 %v7825_v33, %v2960_v47  ;;  %v7833_v49 = vpop.eup %4851  ;;  %v3161_v46 = vmul.f32 %v7831_v61, %v2961_v5 }
 0x97a   : > { %v3110_v28 = vpop.xlane.xlu0 %3109  ;;  %v7837_v48 = vpop.eup %4853 }
 0x97b   : > { %v3165_v30 = vadd.f32 %v3149_v43, %v3110_v28  ;;  %v3162_v26 = vmul.f32 %v7837_v48, %v2962_v45  ;;  %v7841_v41 = vpop.eup %4855 }
 0x97d   : > { %3181 = vst [vmem:[#allocation3 + $0x10] sm:$0xff] %v3165_v30 }
 0x97e   : > { %v3116_v56 = vpop.xlane.xlu1 %3115 }
 0x97f   : > { %v3168_v9 = vadd.f32 %v3152_v55, %v3116_v56  ;;  %v2963_v56 = vld [vmem:[#allocation3 + $0x28] sm:$0xff] }
 0x980   : > { %v3163_v12 = vmul.f32 %v7833_v49, %v2963_v56 }
 0x981   : > { %3184 = vst [vmem:[#allocation3 + $0xa0] sm:$0xff] %v3168_v9 }
 0x982   : > { %v3122_v53 = vpop.xlane.xlu0 %3121  ;;  %v3112_v17 = vpop.xlane.xlu1 %3111 }
 0x983   : > { %v3171_v19 = vadd.f32 %v3155_v25, %v3122_v53  ;;  %v3166_v13 = vadd.f32 %v3150_v20, %v3112_v17  ;;  %v2964_v25 = vld [vmem:[#allocation3 + $0x98] sm:$0xff] }
 0x984   : > { %v3164_v17 = vmul.f32 %v7841_v41, %v2964_v25  ;;  %v3213_v25 = vld [vmem:[#allocation4 + $0xf8] sm:$0xff] }
 0x985   : > { %3187 = vst [vmem:[#allocation3 + $0x20] sm:$0xff] %v3171_v19  ;;  %3182 = vst [vmem:[#allocation3 + $0x70] sm:$0xff] %v3166_v13  ;;  %v3200_v19 = vld [vmem:[#allocation4 + $0x90] sm:$0xff]  ;;  %v3198_v13 = vld [vmem:[#allocation4 + $0x80] sm:$0xff] }
 0x986   : > { %v3118_v21 = vpop.xlane.xlu0 %3117  ;;  %v3216_v2 = vmul.f32 %v7766_v57, %v3200_v19 }
 0x987   : > { %v3124_v22 = vpop.xlane.xlu1 %3123  ;;  %v3169_v27 = vadd.f32 %v3153_v14, %v3118_v21  ;;  %v3214_v14 = vmul.f32 %v7775_v10, %v3198_v13  ;;  %v3199_v21 = vld [vmem:[#allocation4 + $0x88] sm:$0xff] }
 0x988   : > { %v3172_v37 = vadd.f32 %v3156_v7, %v3124_v22 }
 0x989   : > { %3185 = vst [vmem:[#allocation3 + $0xd8] sm:$0xff] %v3169_v27  ;;  %v3204_v27 = vld [vmem:[#allocation4 + $0xb0] sm:$0xff] }
 0x98a   : > { %3188 = vst [vmem:[#allocation3 + $0xf0] sm:$0xff] %v3172_v37  ;;  %v3130_v51 = vpop.xlane.xlu0 %3129  ;;  %v3220_v10 = vmul.f32 %v7798_v54, %v3204_v27 }
 0x98b   : > { %v3120_v1 = vpop.xlane.xlu1 %3119  ;;  %v3175_v40 = vadd.f32 %v3159_v31, %v3130_v51  ;;  %v3215_v31 = vmul.f32 %v7792_v0, %v3199_v21  ;;  %v3221_v0 = vmul.f32 %v7810_v38, %v3205_v15  ;;  %v3222_v38 = vmul.f32 %v7821_v4, %v3206_v58 }
 0x98c   : > { %v3170_v32 = vadd.f32 %v3154_v35, %v3120_v1  ;;  %v3202_v35 = vld [vmem:[#allocation4 + $0xa0] sm:$0xff] }
 0x98d   : > { %3191 = vst [vmem:[#allocation3 + $0xf8] sm:$0xff] %v3175_v40  ;;  %v3218_v29 = vmul.f32 %v7803_v36, %v3202_v35 }
 0x98e   : > { %3186 = vst [vmem:[#allocation3 + $0x30] sm:$0xff] %v3170_v32  ;;  %v3126_v63 = vpop.xlane.xlu0 %3125  ;;  %v3203_v32 = vld [vmem:[#allocation4 + $0xa8] sm:$0xff] }
 0x98f   : > { %v3132_v43 = vpop.xlane.xlu1 %3131  ;;  %v3173_v28 = vadd.f32 %v3157_v62, %v3126_v63  ;;  %v3208_v63 = vld [vmem:[#allocation4 + $0xd0] sm:$0xff]  ;;  %v3219_v54 = vmul.f32 %v7812_v42, %v3203_v32 }
 0x990   : > { %v3176_v30 = vadd.f32 %v3160_v23, %v3132_v43  ;;  %v3224_v36 = vmul.f32 %v7819_v11, %v3208_v63 }
 0x991   : > { %3189 = vst [vmem:[#allocation3 + $0x88] sm:$0xff] %v3173_v28 }
 0x992   : > { %3192 = vst [vmem:[#allocation3 + $0xc0] sm:$0xff] %v3176_v30  ;;  %v3134_v59 = vpop.xlane.xlu0 %3133 }
 0x993   : > { %v3128_v55 = vpop.xlane.xlu1 %3127  ;;  %v3177_v8 = vadd.f32 %v3161_v46, %v3134_v59  ;;  %v3209_v46 = vld [vmem:[#allocation4 + $0xd8] sm:$0xff] }
 0x994   : > { %v3174_v9 = vadd.f32 %v3158_v34, %v3128_v55  ;;  %v3207_v55 = vld [vmem:[#allocation4 + $0xc8] sm:$0xff]  ;;  %v3225_v42 = vmul.f32 %v7825_v33, %v3209_v46 }
 0x995   : > { %3193 = vst [vmem:[#allocation3 + $0xb8] sm:$0xff] %v3177_v8  ;;  %v3212_v8 = vld [vmem:[#allocation4 + $0xf0] sm:$0xff]  ;;  %v3223_v11 = vmul.f32 %v7827_v18, %v3207_v55  ;;  %v3229_v18 = vmul.f32 %v7841_v41, %v3213_v25 }
 0x996   : > { %3190 = vst [vmem:[#allocation3 + $0x48] sm:$0xff] %v3174_v9  ;;  %v3138_v39 = vpop.xlane.xlu0 %3137  ;;  %v3228_v4 = vmul.f32 %v7833_v49, %v3212_v8 }
 0x997   : > { %v3136_v60 = vpop.xlane.xlu1 %3135  ;;  %v3179_v20 = vadd.f32 %v3163_v12, %v3138_v39 }
 0x998   : > { %v3178_v53 = vadd.f32 %v3162_v26, %v3136_v60  ;;  %v3210_v26 = vld [vmem:[#allocation4 + $0xe0] sm:$0xff] }
 0x999   : > { %3195 = vst [vmem:[#allocation3 + $0x28] sm:$0xff] %v3179_v20  ;;  %v3226_v33 = vmul.f32 %v7831_v61, %v3210_v26 }
 0x99a   : > { %3194 = vst [vmem:[#allocation3] sm:$0xff] %v3178_v53 }
 0x99b   : > { %v3140_v44 = vpop.xlane.xlu1 %3139 }
 0x99c   : > { %v3180_v52 = vadd.f32 %v3164_v17, %v3140_v44  ;;  %v3211_v17 = vld [vmem:[#allocation4 + $0xe8] sm:$0xff] }
 0x99d   : > { %v3227_v49 = vmul.f32 %v7837_v48, %v3211_v17 }
 0x99e   : > { %3196 = vst [vmem:[#allocation3 + $0x98] sm:$0xff] %v3180_v52 }
 0x9c5   : > { %v4334_v24 = vpop.f32.mrf.mxu0 }
 0x9c6   : > { %v3353_v50 = vadd.f32 %v4334_v24, %v3216_v2 }
 0x9c7   : > { %v3288_v7 = vpop.f32.mrf.mxu0 }
 0x9c8   : > { %3369 = vst.msk [vmem:[#allocation4 + $0x90] sm:$0xff] %vm2119_vm3, %v3353_v50  ;;  %v3351_v22 = vadd.f32 %v3288_v7, %v3214_v14 }
 0x9c9   : > { %v4335_v6 = vpop.f32.mrf.mxu0 }
 0x9ca   : > { %3367 = vst.msk [vmem:[#allocation4 + $0x80] sm:$0xff] %vm2119_vm3, %v3351_v22  ;;  %v3354_v37 = vadd.f32 %v4335_v6, %v3217_v3 }
 0x9cb   : > { %v3291_v57 = vpop.f32.mrf.mxu0 }
 0x9cc   : > { %3370 = vst.msk [vmem:[#allocation4 + $0x98] sm:$0xff] %vm2119_vm3, %v3354_v37  ;;  %v3352_v51 = vadd.f32 %v3291_v57, %v3215_v31 }
 0x9cd   : > { %v4338_v1 = vpop.f32.mrf.mxu0 }
 0x9ce   : > { %3368 = vst.msk [vmem:[#allocation4 + $0x88] sm:$0xff] %vm2119_vm3, %v3352_v51  ;;  %v3357_v47 = vadd.f32 %v4338_v1, %v3220_v10 }
 0x9cf   : > { %v3304_v40 = vpop.f32.mrf.mxu0 }
 0x9d0   : > { %3373 = vst.msk [vmem:[#allocation4 + $0xb0] sm:$0xff] %vm2119_vm3, %v3357_v47  ;;  %v3355_v62 = vadd.f32 %v3304_v40, %v3218_v29 }
 0x9d1   : > { %v4339_v23 = vpop.f32.mrf.mxu0 }
 0x9d2   : > { %3371 = vst.msk [vmem:[#allocation4 + $0xa0] sm:$0xff] %vm2119_vm3, %v3355_v62  ;;  %v3358_v43 = vadd.f32 %v4339_v23, %v3221_v0 }
 0x9d3   : > { %v3307_v5 = vpop.f32.mrf.mxu0 }
 0x9d4   : > { %3374 = vst.msk [vmem:[#allocation4 + $0xb8] sm:$0xff] %vm2119_vm3, %v3358_v43  ;;  %v3356_v28 = vadd.f32 %v3307_v5, %v3219_v54 }
 0x9d5   : > { %v4342_v30 = vpop.f32.mrf.mxu0 }
 0x9d6   : > { %3372 = vst.msk [vmem:[#allocation4 + $0xa8] sm:$0xff] %vm2119_vm3, %v3356_v28  ;;  %v3361_v34 = vadd.f32 %v4342_v30, %v3224_v36 }
 0x9d7   : > { %v3320_v59 = vpop.f32.mrf.mxu0 }
 0x9d8   : > { %3377 = vst.msk [vmem:[#allocation4 + $0xd0] sm:$0xff] %vm2119_vm3, %v3361_v34  ;;  %v3359_v56 = vadd.f32 %v3320_v59, %v3222_v38 }
 0x9d9   : > { %v4343_v45 = vpop.f32.mrf.mxu0 }
 0x9da   : > { %3375 = vst.msk [vmem:[#allocation4 + $0xc0] sm:$0xff] %vm2119_vm3, %v3359_v56  ;;  %v3362_v9 = vadd.f32 %v4343_v45, %v3225_v42 }
 0x9db   : > { %v3323_v12 = vpop.f32.mrf.mxu0 }
 0x9dc   : > { %3378 = vst.msk [vmem:[#allocation4 + $0xd8] sm:$0xff] %vm2119_vm3, %v3362_v9  ;;  %v3360_v39 = vadd.f32 %v3323_v12, %v3223_v11 }
 0x9dd   : > { %v4346_v60 = vpop.f32.mrf.mxu0 }
 0x9de   : > { %3376 = vst.msk [vmem:[#allocation4 + $0xc8] sm:$0xff] %vm2119_vm3, %v3360_v39  ;;  %v3365_v20 = vadd.f32 %v4346_v60, %v3228_v4 }
 0x9df   : > { %v3336_v53 = vpop.f32.mrf.mxu0 }
 0x9e0   : > { %3381 = vst.msk [vmem:[#allocation4 + $0xf0] sm:$0xff] %vm2119_vm3, %v3365_v20  ;;  %v3363_v44 = vadd.f32 %v3336_v53, %v3226_v33 }
 0x9e1   : > { %v4347_v52 = vpop.f32.mrf.mxu0 }
 0x9e2   : > { %3379 = vst.msk [vmem:[#allocation4 + $0xe0] sm:$0xff] %vm2119_vm3, %v3363_v44  ;;  %v3366_v19 = vadd.f32 %v4347_v52, %v3229_v18 }
 0x9e3   : > { %v3339_v13 = vpop.f32.mrf.mxu0 }
 0x9e4   : > { %3382 = vst.msk [vmem:[#allocation4 + $0xf8] sm:$0xff] %vm2119_vm3, %v3366_v19  ;;  %v3364_v2 = vadd.f32 %v3339_v13, %v3227_v49 }
 0x9e6   : > { %3380 = vst.msk [vmem:[#allocation4 + $0xe8] sm:$0xff] %vm2119_vm3, %v3364_v2 }
 0x9e7 PF: > { %s8216_s12 = sld [smem:[#allocation34_spill]] }
 0x9ed   : > { %s3399_s21 = sld [smem:[#allocation8 + %s8216_s12]] }
 0x9f3   : > { %p3941_p9 = scmp.ne.s32.totalorder %s3399_s21, 1 }
 0x9f4   : > { %s5242_s11 = smov (!%p3941_p9), 64  }
 0x9f5   : > { %3403 = sbr.rel (%p3941_p9) target bundleno = 2707 (0xa93), region = 60 }
 0x9fa   : > { %v3481_v61 = vld [vmem:[#allocation3 + $0xd8] sm:$0xff]  ;;  %v3482_v24 = vld [vmem:[#allocation3 + $0x30] sm:$0xff]  ;;  %v3483_v50 = vld [vmem:[#allocation3 + $0x20] sm:$0xff]  ;;  %vm3574_vm1 = vcmask 523264  }
 0x9fb   : > { %4857 = vrcp.f32 %v3481_v61  ;;  %v3477_v41 = vld [vmem:[#allocation3 + $0x10] sm:$0xff]  ;;  %v3480_v7 = vld [vmem:[#allocation3 + $0xa0] sm:$0xff]  ;;  %v3487_v21 = vld [vmem:[#allocation3 + $0xf8] sm:$0xff] }
 0x9fc   : > { %v3478_v16 = vld [vmem:[#allocation3 + $0x70] sm:$0xff]  ;;  %4859 = vrcp.f32 %v3482_v24  ;;  %v3488_v22 = vld [vmem:[#allocation3 + $0xc0] sm:$0xff]  ;;  %v3485_v3 = vld [vmem:[#allocation3 + $0x88] sm:$0xff] }
 0x9fd   : > { %4861 = vrcp.f32 %v3477_v41  ;;  %v3484_v48 = vld [vmem:[#allocation3 + $0xf0] sm:$0xff]  ;;  %v3486_v6 = vld [vmem:[#allocation3 + $0x48] sm:$0xff]  ;;  %v3492_v37 = vld [vmem:[#allocation3 + $0x98] sm:$0xff] }
 0x9fe   : > { %4863 = vrcp.f32 %v3478_v16  ;;  %v3479_v14 = vld [vmem:[#allocation3 + $0x50] sm:$0xff]  ;;  %v3491_v27 = vld [vmem:[#allocation3 + $0x28] sm:$0xff]  ;;  %v3514_v31 = vld [vmem:[#allocation4 + $0xa0] sm:$0xff] }
 0x9ff   : > { %4865 = vrcp.f32 %v3483_v50  ;;  %v3489_v57 = vld [vmem:[#allocation3 + $0xb8] sm:$0xff]  ;;  %v3515_v35 = vld [vmem:[#allocation4 + $0xa8] sm:$0xff]  ;;  %v3490_v51 = vld [vmem:[#allocation3] sm:$0xff] }
 0xa00   : > { %4867 = vrcp.f32 %v3484_v48  ;;  %v3510_v1 = vld [vmem:[#allocation4 + $0x80] sm:$0xff]  ;;  %v3511_v29 = vld [vmem:[#allocation4 + $0x88] sm:$0xff]  ;;  %v3516_v62 = vld [vmem:[#allocation4 + $0xb0] sm:$0xff] }
 0xa01   : > { %4869 = vrcp.f32 %v3479_v14  ;;  %v3517_v63 = vld [vmem:[#allocation4 + $0xb8] sm:$0xff]  ;;  %v3512_v58 = vld [vmem:[#allocation4 + $0x90] sm:$0xff]  ;;  %v3518_v11 = vld [vmem:[#allocation4 + $0xc0] sm:$0xff] }
 0xa02   : > { %4871 = vrcp.f32 %v3480_v7  ;;  %v3513_v30 = vld [vmem:[#allocation4 + $0x98] sm:$0xff]  ;;  %v3520_v59 = vld [vmem:[#allocation4 + $0xd0] sm:$0xff]  ;;  %v3519_v39 = vld [vmem:[#allocation4 + $0xc8] sm:$0xff] }
 0xa03   : > { %4873 = vrcp.f32 %v3487_v21  ;;  %v3521_v42 = vld [vmem:[#allocation4 + $0xd8] sm:$0xff]  ;;  %v3524_v20 = vld [vmem:[#allocation4 + $0xf0] sm:$0xff]  ;;  %v3522_v19 = vld [vmem:[#allocation4 + $0xe0] sm:$0xff] }
 0xa04   : > { %4875 = vrcp.f32 %v3488_v22  ;;  %v3525_v17 = vld [vmem:[#allocation4 + $0xf8] sm:$0xff]  ;;  %v3523_v2 = vld [vmem:[#allocation4 + $0xe8] sm:$0xff]  ;;  %v3409_v22 = vld [vmem:[#allocation3 + $0x90] sm:$0xff] }
 0xa05   : > { %4877 = vrcp.f32 %v3485_v3  ;;  %v3408_v21 = vld [vmem:[#allocation3 + $0x8] sm:$0xff]  ;;  %v3404_v3 = vld [vmem:[#allocation3 + $0x80] sm:$0xff] }
 0xa06   : > { %4879 = vrcp.f32 %v3486_v6  ;;  %v3405_v6 = vld [vmem:[#allocation3 + $0xc8] sm:$0xff] }
 0xa07   : > { %4881 = vrcp.f32 %v3491_v27  ;;  %v3410_v27 = vld [vmem:[#allocation3 + $0x58] sm:$0xff] }
 0xa08   : > { %v4858_v10 = vpop.eup %4857  ;;  %4883 = vrcp.f32 %v3492_v37  ;;  %v3411_v37 = vld [vmem:[#allocation3 + $0xa8] sm:$0xff] }
 0xa09   : > { %v4860_v15 = vpop.eup %4859  ;;  %v3530_v47 = vmul.f32 %v4858_v10, %v3514_v31  ;;  %4885 = vrcp.f32 %v3489_v57  ;;  %v3406_v31 = vld [vmem:[#allocation3 + $0xe8] sm:$0xff]  ;;  %v3407_v57 = vld [vmem:[#allocation3 + $0x78] sm:$0xff]  ;;  %v3412_v10 = vld [vmem:[#allocation3 + $0xd0] sm:$0xff] }
 0xa0a   : > { %v4862_v40 = vpop.eup %4861  ;;  %v3531_v32 = vmul.f32 %v4860_v15, %v3515_v35  ;;  %4887 = vrcp.f32 %v3490_v51  ;;  %v3414_v35 = vld [vmem:[#allocation3 + $0x38] sm:$0xff]  ;;  %v3415_v51 = vld [vmem:[#allocation3 + $0x40] sm:$0xff] }
 0xa0b   : > { %v4864_v0 = vpop.eup %4863  ;;  %v3526_v23 = vmul.f32 %v4862_v40, %v3510_v1  ;;  %4889 = vrcp.f32 %v3408_v21  ;;  %v3413_v1 = vld [vmem:[#allocation3 + $0xb0] sm:$0xff]  ;;  %v3418_v15 = vld [vmem:[#allocation3 + $0x18] sm:$0xff]  ;;  %v3417_v40 = vld [vmem:[#allocation3 + $0x60] sm:$0xff] }
 0xa0c   : > { %v4866_v43 = vpop.eup %4865  ;;  %v3544_v54 = vpack.c.bf16 %v3531_v32, %v3530_v47  ;;  %v3527_v5 = vmul.f32 %v4864_v0, %v3511_v29  ;;  %4891 = vrcp.f32 %v3409_v22  ;;  %v3419_v47 = vld [vmem:[#allocation3 + $0x68] sm:$0xff]  ;;  %v3416_v29 = vld [vmem:[#allocation3 + $0xe0] sm:$0xff] }
 0xa0d   : > { %v4868_v28 = vpop.eup %4867  ;;  %v3532_v36 = vmul.f32 %v4866_v43, %v3516_v62  ;;  %4893 = vrcp.f32 %v3404_v3  ;;  %v3440_v0 = vld [vmem:[#allocation4 + $0x20] sm:$0xff] }
 0xa0e   : > { %v4870_v46 = vpop.eup %4869  ;;  %3562 = vrot.lane.b32.xlu1 %v3544_v54, %s5242_s11  ;;  %v3542_v34 = vpack.c.bf16 %v3527_v5, %v3526_v23  ;;  %v3533_v38 = vmul.f32 %v4868_v28, %v3517_v63  ;;  %4895 = vrcp.f32 %v3405_v6  ;;  %v3441_v23 = vld [vmem:[#allocation4 + $0x28] sm:$0xff]  ;;  %v3436_v54 = vld [vmem:[#allocation4] sm:$0xff] }
 0xa0f   : > { %v4872_v55 = vpop.eup %4871  ;;  %v3528_v56 = vmul.f32 %v4870_v46, %v3512_v58  ;;  %4897 = vrcp.f32 %v3410_v27  ;;  %v3437_v5 = vld [vmem:[#allocation4 + $0x8] sm:$0xff]  ;;  %v3442_v46 = vld [vmem:[#allocation4 + $0x30] sm:$0xff] }
 0xa10   : > { %v4874_v45 = vpop.eup %4873  ;;  %3558 = vrot.lane.b32.xlu0 %v3542_v34, %s5242_s11  ;;  %v3545_v8 = vpack.c.bf16 %v3533_v38, %v3532_v36  ;;  %v3529_v9 = vmul.f32 %v4872_v55, %v3513_v30  ;;  %4899 = vrcp.f32 %v3411_v37  ;;  %v3443_v34 = vld [vmem:[#allocation4 + $0x38] sm:$0xff] }
 0xa11   : > { %v4876_v12 = vpop.eup %4875  ;;  %v3536_v26 = vmul.f32 %v4874_v45, %v3520_v59  ;;  %4901 = vrcp.f32 %v3406_v31  ;;  %v3439_v45 = vld [vmem:[#allocation4 + $0x18] sm:$0xff] }
 0xa12   : > { %v4878_v4 = vpop.eup %4877  ;;  %3564 = vrot.lane.b32.xlu1 %v3545_v8, %s5242_s11  ;;  %v3543_v60 = vpack.c.bf16 %v3529_v9, %v3528_v56  ;;  %v3537_v25 = vmul.f32 %v4876_v12, %v3521_v42  ;;  %4903 = vrcp.f32 %v3407_v57  ;;  %v3438_v42 = vld [vmem:[#allocation4 + $0x10] sm:$0xff]  ;;  %v3448_v57 = vld [vmem:[#allocation4 + $0x60] sm:$0xff] }
 0xa13   : > { %v4880_v33 = vpop.eup %4879  ;;  %v3534_v53 = vmul.f32 %v4878_v4, %v3518_v11  ;;  %4905 = vrcp.f32 %v3414_v35  ;;  %v3447_v4 = vld [vmem:[#allocation4 + $0x58] sm:$0xff]  ;;  %v3449_v35 = vld [vmem:[#allocation4 + $0x68] sm:$0xff] }
 0xa14   : > { %v4882_v44 = vpop.eup %4881  ;;  %3560 = vrot.lane.b32.xlu0 %v3543_v60, %s5242_s11  ;;  %v3547_v18 = vpack.c.bf16 %v3537_v25, %v3536_v26  ;;  %v3535_v52 = vmul.f32 %v4880_v33, %v3519_v39  ;;  %4907 = vrcp.f32 %v3415_v51  ;;  %v3446_v39 = vld [vmem:[#allocation4 + $0x50] sm:$0xff] }
 0xa15   : > { %v4884_v49 = vpop.eup %4883  ;;  %v3540_v13 = vmul.f32 %v4882_v44, %v3524_v20  ;;  %4909 = vrcp.f32 %v3412_v10  ;;  %v3444_v44 = vld [vmem:[#allocation4 + $0x40] sm:$0xff] }
 0xa16   : > { %v4886_v61 = vpop.eup %4885  ;;  %3568 = vrot.lane.b32.xlu1 %v3547_v18, %s5242_s11  ;;  %v3546_v24 = vpack.c.bf16 %v3535_v52, %v3534_v53  ;;  %v3541_v41 = vmul.f32 %v4884_v49, %v3525_v17  ;;  %4911 = vrcp.f32 %v3413_v1  ;;  %v3445_v18 = vld [vmem:[#allocation4 + $0x48] sm:$0xff] }
 0xa17   : > { %v4888_v16 = vpop.eup %4887  ;;  %v3538_v50 = vmul.f32 %v4886_v61, %v3522_v19  ;;  %4913 = vrcp.f32 %v3418_v15 }
 0xa18   : > { %3566 = vrot.lane.b32.xlu0 %v3546_v24, %s5242_s11  ;;  %v3549_v48 = vpack.c.bf16 %v3541_v41, %v3540_v13  ;;  %v3539_v14 = vmul.f32 %v4888_v16, %v3523_v2  ;;  %v4890_v32 = vpop.eup %4889  ;;  %4915 = vrcp.f32 %v3419_v47 }
 0xa19   : > { %v4892_v62 = vpop.eup %4891  ;;  %4917 = vrcp.f32 %v3416_v29  ;;  %v3456_v28 = vmul.f32 %v4890_v32, %v3440_v0 }
 0xa1a   : > { %3572 = vrot.lane.b32.xlu1 %v3549_v48, %s5242_s11  ;;  %v3548_v7 = vpack.c.bf16 %v3539_v14, %v3538_v50  ;;  %v4894_v63 = vpop.eup %4893  ;;  %4919 = vrcp.f32 %v3417_v40  ;;  %v3457_v36 = vmul.f32 %v4892_v62, %v3441_v23  ;;  %v3450_v50 = vld [vmem:[#allocation4 + $0x70] sm:$0xff]  ;;  %v3451_v48 = vld [vmem:[#allocation4 + $0x78] sm:$0xff] }
 0xa1b   : > { %v4896_v43 = vpop.eup %4895  ;;  %v3452_v59 = vmul.f32 %v4894_v63, %v3436_v54 }
 0xa1c   : > { %3570 = vrot.lane.b32.xlu0 %v3548_v7, %s5242_s11  ;;  %v4898_v58 = vpop.eup %4897  ;;  %v3453_v55 = vmul.f32 %v4896_v43, %v3437_v5  ;;  %v3470_v9 = vpack.c.bf16 %v3457_v36, %v3456_v28 }
 0xa1d   : > { %v4900_v30 = vpop.eup %4899  ;;  %v3458_v11 = vmul.f32 %v4898_v58, %v3442_v46 }
 0xa1e   : > { %v4902_v38 = vpop.eup %4901  ;;  %v3459_v12 = vmul.f32 %v4900_v30, %v3443_v34  ;;  %v3468_v25 = vpack.c.bf16 %v3453_v55, %v3452_v59 }
 0xa1f   : > { %v4904_v56 = vpop.eup %4903  ;;  %v3454_v20 = vmul.f32 %v4902_v38, %v3438_v42 }
 0xa20   : > { %v4906_v8 = vpop.eup %4905  ;;  %v3455_v33 = vmul.f32 %v4904_v56, %v3439_v45  ;;  %v3471_v49 = vpack.c.bf16 %v3459_v12, %v3458_v11 }
 0xa21   : > { %v4908_v26 = vpop.eup %4907  ;;  %v3462_v13 = vmul.f32 %v4906_v8, %v3446_v39 }
 0xa22   : > { %v4910_v60 = vpop.eup %4909  ;;  %v3463_v2 = vmul.f32 %v4908_v26, %v3447_v4  ;;  %v3469_v21 = vpack.c.bf16 %v3455_v33, %v3454_v20 }
 0xa23   : > { %v4912_v53 = vpop.eup %4911  ;;  %v3460_v22 = vmul.f32 %v4910_v60, %v3444_v44 }
 0xa24   : > { %v4914_v52 = vpop.eup %4913  ;;  %v3461_v3 = vmul.f32 %v4912_v53, %v3445_v18  ;;  %v3473_v10 = vpack.c.bf16 %v3463_v2, %v3462_v13 }
 0xa25   : > { %v4916_v61 = vpop.eup %4915  ;;  %v3466_v1 = vmul.f32 %v4914_v52, %v3450_v50 }
 0xa26   : > { %v4918_v14 = vpop.eup %4917  ;;  %v3467_v15 = vmul.f32 %v4916_v61, %v3451_v48  ;;  %v3472_v62 = vpack.c.bf16 %v3461_v3, %v3460_v22 }
 0xa27   : > { %v4920_v6 = vpop.eup %4919  ;;  %v3464_v0 = vmul.f32 %v4918_v14, %v3448_v57 }
 0xa28   : > { %v3465_v23 = vmul.f32 %v4920_v6, %v3449_v35  ;;  %v3475_v58 = vpack.c.bf16 %v3467_v15, %v3466_v1 }
 0xa2a   : > { %v3474_v34 = vpack.c.bf16 %v3465_v23, %v3464_v0 }
 0xa80   : > { %v3563_v17 = vpop.permute.xlu1 %3562 }
 0xa81   : > { %v3583_v19 = vsel %vm3574_vm1, %v3470_v9, %v3563_v17 }
 0xa82   : > { %v3946_v24 = vcombine.low %v3583_v19, %v3583_v19  ;;  %v3947_v41 = vcombine.high %v3583_v19, %v3583_v19  ;;  %v3559_v16 = vpop.permute.xlu0 %3558 }
 0xa83   : > { %v3577_v7 = vsel %vm3574_vm1, %v3468_v25, %v3559_v16 }
 0xa84   : > { %3659 = vst [vmem:[%s5693_s6 + $0x10] sm:$0xf] %v3946_v24  ;;  %3660 = vst [vmem:[%s5693_s6 + $0x14] sm:$0xf] %v3947_v41  ;;  %v3942_v27 = vcombine.low %v3577_v7, %v3577_v7  ;;  %v3943_v37 = vcombine.high %v3577_v7, %v3577_v7  ;;  %v3565_v31 = vpop.permute.xlu1 %3564 }
 0xa85   : > { %v3586_v51 = vsel %vm3574_vm1, %v3471_v49, %v3565_v31 }
 0xa86   : > { %3655 = vst [vmem:[%s5693_s6] sm:$0xf] %v3942_v27  ;;  %3656 = vst [vmem:[%s5693_s6 + $0x4] sm:$0xf] %v3943_v37  ;;  %v3948_v47 = vcombine.low %v3586_v51, %v3586_v51  ;;  %v3949_v29 = vcombine.high %v3586_v51, %v3586_v51  ;;  %v3561_v40 = vpop.permute.xlu0 %3560 }
 0xa87   : > { %v3580_v32 = vsel %vm3574_vm1, %v3469_v21, %v3561_v40 }
 0xa88   : > { %3661 = vst [vmem:[%s5693_s6 + $0x18] sm:$0xf] %v3948_v47  ;;  %3662 = vst [vmem:[%s5693_s6 + $0x1c] sm:$0xf] %v3949_v29  ;;  %v3944_v63 = vcombine.low %v3580_v32, %v3580_v32  ;;  %v3945_v43 = vcombine.high %v3580_v32, %v3580_v32  ;;  %v3569_v54 = vpop.permute.xlu1 %3568 }
 0xa89   : > { %v3592_v5 = vsel %vm3574_vm1, %v3473_v10, %v3569_v54 }
 0xa8a   : > { %3657 = vst [vmem:[%s5693_s6 + $0x8] sm:$0xf] %v3944_v63  ;;  %3658 = vst [vmem:[%s5693_s6 + $0xc] sm:$0xf] %v3945_v43  ;;  %v3952_v28 = vcombine.low %v3592_v5, %v3592_v5  ;;  %v3953_v36 = vcombine.high %v3592_v5, %v3592_v5  ;;  %v3567_v30 = vpop.permute.xlu0 %3566 }
 0xa8b   : > { %v3589_v46 = vsel %vm3574_vm1, %v3472_v62, %v3567_v30 }
 0xa8c   : > { %3665 = vst [vmem:[%s5693_s6 + $0x28] sm:$0xf] %v3952_v28  ;;  %3666 = vst [vmem:[%s5693_s6 + $0x2c] sm:$0xf] %v3953_v36  ;;  %v3950_v38 = vcombine.low %v3589_v46, %v3589_v46  ;;  %v3951_v59 = vcombine.high %v3589_v46, %v3589_v46  ;;  %v3573_v55 = vpop.permute.xlu1 %3572 }
 0xa8d   : > { %v3598_v56 = vsel %vm3574_vm1, %v3475_v58, %v3573_v55 }
 0xa8e   : > { %3663 = vst [vmem:[%s5693_s6 + $0x20] sm:$0xf] %v3950_v38  ;;  %3664 = vst [vmem:[%s5693_s6 + $0x24] sm:$0xf] %v3951_v59  ;;  %v3956_v42 = vcombine.low %v3598_v56, %v3598_v56  ;;  %v3957_v45 = vcombine.high %v3598_v56, %v3598_v56  ;;  %v3571_v8 = vpop.permute.xlu0 %3570 }
 0xa8f   : > { %v3595_v9 = vsel %vm3574_vm1, %v3474_v34, %v3571_v8 }
 0xa90   : > { %3669 = vst [vmem:[%s5693_s6 + $0x38] sm:$0xf] %v3956_v42  ;;  %3670 = vst [vmem:[%s5693_s6 + $0x3c] sm:$0xf] %v3957_v45  ;;  %v3954_v11 = vcombine.low %v3595_v9, %v3595_v9  ;;  %v3955_v12 = vcombine.high %v3595_v9, %v3595_v9 }
 0xa92   : > { %3667 = vst [vmem:[%s5693_s6 + $0x30] sm:$0xf] %v3954_v11  ;;  %3668 = vst [vmem:[%s5693_s6 + $0x34] sm:$0xf] %v3955_v12 }
 0xa93 PF: > { %s8217_s28 = sld [smem:[#allocation41_spill]]  ;;  %s3689_s9 = sshll.u32 %s5693_s6, 4  ;;  %s7916_s9 = int_to_ptr.vmem [resolvable:$true] %s3689_s9 }
 0xa94   : > { %s8219_s1 = sld [smem:[#allocation34_spill]]  ;;  %s7925_s10 = scalar_lea.sflag [#allocation12], %s338_s17 }
 0xa95   : > { %s8220_s5 = sld [smem:[#allocation35_spill]]  ;;  %s5049_s27 = scalar_lea.vmem %s7916_s9, 1024 }
 0xa96   : > { %s8222_s14 = sld [smem:[#allocation61_spill]]  ;;  %p5050_p3 = scmp.ne.s32.totalorder %s7916_s9, %s5049_s27 }
 0xa97   : > { %s5243_s6 = smov [#allocation16]  }
 0xa98   : > { %s5053_s12 = sshll.u32 %s5243_s6, 4  ;;  %s5054_s12 = int_to_ptr.vmem [resolvable:$false] %s5053_s12 }
 0xa99   : > { %p8218_p5 = scmp.ne.s32.totalorder %s8217_s28, 0  ;;  %s5055_s21 = scalar_lea.vmem %s5054_s12, 2048 }
 0xa9a   : > { %p5056_p10 = scmp.lt.s32.totalorder %s7916_s9, %s5054_s12  ;;  %p5057_p11 = scmp.lt.s32.totalorder %s5055_s21, %s5049_s27 }
 0xa9b   : > { %s4392_s15 = scalar_select %p8218_p5, [#allocation6], [#allocation20] }
 0xa9c   : > { %s8267_s1 = smov (!%p8218_p5, %s8219_s1), 0  ;;  %s3960_s3 = sshll.u32 %s8220_s5, 5 }
 0xa9d   : > { %s3679_s16 = sld [smem:[%s4392_s15 + %s8267_s1]]  ;;  %p5051_p6 = pnand %p5050_p3, %p8218_p5 }
 0xa9e   : > { %p5058_p1 = por %p5057_p11, %p5056_p10 }
 0xa9f   : > { %p5052_p13 = pneg %p5051_p6 }
 0xaa1   : > { %p5059_p7 = pnand %p5058_p1, %p5052_p13 }
 0xaa3   : > { %s3959_s2 = sshll.u32 %s3679_s16, 4 }
 0xaa4   : > { %s3686_s13 = sadd.s32 %s3960_s3, %s3959_s2 }
 0xaa5   : > { %s3961_s18 = sshll.u32 %s3686_s13, 6 }
 0xaa6   : > { %s7921_s0 = scalar_lea.hbm %s8222_s14, %s3961_s18 }
 0xaa7   : > { %5062 = shalt.err (!%p5059_p7)
}
 0xaa8   : > { %s5063_s17 = scalar_lea.hbm %s7921_s0, 1024  ;;  %s5067_s5 = scalar_lea.hbm %s8222_s14, 4096 }
 0xaa9   : > { %p5064_p12 = scmp.ne.s32.totalorder %s7921_s0, %s5063_s17  ;;  %p5068_p8 = scmp.lt.s32.totalorder %s7921_s0, %s8222_s14 }
 0xaaa   : > { %p5069_p0 = scmp.lt.s32.totalorder %s5067_s5, %s5063_s17 }
 0xaab   : > { %p5065_p4 = pnand %p5064_p12, %p8218_p5 }
 0xaac   : > { %p5070_p9 = por %p5069_p0, %p5068_p8 }
 0xaad   : > { %p5066_p2 = pneg %p5065_p4 }
 0xaaf   : > { %p5071_p3 = pnand %p5070_p9, %p5066_p2 }
 0xab1   : > { %5074 = shalt.err (!%p5071_p3)
}
 0xab2   : > { %s5244_s16 = smov 64   ;;  %s5245_s3 = smov 4  }
 0xab3   : > { %4394 = dma.vmem_to_hbm [thread:$0]  (%p8218_p5), %s7916_s9, 1024, %s7921_s0, %s7925_s10, %s5244_s16, %s5244_s16, %s5245_s3  }
 0xab4 PF: > { %s8223_s2 = sld [smem:[#allocation29_spill]]  ;;  %p4417_p6 = scmp.ge.s32.totalorder %s5227_s8, 2 }
 0xab5   : > { %s8224_s13 = sld [smem:[#allocation42_spill]] }
 0xaba   : > { %s3704_s18 = sand.u32 1, %s8223_s2  }
 0xabb   : > { %p8225_p13 = scmp.ne.s32.totalorder %s8224_s13, 0  ;;  %s3705_s30 = scalar_lea.sflag [#allocation12], %s3704_s18 }
 0xabd   : > { %p4413_p10 = pnand %p4417_p6, %p8225_p13 }
 0xabf   : > { %p4414_p11 = pneg %p4413_p10 }
 0xac1   : > { %5158 = dma.done.wait (%p4414_p11), %s3705_s30, 1024  }
 0xac2   : > { %5160 = vsyncadd (%p4414_p11), %s3705_s30, 4294966272  ;;  %s42_s8 = sadd.s32 1, %s5227_s8   ;;  %s8227_s3 = sld [smem:[#allocation30_spill]] }
 0xac3   : > { %p7953_p1 = scmp.ge.s32.totalorder %s42_s8, 8   ;;  %s8228_s16 = sld [smem:[#allocation31_spill]] }
 0xac4   : > { %s8229_s17 = sld [smem:[#allocation43_spill]]  ;;  %s8233_s0 = smov %s5541_s23 }
 0xac5   : > { %s8230_s21 = sld [smem:[#allocation32_spill]]  ;;  %s8237_s18 = smov %s5179_s19 }
 0xac6   : > { %s8231_s28 = sld [smem:[#allocation33_spill]]  ;;  %s8238_s19 = smov %s5183_s20 }
 0xac7   : > { %s8232_s9 = sld [smem:[#allocation40_spill]]  ;;  %s8239_s20 = smov %s5562_s22 }
 0xac8   : > { %s8234_s10 = sld [smem:[#allocation36_spill]]  ;;  %s8242_s24 = smov %s5203_s25 }
 0xac9   : > { %s8235_s6 = sld [smem:[#allocation37_spill]]  ;;  %s8243_s25 = smov %s5207_s26 }
 0xaca   : > { %s8236_s30 = sld [smem:[#allocation38_spill]]  ;;  %s8244_s26 = smov %s8233_s0 }
 0xacb   : > { %s8245_s27 = smov %s5219_s29  ;;  %41 = sbr.rel (!%p7953_p1) target bundleno = 52 (0x34), region = 125 }
 0xacc   : > { %s8240_s22 = smov %s8231_s28 }
 0xacd   : > { %s8241_s23 = smov %s8232_s9 }
 0xace   : > { %s8246_s28 = smov %s8234_s10 }
 0xacf   : > { %s8247_s29 = smov %s8235_s6 }
 0xad0   :  { %3710 = vsyncpa [#allocation11], 1 }
 0xad1   :  { %3712 = vsyncpa [#allocation11 + $0x1], 1 }
 0xad2   :  { %3713 = vsyncpa [#allocation14], 1 }
 0xad3   :  { %3715 = vsyncpa [#allocation14 + $0x1], 1 }
 0xad4   :  { %3716 = vsyncpa [#allocation12], 1 }
 0xad5   :  { %3718 = vsyncpa [#allocation12 + $0x1], 1 }

</bundles_post_ra>
